<compile_context>
chip_gen: v6e
topology: v6e:2x2x1
jax: 0.10.0
libtpu: 0.0.40
codegen_flags: <defaults>
</compile_context>

<pallas_src>
import functools

import jax
import jax.numpy as jnp
from jax.experimental import pallas as pl
from jax.experimental.pallas import tpu as pltpu

EPS = 1e-5
TM_MAX = 512  # preferred M tile (sweeps at 512/1024 measure ~85% of HBM roofline)


def _pick_tm(M):
    """Largest tile in {512,...,8} dividing M; tiny/odd M -> whole-array block."""
    for tm in (TM_MAX, 256, 128, 64, 32, 16, 8):
        if M % tm == 0:
            return tm
    return M  # block covers full M extent (no 8-alignment needed then)


# --------------------------------------------------------------------------
# Pallas kernel: matmul (bf16 in, f32 acc) + per-channel shift + LeakyReLU
# --------------------------------------------------------------------------
def _fused_matmul_kernel(a_ref, w_ref, shift_ref, o_ref, *, slope):
    acc = jnp.dot(a_ref[...], w_ref[...], preferred_element_type=jnp.float32)
    y = acc + shift_ref[...]            # f32 epilogue (v5e has no bf16 VPU path)
    if slope != 1.0:                    # static branch: skipped for residual/FC
        y = jnp.where(y >= 0.0, y, slope * y)
    o_ref[...] = y.astype(o_ref.dtype)


def fused_matmul(a, w, shift, slope, out_dtype=jnp.bfloat16):
    """out[M,N] = leaky_relu(a[M,K] @ w[K,N] + shift[N], slope).

    a, w are fed to the MXU as bf16; accumulation/epilogue are f32.
    No K/N padding: blocks span the full K and N extents.
    """
    M, K = a.shape
    K2, N = w.shape
    assert K == K2

    a = a.astype(jnp.bfloat16)
    w = w.astype(jnp.bfloat16)
    shift = shift.astype(jnp.float32).reshape(1, N)

    tm = _pick_tm(M)
    grid = (M // tm,)

    # VMEM per step (bf16): tm*K + K*N + tm*N  -> < 1 MiB for this config.
    # TODO(synk): add a K grid axis ("arbitrary" + f32 VMEM accumulator) before
    # scaling hidden_dims, to stay inside the 32 MiB scoped VMEM on v7x.
    return pl.pallas_call(
        functools.partial(_fused_matmul_kernel, slope=float(slope)),
        out_shape=jax.ShapeDtypeStruct((M, N), out_dtype),
        grid_spec=pltpu.PrefetchScalarGridSpec(
            num_scalar_prefetch=0,
            grid=grid,
            in_specs=[
                pl.BlockSpec((tm, K), lambda i: (i, 0)),
                pl.BlockSpec((K, N), lambda i: (0, 0)),   # resident weight block
                pl.BlockSpec((1, N), lambda i: (0, 0)),
            ],
            out_specs=pl.BlockSpec((tm, N), lambda i: (i, 0)),
        ),
        compiler_params=pltpu.CompilerParams(dimension_semantics=("parallel",)),
    )(a, w, shift)


# --------------------------------------------------------------------------
# Conv-as-matmul glue (im2col in plain JAX, compute in the Pallas kernel)
# --------------------------------------------------------------------------
def _im2col(x, stride):
    """x: (N, H, W, C) -> (N*OH*OW, 9*C) for a 3x3 conv with pad=1."""
    n, h, w, c = x.shape
    xp = jnp.pad(x, ((0, 0), (1, 1), (1, 1), (0, 0)))
    oh = (h + 2 - 3) // stride + 1
    ow = (w + 2 - 3) // stride + 1
    cols = []
    for kh in range(3):
        for kw in range(3):
            patch = xp[:, kh:kh + stride * (oh - 1) + 1:stride,
                          kw:kw + stride * (ow - 1) + 1:stride, :]
            cols.append(patch)
    cols = jnp.concatenate(cols, axis=-1)  # (N, OH, OW, 9*C)
    return cols.reshape(n * oh * ow, 9 * c), (n, oh, ow)


def conv_bn_lrelu(x, w, bias, bn, slope, stride):
    """x: NHWC (bf16). w: (3,3,Cin,Cout) f32. bn: (gamma,beta,mean,var) or None."""
    cout = w.shape[-1]
    cols, (n, oh, ow) = _im2col(x, stride)
    wmat = w.reshape(9 * w.shape[2], cout)
    if bn is not None:
        gamma, beta, mean, var = bn
        scale = gamma * jax.lax.rsqrt(var + EPS)
        wmat = wmat * scale[None, :]                # fold BN scale into W
        shift = (bias - mean) * scale + beta
    else:
        shift = bias
    y = fused_matmul(cols, wmat, shift, slope, out_dtype=jnp.bfloat16)
    return y.reshape(n, oh, ow, cout)


# --------------------------------------------------------------------------
# Parameter construction (deterministic, shapes per ResnetEncoder.__init__)
# --------------------------------------------------------------------------
def _bn_params(key, c):
    k1, k2, k3, k4 = jax.random.split(key, 4)
    gamma = 1.0 + 0.1 * jax.random.normal(k1, (c,), jnp.float32)
    beta = 0.1 * jax.random.normal(k2, (c,), jnp.float32)
    mean = 0.1 * jax.random.normal(k3, (c,), jnp.float32)
    var = jax.random.uniform(k4, (c,), jnp.float32, 0.5, 1.5)
    return (gamma, beta, mean, var)


def init_params(key, num_input_channels, hidden_dims, latent_dim):
    params = {"down": [], "res": []}
    in_ch = num_input_channels
    for h in hidden_dims:
        key, kw, kb, kbn = jax.random.split(key, 4)
        w = 0.1 * jax.random.normal(kw, (3, 3, in_ch, h), jnp.float32)
        b = 0.1 * jax.random.normal(kb, (h,), jnp.float32)
        params["down"].append({"w": w, "b": b, "bn": _bn_params(kbn, h)})
        in_ch = h
    # residual layers after block 2 (hidden_dims[2]) and block 4 (hidden_dims[4]);
    # their conv has no bias.
    for c in (hidden_dims[2], hidden_dims[4]):
        key, kw, kbn = jax.random.split(key, 3)
        w = 0.1 * jax.random.normal(kw, (3, 3, c, c), jnp.float32)
        params["res"].append({"w": w, "bn": _bn_params(kbn, c)})
    key, kw, kb = jax.random.split(key, 3)
    in_feat = hidden_dims[-1] * 16
    params["fc_w"] = 0.1 * jax.random.normal(kw, (in_feat, latent_dim), jnp.float32)
    params["fc_b"] = 0.1 * jax.random.normal(kb, (latent_dim,), jnp.float32)
    return params


# --------------------------------------------------------------------------
# Forward pass (mirrors ResnetEncoder.forward)
# --------------------------------------------------------------------------
def resnet_encoder_forward(params, x_nchw):
    x = jnp.transpose(x_nchw, (0, 2, 3, 1)).astype(jnp.bfloat16)  # NCHW -> NHWC

    def residual(x, p):
        # ResidualLayer: x + LeakyReLU(negative_slope=1)(BN(Conv(x, bias=False)))
        zero_b = jnp.zeros((p["w"].shape[-1],), jnp.float32)
        r = conv_bn_lrelu(x, p["w"], zero_b, p["bn"], slope=1.0, stride=1)
        return x + r

    # downsample blocks 0..2
    for i in range(0, 3):
        p = params["down"][i]
        x = conv_bn_lrelu(x, p["w"], p["b"], p["bn"], slope=0.01, stride=2)
    x = residual(x, params["res"][0])
    # downsample blocks 3..4
    for i in range(3, 5):
        p = params["down"][i]
        x = conv_bn_lrelu(x, p["w"], p["b"], p["bn"], slope=0.01, stride=2)
    x = residual(x, params["res"][1])
    # downsample block 5
    p = params["down"][5]
    x = conv_bn_lrelu(x, p["w"], p["b"], p["bn"], slope=0.01, stride=2)

    # Flatten exactly like torch (NCHW order), then Linear via the same kernel.
    n = x.shape[0]
    flat = jnp.transpose(x, (0, 3, 1, 2)).reshape(n, -1)
    z = fused_matmul(flat, params["fc_w"], params["fc_b"], slope=1.0,
                     out_dtype=jnp.float32)
    return z


if __name__ == "__main__":
    # Small channel config; spatial must be 256 because the module hardcodes
    # Linear(hidden_dims[-1] * 16, latent) after six stride-2 convs (256 -> 4).
    batch = 2
    num_input_channels = 3
    hidden_dims = [4, 8, 8, 16, 16, 32]
    latent_dim = 8

    key = jax.random.PRNGKey(0)
    kp, kx = jax.random.split(key)
    params = init_params(kp, num_input_channels, hidden_dims, latent_dim)
    x = jax.random.normal(kx, (batch, num_input_channels, 256, 256), jnp.float32)

    fwd = jax.jit(resnet_encoder_forward)
    z = fwd(params, x)
    z = jax.block_until_ready(z)
    assert z.shape == (batch, latent_dim), z.shape
    assert jnp.all(jnp.isfinite(z))
    print("KERNEL_OK")
</pallas_src>

<mosaic_0001>
module attributes {stable_mosaic.version = 11 : i64} {
  func.func @_fused_matmul_kernel(%arg0: i32, %arg1: memref<512x27xbf16, #tpu.memory_space<vmem>>, %arg2: memref<27x4xbf16, #tpu.memory_space<vmem>>, %arg3: memref<1x4xf32, #tpu.memory_space<vmem>>, %arg4: memref<512x4xbf16, #tpu.memory_space<vmem>>) attributes {dimension_semantics = [#tpu.dimension_semantics<parallel>], iteration_bounds = array<i64: 64>, scalar_prefetch = 0 : i64, scratch_operands = 0 : i64, tpu.core_type = #tpu.core_type<tc>, window_params = [{transform_indices = @transform_0, window_bounds = array<i64: 512, 27>}, {pipeline_mode = #tpu.pipeline_mode<synchronous>, transform_indices = @transform_1, window_bounds = array<i64: 27, 4>}, {pipeline_mode = #tpu.pipeline_mode<synchronous>, transform_indices = @transform_2, window_bounds = array<i64: 1, 4>}, {transform_indices = @transform_3, window_bounds = array<i64: 512, 4>}]} {
    %c0 = arith.constant 0 : index
    %c0_0 = arith.constant 0 : index
    %0 = vector.load %arg1[%c0, %c0_0] : memref<512x27xbf16, #tpu.memory_space<vmem>>, vector<512x27xbf16>
    %c0_1 = arith.constant 0 : index
    %c0_2 = arith.constant 0 : index
    %1 = vector.load %arg2[%c0_1, %c0_2] : memref<27x4xbf16, #tpu.memory_space<vmem>>, vector<27x4xbf16>
    %cst = arith.constant dense<0.000000e+00> : vector<512x4xf32>
    %2 = tpu.matmul %0, %1, %cst {dimension_numbers = #tpu.dot_dimension_numbers<[1], [0], [0], [1], [0, 0, 1, 1], [], []>} : vector<512x27xbf16>, vector<27x4xbf16>, vector<512x4xf32> -> vector<512x4xf32>
    %c0_3 = arith.constant 0 : index
    %c0_4 = arith.constant 0 : index
    %3 = vector.load %arg3[%c0_3, %c0_4] : memref<1x4xf32, #tpu.memory_space<vmem>>, vector<1x4xf32>
    %4 = vector.broadcast %3 : vector<1x4xf32> to vector<512x4xf32>
    %5 = arith.addf %2, %4 : vector<512x4xf32>
    %cst_5 = arith.constant 0.000000e+00 : f32
    %6 = vector.broadcast %cst_5 : f32 to vector<512x4xf32>
    %7 = arith.cmpf oge, %5, %6 : vector<512x4xf32>
    %cst_6 = arith.constant 0.00999999977 : f32
    %8 = vector.broadcast %cst_6 : f32 to vector<512x4xf32>
    %9 = arith.mulf %8, %5 : vector<512x4xf32>
    %10 = arith.select %7, %5, %9 : vector<512x4xi1>, vector<512x4xf32>
    %11 = arith.truncf %10 : vector<512x4xf32> to vector<512x4xbf16>
    %c0_7 = arith.constant 0 : index
    %c0_8 = arith.constant 0 : index
    %12 = vector.load %arg4[%c0_7, %c0_8] : memref<512x4xbf16, #tpu.memory_space<vmem>>, vector<512x4xbf16>
    tpu.vector_store %arg4[%c0_7, %c0_8], %11 {strides = array<i32>} : memref<512x4xbf16, #tpu.memory_space<vmem>>, vector<512x4xbf16>,
    return
  }
  func.func @transform_0(%arg0: i32) -> (i32, i32) {
    %c0_i32 = arith.constant 0 : i32
    %c0_i32_0 = arith.constant 0 : i32
    return %arg0, %c0_i32 : i32, i32
  }
  func.func @transform_1(%arg0: i32) -> (i32, i32) {
    %c0_i32 = arith.constant 0 : i32
    %c0_i32_0 = arith.constant 0 : i32
    %c0_i32_1 = arith.constant 0 : i32
    return %c0_i32, %c0_i32_0 : i32, i32
  }
  func.func @transform_2(%arg0: i32) -> (i32, i32) {
    %c0_i32 = arith.constant 0 : i32
    %c0_i32_0 = arith.constant 0 : i32
    %c0_i32_1 = arith.constant 0 : i32
    return %c0_i32, %c0_i32_0 : i32, i32
  }
  func.func @transform_3(%arg0: i32) -> (i32, i32) {
    %c0_i32 = arith.constant 0 : i32
    %c0_i32_0 = arith.constant 0 : i32
    return %arg0, %c0_i32 : i32, i32
  }
}

module attributes {stable_mosaic.version = 11 : i64} {
  func.func @_fused_matmul_kernel(%arg0: i32, %arg1: memref<512x36xbf16, #tpu.memory_space<vmem>>, %arg2: memref<36x8xbf16, #tpu.memory_space<vmem>>, %arg3: memref<1x8xf32, #tpu.memory_space<vmem>>, %arg4: memref<512x8xbf16, #tpu.memory_space<vmem>>) attributes {dimension_semantics = [#tpu.dimension_semantics<parallel>], iteration_bounds = array<i64: 16>, scalar_prefetch = 0 : i64, scratch_operands = 0 : i64, tpu.core_type = #tpu.core_type<tc>, window_params = [{transform_indices = @transform_0, window_bounds = array<i64: 512, 36>}, {pipeline_mode = #tpu.pipeline_mode<synchronous>, transform_indices = @transform_1, window_bounds = array<i64: 36, 8>}, {pipeline_mode = #tpu.pipeline_mode<synchronous>, transform_indices = @transform_2, window_bounds = array<i64: 1, 8>}, {transform_indices = @transform_3, window_bounds = array<i64: 512, 8>}]} {
    %c0 = arith.constant 0 : index
    %c0_0 = arith.constant 0 : index
    %0 = vector.load %arg1[%c0, %c0_0] : memref<512x36xbf16, #tpu.memory_space<vmem>>, vector<512x36xbf16>
    %c0_1 = arith.constant 0 : index
    %c0_2 = arith.constant 0 : index
    %1 = vector.load %arg2[%c0_1, %c0_2] : memref<36x8xbf16, #tpu.memory_space<vmem>>, vector<36x8xbf16>
    %cst = arith.constant dense<0.000000e+00> : vector<512x8xf32>
    %2 = tpu.matmul %0, %1, %cst {dimension_numbers = #tpu.dot_dimension_numbers<[1], [0], [0], [1], [0, 0, 1, 1], [], []>} : vector<512x36xbf16>, vector<36x8xbf16>, vector<512x8xf32> -> vector<512x8xf32>
    %c0_3 = arith.constant 0 : index
    %c0_4 = arith.constant 0 : index
    %3 = vector.load %arg3[%c0_3, %c0_4] : memref<1x8xf32, #tpu.memory_space<vmem>>, vector<1x8xf32>
    %4 = vector.broadcast %3 : vector<1x8xf32> to vector<512x8xf32>
    %5 = arith.addf %2, %4 : vector<512x8xf32>
    %cst_5 = arith.constant 0.000000e+00 : f32
    %6 = vector.broadcast %cst_5 : f32 to vector<512x8xf32>
    %7 = arith.cmpf oge, %5, %6 : vector<512x8xf32>
    %cst_6 = arith.constant 0.00999999977 : f32
    %8 = vector.broadcast %cst_6 : f32 to vector<512x8xf32>
    %9 = arith.mulf %8, %5 : vector<512x8xf32>
    %10 = arith.select %7, %5, %9 : vector<512x8xi1>, vector<512x8xf32>
    %11 = arith.truncf %10 : vector<512x8xf32> to vector<512x8xbf16>
    %c0_7 = arith.constant 0 : index
    %c0_8 = arith.constant 0 : index
    %12 = vector.load %arg4[%c0_7, %c0_8] : memref<512x8xbf16, #tpu.memory_space<vmem>>, vector<512x8xbf16>
    tpu.vector_store %arg4[%c0_7, %c0_8], %11 {strides = array<i32>} : memref<512x8xbf16, #tpu.memory_space<vmem>>, vector<512x8xbf16>,
    return
  }
  func.func @transform_0(%arg0: i32) -> (i32, i32) {
    %c0_i32 = arith.constant 0 : i32
    %c0_i32_0 = arith.constant 0 : i32
    return %arg0, %c0_i32 : i32, i32
  }
  func.func @transform_1(%arg0: i32) -> (i32, i32) {
    %c0_i32 = arith.constant 0 : i32
    %c0_i32_0 = arith.constant 0 : i32
    %c0_i32_1 = arith.constant 0 : i32
    return %c0_i32, %c0_i32_0 : i32, i32
  }
  func.func @transform_2(%arg0: i32) -> (i32, i32) {
    %c0_i32 = arith.constant 0 : i32
    %c0_i32_0 = arith.constant 0 : i32
    %c0_i32_1 = arith.constant 0 : i32
    return %c0_i32, %c0_i32_0 : i32, i32
  }
  func.func @transform_3(%arg0: i32) -> (i32, i32) {
    %c0_i32 = arith.constant 0 : i32
    %c0_i32_0 = arith.constant 0 : i32
    return %arg0, %c0_i32 : i32, i32
  }
}

module attributes {stable_mosaic.version = 11 : i64} {
  func.func @_fused_matmul_kernel(%arg0: i32, %arg1: memref<512x72xbf16, #tpu.memory_space<vmem>>, %arg2: memref<72x8xbf16, #tpu.memory_space<vmem>>, %arg3: memref<1x8xf32, #tpu.memory_space<vmem>>, %arg4: memref<512x8xbf16, #tpu.memory_space<vmem>>) attributes {dimension_semantics = [#tpu.dimension_semantics<parallel>], iteration_bounds = array<i64: 4>, scalar_prefetch = 0 : i64, scratch_operands = 0 : i64, tpu.core_type = #tpu.core_type<tc>, window_params = [{transform_indices = @transform_0, window_bounds = array<i64: 512, 72>}, {pipeline_mode = #tpu.pipeline_mode<synchronous>, transform_indices = @transform_1, window_bounds = array<i64: 72, 8>}, {pipeline_mode = #tpu.pipeline_mode<synchronous>, transform_indices = @transform_2, window_bounds = array<i64: 1, 8>}, {transform_indices = @transform_3, window_bounds = array<i64: 512, 8>}]} {
    %c0 = arith.constant 0 : index
    %c0_0 = arith.constant 0 : index
    %0 = vector.load %arg1[%c0, %c0_0] : memref<512x72xbf16, #tpu.memory_space<vmem>>, vector<512x72xbf16>
    %c0_1 = arith.constant 0 : index
    %c0_2 = arith.constant 0 : index
    %1 = vector.load %arg2[%c0_1, %c0_2] : memref<72x8xbf16, #tpu.memory_space<vmem>>, vector<72x8xbf16>
    %cst = arith.constant dense<0.000000e+00> : vector<512x8xf32>
    %2 = tpu.matmul %0, %1, %cst {dimension_numbers = #tpu.dot_dimension_numbers<[1], [0], [0], [1], [0, 0, 1, 1], [], []>} : vector<512x72xbf16>, vector<72x8xbf16>, vector<512x8xf32> -> vector<512x8xf32>
    %c0_3 = arith.constant 0 : index
    %c0_4 = arith.constant 0 : index
    %3 = vector.load %arg3[%c0_3, %c0_4] : memref<1x8xf32, #tpu.memory_space<vmem>>, vector<1x8xf32>
    %4 = vector.broadcast %3 : vector<1x8xf32> to vector<512x8xf32>
    %5 = arith.addf %2, %4 : vector<512x8xf32>
    %cst_5 = arith.constant 0.000000e+00 : f32
    %6 = vector.broadcast %cst_5 : f32 to vector<512x8xf32>
    %7 = arith.cmpf oge, %5, %6 : vector<512x8xf32>
    %cst_6 = arith.constant 0.00999999977 : f32
    %8 = vector.broadcast %cst_6 : f32 to vector<512x8xf32>
    %9 = arith.mulf %8, %5 : vector<512x8xf32>
    %10 = arith.select %7, %5, %9 : vector<512x8xi1>, vector<512x8xf32>
    %11 = arith.truncf %10 : vector<512x8xf32> to vector<512x8xbf16>
    %c0_7 = arith.constant 0 : index
    %c0_8 = arith.constant 0 : index
    %12 = vector.load %arg4[%c0_7, %c0_8] : memref<512x8xbf16, #tpu.memory_space<vmem>>, vector<512x8xbf16>
    tpu.vector_store %arg4[%c0_7, %c0_8], %11 {strides = array<i32>} : memref<512x8xbf16, #tpu.memory_space<vmem>>, vector<512x8xbf16>,
    return
  }
  func.func @transform_0(%arg0: i32) -> (i32, i32) {
    %c0_i32 = arith.constant 0 : i32
    %c0_i32_0 = arith.constant 0 : i32
    return %arg0, %c0_i32 : i32, i32
  }
  func.func @transform_1(%arg0: i32) -> (i32, i32) {
    %c0_i32 = arith.constant 0 : i32
    %c0_i32_0 = arith.constant 0 : i32
    %c0_i32_1 = arith.constant 0 : i32
    return %c0_i32, %c0_i32_0 : i32, i32
  }
  func.func @transform_2(%arg0: i32) -> (i32, i32) {
    %c0_i32 = arith.constant 0 : i32
    %c0_i32_0 = arith.constant 0 : i32
    %c0_i32_1 = arith.constant 0 : i32
    return %c0_i32, %c0_i32_0 : i32, i32
  }
  func.func @transform_3(%arg0: i32) -> (i32, i32) {
    %c0_i32 = arith.constant 0 : i32
    %c0_i32_0 = arith.constant 0 : i32
    return %arg0, %c0_i32 : i32, i32
  }
}

module attributes {stable_mosaic.version = 11 : i64} {
  func.func @_fused_matmul_kernel(%arg0: i32, %arg1: memref<512x72xbf16, #tpu.memory_space<vmem>>, %arg2: memref<72x8xbf16, #tpu.memory_space<vmem>>, %arg3: memref<1x8xf32, #tpu.memory_space<vmem>>, %arg4: memref<512x8xbf16, #tpu.memory_space<vmem>>) attributes {dimension_semantics = [#tpu.dimension_semantics<parallel>], iteration_bounds = array<i64: 4>, scalar_prefetch = 0 : i64, scratch_operands = 0 : i64, tpu.core_type = #tpu.core_type<tc>, window_params = [{transform_indices = @transform_0, window_bounds = array<i64: 512, 72>}, {pipeline_mode = #tpu.pipeline_mode<synchronous>, transform_indices = @transform_1, window_bounds = array<i64: 72, 8>}, {pipeline_mode = #tpu.pipeline_mode<synchronous>, transform_indices = @transform_2, window_bounds = array<i64: 1, 8>}, {transform_indices = @transform_3, window_bounds = array<i64: 512, 8>}]} {
    %c0 = arith.constant 0 : index
    %c0_0 = arith.constant 0 : index
    %0 = vector.load %arg1[%c0, %c0_0] : memref<512x72xbf16, #tpu.memory_space<vmem>>, vector<512x72xbf16>
    %c0_1 = arith.constant 0 : index
    %c0_2 = arith.constant 0 : index
    %1 = vector.load %arg2[%c0_1, %c0_2] : memref<72x8xbf16, #tpu.memory_space<vmem>>, vector<72x8xbf16>
    %cst = arith.constant dense<0.000000e+00> : vector<512x8xf32>
    %2 = tpu.matmul %0, %1, %cst {dimension_numbers = #tpu.dot_dimension_numbers<[1], [0], [0], [1], [0, 0, 1, 1], [], []>} : vector<512x72xbf16>, vector<72x8xbf16>, vector<512x8xf32> -> vector<512x8xf32>
    %c0_3 = arith.constant 0 : index
    %c0_4 = arith.constant 0 : index
    %3 = vector.load %arg3[%c0_3, %c0_4] : memref<1x8xf32, #tpu.memory_space<vmem>>, vector<1x8xf32>
    %4 = vector.broadcast %3 : vector<1x8xf32> to vector<512x8xf32>
    %5 = arith.addf %2, %4 : vector<512x8xf32>
    %6 = arith.truncf %5 : vector<512x8xf32> to vector<512x8xbf16>
    %c0_5 = arith.constant 0 : index
    %c0_6 = arith.constant 0 : index
    %7 = vector.load %arg4[%c0_5, %c0_6] : memref<512x8xbf16, #tpu.memory_space<vmem>>, vector<512x8xbf16>
    tpu.vector_store %arg4[%c0_5, %c0_6], %6 {strides = array<i32>} : memref<512x8xbf16, #tpu.memory_space<vmem>>, vector<512x8xbf16>,
    return
  }
  func.func @transform_0(%arg0: i32) -> (i32, i32) {
    %c0_i32 = arith.constant 0 : i32
    %c0_i32_0 = arith.constant 0 : i32
    return %arg0, %c0_i32 : i32, i32
  }
  func.func @transform_1(%arg0: i32) -> (i32, i32) {
    %c0_i32 = arith.constant 0 : i32
    %c0_i32_0 = arith.constant 0 : i32
    %c0_i32_1 = arith.constant 0 : i32
    return %c0_i32, %c0_i32_0 : i32, i32
  }
  func.func @transform_2(%arg0: i32) -> (i32, i32) {
    %c0_i32 = arith.constant 0 : i32
    %c0_i32_0 = arith.constant 0 : i32
    %c0_i32_1 = arith.constant 0 : i32
    return %c0_i32, %c0_i32_0 : i32, i32
  }
  func.func @transform_3(%arg0: i32) -> (i32, i32) {
    %c0_i32 = arith.constant 0 : i32
    %c0_i32_0 = arith.constant 0 : i32
    return %arg0, %c0_i32 : i32, i32
  }
}

module attributes {stable_mosaic.version = 11 : i64} {
  func.func @_fused_matmul_kernel(%arg0: i32, %arg1: memref<512x72xbf16, #tpu.memory_space<vmem>>, %arg2: memref<72x16xbf16, #tpu.memory_space<vmem>>, %arg3: memref<1x16xf32, #tpu.memory_space<vmem>>, %arg4: memref<512x16xbf16, #tpu.memory_space<vmem>>) attributes {dimension_semantics = [#tpu.dimension_semantics<parallel>], iteration_bounds = array<i64: 1>, scalar_prefetch = 0 : i64, scratch_operands = 0 : i64, tpu.core_type = #tpu.core_type<tc>, window_params = [{transform_indices = @transform_0, window_bounds = array<i64: 512, 72>}, {pipeline_mode = #tpu.pipeline_mode<synchronous>, transform_indices = @transform_1, window_bounds = array<i64: 72, 16>}, {pipeline_mode = #tpu.pipeline_mode<synchronous>, transform_indices = @transform_2, window_bounds = array<i64: 1, 16>}, {transform_indices = @transform_3, window_bounds = array<i64: 512, 16>}]} {
    %c0 = arith.constant 0 : index
    %c0_0 = arith.constant 0 : index
    %0 = vector.load %arg1[%c0, %c0_0] : memref<512x72xbf16, #tpu.memory_space<vmem>>, vector<512x72xbf16>
    %c0_1 = arith.constant 0 : index
    %c0_2 = arith.constant 0 : index
    %1 = vector.load %arg2[%c0_1, %c0_2] : memref<72x16xbf16, #tpu.memory_space<vmem>>, vector<72x16xbf16>
    %cst = arith.constant dense<0.000000e+00> : vector<512x16xf32>
    %2 = tpu.matmul %0, %1, %cst {dimension_numbers = #tpu.dot_dimension_numbers<[1], [0], [0], [1], [0, 0, 1, 1], [], []>} : vector<512x72xbf16>, vector<72x16xbf16>, vector<512x16xf32> -> vector<512x16xf32>
    %c0_3 = arith.constant 0 : index
    %c0_4 = arith.constant 0 : index
    %3 = vector.load %arg3[%c0_3, %c0_4] : memref<1x16xf32, #tpu.memory_space<vmem>>, vector<1x16xf32>
    %4 = vector.broadcast %3 : vector<1x16xf32> to vector<512x16xf32>
    %5 = arith.addf %2, %4 : vector<512x16xf32>
    %cst_5 = arith.constant 0.000000e+00 : f32
    %6 = vector.broadcast %cst_5 : f32 to vector<512x16xf32>
    %7 = arith.cmpf oge, %5, %6 : vector<512x16xf32>
    %cst_6 = arith.constant 0.00999999977 : f32
    %8 = vector.broadcast %cst_6 : f32 to vector<512x16xf32>
    %9 = arith.mulf %8, %5 : vector<512x16xf32>
    %10 = arith.select %7, %5, %9 : vector<512x16xi1>, vector<512x16xf32>
    %11 = arith.truncf %10 : vector<512x16xf32> to vector<512x16xbf16>
    %c0_7 = arith.constant 0 : index
    %c0_8 = arith.constant 0 : index
    %12 = vector.load %arg4[%c0_7, %c0_8] : memref<512x16xbf16, #tpu.memory_space<vmem>>, vector<512x16xbf16>
    tpu.vector_store %arg4[%c0_7, %c0_8], %11 {strides = array<i32>} : memref<512x16xbf16, #tpu.memory_space<vmem>>, vector<512x16xbf16>,
    return
  }
  func.func @transform_0(%arg0: i32) -> (i32, i32) {
    %c0_i32 = arith.constant 0 : i32
    %c0_i32_0 = arith.constant 0 : i32
    return %arg0, %c0_i32 : i32, i32
  }
  func.func @transform_1(%arg0: i32) -> (i32, i32) {
    %c0_i32 = arith.constant 0 : i32
    %c0_i32_0 = arith.constant 0 : i32
    %c0_i32_1 = arith.constant 0 : i32
    return %c0_i32, %c0_i32_0 : i32, i32
  }
  func.func @transform_2(%arg0: i32) -> (i32, i32) {
    %c0_i32 = arith.constant 0 : i32
    %c0_i32_0 = arith.constant 0 : i32
    %c0_i32_1 = arith.constant 0 : i32
    return %c0_i32, %c0_i32_0 : i32, i32
  }
  func.func @transform_3(%arg0: i32) -> (i32, i32) {
    %c0_i32 = arith.constant 0 : i32
    %c0_i32_0 = arith.constant 0 : i32
    return %arg0, %c0_i32 : i32, i32
  }
}

module attributes {stable_mosaic.version = 11 : i64} {
  func.func @_fused_matmul_kernel(%arg0: i32, %arg1: memref<128x144xbf16, #tpu.memory_space<vmem>>, %arg2: memref<144x16xbf16, #tpu.memory_space<vmem>>, %arg3: memref<1x16xf32, #tpu.memory_space<vmem>>, %arg4: memref<128x16xbf16, #tpu.memory_space<vmem>>) attributes {dimension_semantics = [#tpu.dimension_semantics<parallel>], iteration_bounds = array<i64: 1>, scalar_prefetch = 0 : i64, scratch_operands = 0 : i64, tpu.core_type = #tpu.core_type<tc>, window_params = [{transform_indices = @transform_0, window_bounds = array<i64: 128, 144>}, {pipeline_mode = #tpu.pipeline_mode<synchronous>, transform_indices = @transform_1, window_bounds = array<i64: 144, 16>}, {pipeline_mode = #tpu.pipeline_mode<synchronous>, transform_indices = @transform_2, window_bounds = array<i64: 1, 16>}, {transform_indices = @transform_3, window_bounds = array<i64: 128, 16>}]} {
    %c0 = arith.constant 0 : index
    %c0_0 = arith.constant 0 : index
    %0 = vector.load %arg1[%c0, %c0_0] : memref<128x144xbf16, #tpu.memory_space<vmem>>, vector<128x144xbf16>
    %c0_1 = arith.constant 0 : index
    %c0_2 = arith.constant 0 : index
    %1 = vector.load %arg2[%c0_1, %c0_2] : memref<144x16xbf16, #tpu.memory_space<vmem>>, vector<144x16xbf16>
    %cst = arith.constant dense<0.000000e+00> : vector<128x16xf32>
    %2 = tpu.matmul %0, %1, %cst {dimension_numbers = #tpu.dot_dimension_numbers<[1], [0], [0], [1], [0, 0, 1, 1], [], []>} : vector<128x144xbf16>, vector<144x16xbf16>, vector<128x16xf32> -> vector<128x16xf32>
    %c0_3 = arith.constant 0 : index
    %c0_4 = arith.constant 0 : index
    %3 = vector.load %arg3[%c0_3, %c0_4] : memref<1x16xf32, #tpu.memory_space<vmem>>, vector<1x16xf32>
    %4 = vector.broadcast %3 : vector<1x16xf32> to vector<128x16xf32>
    %5 = arith.addf %2, %4 : vector<128x16xf32>
    %cst_5 = arith.constant 0.000000e+00 : f32
    %6 = vector.broadcast %cst_5 : f32 to vector<128x16xf32>
    %7 = arith.cmpf oge, %5, %6 : vector<128x16xf32>
    %cst_6 = arith.constant 0.00999999977 : f32
    %8 = vector.broadcast %cst_6 : f32 to vector<128x16xf32>
    %9 = arith.mulf %8, %5 : vector<128x16xf32>
    %10 = arith.select %7, %5, %9 : vector<128x16xi1>, vector<128x16xf32>
    %11 = arith.truncf %10 : vector<128x16xf32> to vector<128x16xbf16>
    %c0_7 = arith.constant 0 : index
    %c0_8 = arith.constant 0 : index
    %12 = vector.load %arg4[%c0_7, %c0_8] : memref<128x16xbf16, #tpu.memory_space<vmem>>, vector<128x16xbf16>
    tpu.vector_store %arg4[%c0_7, %c0_8], %11 {strides = array<i32>} : memref<128x16xbf16, #tpu.memory_space<vmem>>, vector<128x16xbf16>,
    return
  }
  func.func @transform_0(%arg0: i32) -> (i32, i32) {
    %c0_i32 = arith.constant 0 : i32
    %c0_i32_0 = arith.constant 0 : i32
    return %arg0, %c0_i32 : i32, i32
  }
  func.func @transform_1(%arg0: i32) -> (i32, i32) {
    %c0_i32 = arith.constant 0 : i32
    %c0_i32_0 = arith.constant 0 : i32
    %c0_i32_1 = arith.constant 0 : i32
    return %c0_i32, %c0_i32_0 : i32, i32
  }
  func.func @transform_2(%arg0: i32) -> (i32, i32) {
    %c0_i32 = arith.constant 0 : i32
    %c0_i32_0 = arith.constant 0 : i32
    %c0_i32_1 = arith.constant 0 : i32
    return %c0_i32, %c0_i32_0 : i32, i32
  }
  func.func @transform_3(%arg0: i32) -> (i32, i32) {
    %c0_i32 = arith.constant 0 : i32
    %c0_i32_0 = arith.constant 0 : i32
    return %arg0, %c0_i32 : i32, i32
  }
}

module attributes {stable_mosaic.version = 11 : i64} {
  func.func @_fused_matmul_kernel(%arg0: i32, %arg1: memref<128x144xbf16, #tpu.memory_space<vmem>>, %arg2: memref<144x16xbf16, #tpu.memory_space<vmem>>, %arg3: memref<1x16xf32, #tpu.memory_space<vmem>>, %arg4: memref<128x16xbf16, #tpu.memory_space<vmem>>) attributes {dimension_semantics = [#tpu.dimension_semantics<parallel>], iteration_bounds = array<i64: 1>, scalar_prefetch = 0 : i64, scratch_operands = 0 : i64, tpu.core_type = #tpu.core_type<tc>, window_params = [{transform_indices = @transform_0, window_bounds = array<i64: 128, 144>}, {pipeline_mode = #tpu.pipeline_mode<synchronous>, transform_indices = @transform_1, window_bounds = array<i64: 144, 16>}, {pipeline_mode = #tpu.pipeline_mode<synchronous>, transform_indices = @transform_2, window_bounds = array<i64: 1, 16>}, {transform_indices = @transform_3, window_bounds = array<i64: 128, 16>}]} {
    %c0 = arith.constant 0 : index
    %c0_0 = arith.constant 0 : index
    %0 = vector.load %arg1[%c0, %c0_0] : memref<128x144xbf16, #tpu.memory_space<vmem>>, vector<128x144xbf16>
    %c0_1 = arith.constant 0 : index
    %c0_2 = arith.constant 0 : index
    %1 = vector.load %arg2[%c0_1, %c0_2] : memref<144x16xbf16, #tpu.memory_space<vmem>>, vector<144x16xbf16>
    %cst = arith.constant dense<0.000000e+00> : vector<128x16xf32>
    %2 = tpu.matmul %0, %1, %cst {dimension_numbers = #tpu.dot_dimension_numbers<[1], [0], [0], [1], [0, 0, 1, 1], [], []>} : vector<128x144xbf16>, vector<144x16xbf16>, vector<128x16xf32> -> vector<128x16xf32>
    %c0_3 = arith.constant 0 : index
    %c0_4 = arith.constant 0 : index
    %3 = vector.load %arg3[%c0_3, %c0_4] : memref<1x16xf32, #tpu.memory_space<vmem>>, vector<1x16xf32>
    %4 = vector.broadcast %3 : vector<1x16xf32> to vector<128x16xf32>
    %5 = arith.addf %2, %4 : vector<128x16xf32>
    %6 = arith.truncf %5 : vector<128x16xf32> to vector<128x16xbf16>
    %c0_5 = arith.constant 0 : index
    %c0_6 = arith.constant 0 : index
    %7 = vector.load %arg4[%c0_5, %c0_6] : memref<128x16xbf16, #tpu.memory_space<vmem>>, vector<128x16xbf16>
    tpu.vector_store %arg4[%c0_5, %c0_6], %6 {strides = array<i32>} : memref<128x16xbf16, #tpu.memory_space<vmem>>, vector<128x16xbf16>,
    return
  }
  func.func @transform_0(%arg0: i32) -> (i32, i32) {
    %c0_i32 = arith.constant 0 : i32
    %c0_i32_0 = arith.constant 0 : i32
    return %arg0, %c0_i32 : i32, i32
  }
  func.func @transform_1(%arg0: i32) -> (i32, i32) {
    %c0_i32 = arith.constant 0 : i32
    %c0_i32_0 = arith.constant 0 : i32
    %c0_i32_1 = arith.constant 0 : i32
    return %c0_i32, %c0_i32_0 : i32, i32
  }
  func.func @transform_2(%arg0: i32) -> (i32, i32) {
    %c0_i32 = arith.constant 0 : i32
    %c0_i32_0 = arith.constant 0 : i32
    %c0_i32_1 = arith.constant 0 : i32
    return %c0_i32, %c0_i32_0 : i32, i32
  }
  func.func @transform_3(%arg0: i32) -> (i32, i32) {
    %c0_i32 = arith.constant 0 : i32
    %c0_i32_0 = arith.constant 0 : i32
    return %arg0, %c0_i32 : i32, i32
  }
}

module attributes {stable_mosaic.version = 11 : i64} {
  func.func @_fused_matmul_kernel(%arg0: i32, %arg1: memref<32x144xbf16, #tpu.memory_space<vmem>>, %arg2: memref<144x32xbf16, #tpu.memory_space<vmem>>, %arg3: memref<1x32xf32, #tpu.memory_space<vmem>>, %arg4: memref<32x32xbf16, #tpu.memory_space<vmem>>) attributes {dimension_semantics = [#tpu.dimension_semantics<parallel>], iteration_bounds = array<i64: 1>, scalar_prefetch = 0 : i64, scratch_operands = 0 : i64, tpu.core_type = #tpu.core_type<tc>, window_params = [{transform_indices = @transform_0, window_bounds = array<i64: 32, 144>}, {pipeline_mode = #tpu.pipeline_mode<synchronous>, transform_indices = @transform_1, window_bounds = array<i64: 144, 32>}, {pipeline_mode = #tpu.pipeline_mode<synchronous>, transform_indices = @transform_2, window_bounds = array<i64: 1, 32>}, {transform_indices = @transform_3, window_bounds = array<i64: 32, 32>}]} {
    %c0 = arith.constant 0 : index
    %c0_0 = arith.constant 0 : index
    %0 = vector.load %arg1[%c0, %c0_0] : memref<32x144xbf16, #tpu.memory_space<vmem>>, vector<32x144xbf16>
    %c0_1 = arith.constant 0 : index
    %c0_2 = arith.constant 0 : index
    %1 = vector.load %arg2[%c0_1, %c0_2] : memref<144x32xbf16, #tpu.memory_space<vmem>>, vector<144x32xbf16>
    %cst = arith.constant dense<0.000000e+00> : vector<32x32xf32>
    %2 = tpu.matmul %0, %1, %cst {dimension_numbers = #tpu.dot_dimension_numbers<[1], [0], [0], [1], [0, 0, 1, 1], [], []>} : vector<32x144xbf16>, vector<144x32xbf16>, vector<32x32xf32> -> vector<32x32xf32>
    %c0_3 = arith.constant 0 : index
    %c0_4 = arith.constant 0 : index
    %3 = vector.load %arg3[%c0_3, %c0_4] : memref<1x32xf32, #tpu.memory_space<vmem>>, vector<1x32xf32>
    %4 = vector.broadcast %3 : vector<1x32xf32> to vector<32x32xf32>
    %5 = arith.addf %2, %4 : vector<32x32xf32>
    %cst_5 = arith.constant 0.000000e+00 : f32
    %6 = vector.broadcast %cst_5 : f32 to vector<32x32xf32>
    %7 = arith.cmpf oge, %5, %6 : vector<32x32xf32>
    %cst_6 = arith.constant 0.00999999977 : f32
    %8 = vector.broadcast %cst_6 : f32 to vector<32x32xf32>
    %9 = arith.mulf %8, %5 : vector<32x32xf32>
    %10 = arith.select %7, %5, %9 : vector<32x32xi1>, vector<32x32xf32>
    %11 = arith.truncf %10 : vector<32x32xf32> to vector<32x32xbf16>
    %c0_7 = arith.constant 0 : index
    %c0_8 = arith.constant 0 : index
    %12 = vector.load %arg4[%c0_7, %c0_8] : memref<32x32xbf16, #tpu.memory_space<vmem>>, vector<32x32xbf16>
    tpu.vector_store %arg4[%c0_7, %c0_8], %11 {strides = array<i32>} : memref<32x32xbf16, #tpu.memory_space<vmem>>, vector<32x32xbf16>,
    return
  }
  func.func @transform_0(%arg0: i32) -> (i32, i32) {
    %c0_i32 = arith.constant 0 : i32
    %c0_i32_0 = arith.constant 0 : i32
    return %arg0, %c0_i32 : i32, i32
  }
  func.func @transform_1(%arg0: i32) -> (i32, i32) {
    %c0_i32 = arith.constant 0 : i32
    %c0_i32_0 = arith.constant 0 : i32
    %c0_i32_1 = arith.constant 0 : i32
    return %c0_i32, %c0_i32_0 : i32, i32
  }
  func.func @transform_2(%arg0: i32) -> (i32, i32) {
    %c0_i32 = arith.constant 0 : i32
    %c0_i32_0 = arith.constant 0 : i32
    %c0_i32_1 = arith.constant 0 : i32
    return %c0_i32, %c0_i32_0 : i32, i32
  }
  func.func @transform_3(%arg0: i32) -> (i32, i32) {
    %c0_i32 = arith.constant 0 : i32
    %c0_i32_0 = arith.constant 0 : i32
    return %arg0, %c0_i32 : i32, i32
  }
}

module attributes {stable_mosaic.version = 11 : i64} {
  func.func @_fused_matmul_kernel(%arg0: i32, %arg1: memref<2x512xbf16, #tpu.memory_space<vmem>>, %arg2: memref<512x8xbf16, #tpu.memory_space<vmem>>, %arg3: memref<1x8xf32, #tpu.memory_space<vmem>>, %arg4: memref<2x8xf32, #tpu.memory_space<vmem>>) attributes {dimension_semantics = [#tpu.dimension_semantics<parallel>], iteration_bounds = array<i64: 1>, scalar_prefetch = 0 : i64, scratch_operands = 0 : i64, tpu.core_type = #tpu.core_type<tc>, window_params = [{transform_indices = @transform_0, window_bounds = array<i64: 2, 512>}, {pipeline_mode = #tpu.pipeline_mode<synchronous>, transform_indices = @transform_1, window_bounds = array<i64: 512, 8>}, {pipeline_mode = #tpu.pipeline_mode<synchronous>, transform_indices = @transform_2, window_bounds = array<i64: 1, 8>}, {transform_indices = @transform_3, window_bounds = array<i64: 2, 8>}]} {
    %c0 = arith.constant 0 : index
    %c0_0 = arith.constant 0 : index
    %0 = vector.load %arg1[%c0, %c0_0] : memref<2x512xbf16, #tpu.memory_space<vmem>>, vector<2x512xbf16>
    %c0_1 = arith.constant 0 : index
    %c0_2 = arith.constant 0 : index
    %1 = vector.load %arg2[%c0_1, %c0_2] : memref<512x8xbf16, #tpu.memory_space<vmem>>, vector<512x8xbf16>
    %cst = arith.constant dense<0.000000e+00> : vector<2x8xf32>
    %2 = tpu.matmul %0, %1, %cst {dimension_numbers = #tpu.dot_dimension_numbers<[1], [0], [0], [1], [0, 0, 1, 1], [], []>} : vector<2x512xbf16>, vector<512x8xbf16>, vector<2x8xf32> -> vector<2x8xf32>
    %c0_3 = arith.constant 0 : index
    %c0_4 = arith.constant 0 : index
    %3 = vector.load %arg3[%c0_3, %c0_4] : memref<1x8xf32, #tpu.memory_space<vmem>>, vector<1x8xf32>
    %4 = vector.broadcast %3 : vector<1x8xf32> to vector<2x8xf32>
    %5 = arith.addf %2, %4 : vector<2x8xf32>
    %c0_5 = arith.constant 0 : index
    %c0_6 = arith.constant 0 : index
    %6 = vector.load %arg4[%c0_5, %c0_6] : memref<2x8xf32, #tpu.memory_space<vmem>>, vector<2x8xf32>
    tpu.vector_store %arg4[%c0_5, %c0_6], %5 {strides = array<i32>} : memref<2x8xf32, #tpu.memory_space<vmem>>, vector<2x8xf32>,
    return
  }
  func.func @transform_0(%arg0: i32) -> (i32, i32) {
    %c0_i32 = arith.constant 0 : i32
    %c0_i32_0 = arith.constant 0 : i32
    return %arg0, %c0_i32 : i32, i32
  }
  func.func @transform_1(%arg0: i32) -> (i32, i32) {
    %c0_i32 = arith.constant 0 : i32
    %c0_i32_0 = arith.constant 0 : i32
    %c0_i32_1 = arith.constant 0 : i32
    return %c0_i32, %c0_i32_0 : i32, i32
  }
  func.func @transform_2(%arg0: i32) -> (i32, i32) {
    %c0_i32 = arith.constant 0 : i32
    %c0_i32_0 = arith.constant 0 : i32
    %c0_i32_1 = arith.constant 0 : i32
    return %c0_i32, %c0_i32_0 : i32, i32
  }
  func.func @transform_3(%arg0: i32) -> (i32, i32) {
    %c0_i32 = arith.constant 0 : i32
    %c0_i32_0 = arith.constant 0 : i32
    return %arg0, %c0_i32 : i32, i32
  }
}

</mosaic_0001>

<bundles_post_ra>
// kernel: resnet_encoder_forward.9
= control target key start
LH: loop header
LB: loop body
LE: loop exit
PB: predicated region body
PF: predicated region fallthrough
CT: control target
= control target key end

     0   :  { %s1767_s12 = smov 0   ;;  %s2089_s0 = inlined_call_operand.vmem [shape: bf16[32768,27], index: 0, kind: input, shape index: {}]   ;;  %s2090_s1 = inlined_call_operand.vmem [shape: bf16[27,4], index: 1, kind: input, shape index: {}]   ;;  %s2091_s2 = inlined_call_operand.vmem [shape: f32[1,4], index: 2, kind: input, shape index: {}]   ;;  %s2092_s3 = inlined_call_operand.vmem [shape: bf16[32768,4], index: 3, kind: output, shape index: {}]  }
   0x1 LB: > { %s1383_s13 = sadd.s32 4294967295, %s1744_s12   ;;  %p1387_p0 = scmp.ge.s32.totalorder %s1744_s12, 1  ;;  %s1744_s12 = sphi %s1767_s12, %s13_s12  }
   0x2   : > { %p138_p1 = scmp.lt.s32.totalorder %s1744_s12, 65 }
   0x4   : > { %p139_p2 = pnand %p1387_p0, %p138_p1 }
   0x5   : > { %s1388_s16 = sshll.u32 (!%p139_p2), %s1383_s13, 6 }
   0x6   : > { %142 = sbr.rel (%p139_p2) target bundleno = 304 (0x130), region = 32  ;;  %p163_p3 = scmp.lt.s32.totalorder (!%p139_p2), %s1388_s16, 4095 }
   0xb   : > { %v1704_v0 = vld [vmem:[%s2090_s1 + $0x8] sm:$0x3f]   ;;  %vm518_vm0 = vcmask 1044480   ;;  %vm519_vm1 = vcmask 1045504   ;;  %v1746_v1 = vmov 65535   ;;  %v1705_v5 = vld [vmem:[%s2090_s1] sm:$0xff]  }
   0xc   : > { %v520_v2 = vsel %vm518_vm0, 4294967295, %v1746_v1  ;;  %s2094_s16 = smov (!%p163_p3, %s1388_s16), 4095  ;;  %vm421_vm2 = vcmask 220160   ;;  %v1858_v38 = vld [vmem:[%s2091_s2] ss:$0 sm:$0xff]  ;;  %vm1262_vm5 = vcmask 27648  }
   0xd   : > { %v521_v3 = vsel %vm519_vm1, %v520_v2, 0  ;;  %s1389_s19 = sshll.u32 %s2094_s16, 2 }
   0xe   : > { %v523_v4 = vand.u32 %v1704_v0, %v521_v3  ;;  %s1789_s22 = scalar_lea.vmem %s2089_s0, %s1389_s19  ;;  %s1869_s27 = scalar_lea.vmem %s2092_s3, %s1389_s19 }
   0xf   : > { %v1706_v6 = vld [vmem:[%s1789_s22] sm:$0xff]   ;;  %v1708_v8 = vld [vmem:[%s1789_s22 + $0x8] sm:$0xff]   ;;  %v1710_v10 = vld [vmem:[%s1789_s22 + $0x10] sm:$0xff]  }
  0x10   : > { %1623 = vmatprep.subr.bf16.mxu0 %v523_v4  ;;  %1691 = vmatprep.subr.bf16.mxu1 %v523_v4  ;;  %v1707_v7 = vld [vmem:[%s1789_s22 + $0x80] sm:$0xff]   ;;  %v1709_v9 = vld [vmem:[%s1789_s22 + $0x88] sm:$0xff]   ;;  %v1711_v11 = vld [vmem:[%s1789_s22 + $0x90] sm:$0xff]  }
  0x11   : > { %1624 = vmatpush3.bf16.msra.mxu0 %v523_v4  ;;  %1693 = vmatpush3.bf16.msra.mxu1 %v523_v4  ;;  %v1712_v12 = vld [vmem:[%s1789_s22 + $0x18] sm:$0xff]   ;;  %v1714_v14 = vld [vmem:[%s1789_s22 + $0x20] sm:$0xff]   ;;  %v1716_v16 = vld [vmem:[%s1789_s22 + $0x28] sm:$0xff]  }
  0x12   : > { %1625 = vmatprep.subr.bf16.mxu0 %v1705_v5  ;;  %1692 = vmatprep.subr.bf16.mxu1 %v1705_v5  ;;  %v1713_v13 = vld [vmem:[%s1789_s22 + $0x98] sm:$0xff]   ;;  %v1715_v15 = vld [vmem:[%s1789_s22 + $0xa0] sm:$0xff]   ;;  %v1717_v17 = vld [vmem:[%s1789_s22 + $0xa8] sm:$0xff]  }
  0x13   : > { %1627 = vmatprep.mubr.msk.bf16.mxu0 %vm421_vm2, %v1706_v6  ;;  %1659 = vmatprep.mubr.msk.bf16.mxu1 %vm421_vm2, %v1707_v7  ;;  %v1718_v18 = vld [vmem:[%s1789_s22 + $0x30] sm:$0xff]   ;;  %v1720_v20 = vld [vmem:[%s1789_s22 + $0x38] sm:$0xff]   ;;  %v1722_v22 = vld [vmem:[%s1789_s22 + $0x40] sm:$0xff]  }
  0x14   : > { %v1719_v19 = vld [vmem:[%s1789_s22 + $0xb0] sm:$0xff]   ;;  %v1721_v21 = vld [vmem:[%s1789_s22 + $0xb8] sm:$0xff]   ;;  %v1723_v23 = vld [vmem:[%s1789_s22 + $0xc0] sm:$0xff]  }
  0x15   : > { %1626 = vmatpush3.bf16.msra.mxu0 %v1705_v5  ;;  %1694 = vmatpush3.bf16.msra.mxu1 %v1705_v5  ;;  %v1724_v24 = vld [vmem:[%s1789_s22 + $0x48] sm:$0xff]   ;;  %v1726_v26 = vld [vmem:[%s1789_s22 + $0x50] sm:$0xff]   ;;  %v1728_v28 = vld [vmem:[%s1789_s22 + $0x58] sm:$0xff]  }
  0x16   : > { %v1725_v25 = vld [vmem:[%s1789_s22 + $0xc8] sm:$0xff]   ;;  %v1727_v27 = vld [vmem:[%s1789_s22 + $0xd0] sm:$0xff]   ;;  %v1729_v29 = vld [vmem:[%s1789_s22 + $0xd8] sm:$0xff]  }
  0x17   : > { %v1730_v30 = vld [vmem:[%s1789_s22 + $0x60] sm:$0xff]   ;;  %v1732_v32 = vld [vmem:[%s1789_s22 + $0x68] sm:$0xff]   ;;  %v1734_v34 = vld [vmem:[%s1789_s22 + $0x70] sm:$0xff]  }
  0x18   : > { %1628 = vmatmul.mubr.msk.bf16.vlgmr.msra.gmra.mxu0 %vm421_vm2, %v1708_v8  ;;  %1660 = vmatmul.mubr.msk.bf16.vlgmr.msra.gmra.mxu1 %vm421_vm2, %v1709_v9  ;;  %v1731_v31 = vld [vmem:[%s1789_s22 + $0xe0] sm:$0xff]   ;;  %v1733_v33 = vld [vmem:[%s1789_s22 + $0xe8] sm:$0xff]   ;;  %v1735_v35 = vld [vmem:[%s1789_s22 + $0xf0] sm:$0xff]  }
  0x19   : > { %1631 = vmatprep.mubr.msk.bf16.mxu0 %vm421_vm2, %v1710_v10  ;;  %1663 = vmatprep.mubr.msk.bf16.mxu1 %vm421_vm2, %v1711_v11  ;;  %v1736_v36 = vld [vmem:[%s1789_s22 + $0x78] sm:$0xff]  }
  0x1a   : > { %v1737_v37 = vld [vmem:[%s1789_s22 + $0xf8] sm:$0xff]  }
  0x20   : > { %1632 = vmatmul.mubr.msk.bf16.gmra.mxu0 %vm421_vm2, %v1712_v12  ;;  %1664 = vmatmul.mubr.msk.bf16.gmra.mxu1 %vm421_vm2, %v1713_v13 }
  0x21   : > { %1635 = vmatprep.mubr.msk.bf16.mxu0 %vm421_vm2, %v1714_v14  ;;  %1667 = vmatprep.mubr.msk.bf16.mxu1 %vm421_vm2, %v1715_v15 }
  0x28   : > { %1636 = vmatmul.mubr.msk.bf16.gmra.mxu0 %vm421_vm2, %v1716_v16  ;;  %1668 = vmatmul.mubr.msk.bf16.gmra.mxu1 %vm421_vm2, %v1717_v17 }
  0x29   : > { %1639 = vmatprep.mubr.msk.bf16.mxu0 %vm421_vm2, %v1718_v18  ;;  %1671 = vmatprep.mubr.msk.bf16.mxu1 %vm421_vm2, %v1719_v19 }
  0x30   : > { %1640 = vmatmul.mubr.msk.bf16.gmra.mxu0 %vm421_vm2, %v1720_v20  ;;  %1672 = vmatmul.mubr.msk.bf16.gmra.mxu1 %vm421_vm2, %v1721_v21 }
  0x31   : > { %1643 = vmatprep.mubr.msk.bf16.mxu0 %vm421_vm2, %v1722_v22  ;;  %1675 = vmatprep.mubr.msk.bf16.mxu1 %vm421_vm2, %v1723_v23 }
  0x38   : > { %1644 = vmatmul.mubr.msk.bf16.gmra.mxu0 %vm421_vm2, %v1724_v24  ;;  %1676 = vmatmul.mubr.msk.bf16.gmra.mxu1 %vm421_vm2, %v1725_v25 }
  0x39   : > { %1647 = vmatprep.mubr.msk.bf16.mxu0 %vm421_vm2, %v1726_v26  ;;  %1679 = vmatprep.mubr.msk.bf16.mxu1 %vm421_vm2, %v1727_v27 }
  0x40   : > { %1648 = vmatmul.mubr.msk.bf16.gmra.mxu0 %vm421_vm2, %v1728_v28  ;;  %1680 = vmatmul.mubr.msk.bf16.gmra.mxu1 %vm421_vm2, %v1729_v29 }
  0x41   : > { %1651 = vmatprep.mubr.msk.bf16.mxu0 %vm421_vm2, %v1730_v30  ;;  %1683 = vmatprep.mubr.msk.bf16.mxu1 %vm421_vm2, %v1731_v31 }
  0x48   : > { %1652 = vmatmul.mubr.msk.bf16.gmra.mxu0 %vm421_vm2, %v1732_v32  ;;  %1684 = vmatmul.mubr.msk.bf16.gmra.mxu1 %vm421_vm2, %v1733_v33 }
  0x49   : > { %1655 = vmatprep.mubr.msk.bf16.mxu0 %vm421_vm2, %v1734_v34  ;;  %1687 = vmatprep.mubr.msk.bf16.mxu1 %vm421_vm2, %v1735_v35 }
  0x50   : > { %1656 = vmatmul.mubr.msk.bf16.gmra.mxu0 %vm421_vm2, %v1736_v36  ;;  %1688 = vmatmul.mubr.msk.bf16.gmra.mxu1 %vm421_vm2, %v1737_v37 }
  0xd8   : > { %v1629_v39 = vpop.f32.mrf.mxu0  ;;  %v1661_v40 = vpop.f32.mrf.mxu1 }
  0xd9   : > { %v568_v41 = vadd.f32 %v1629_v39, %v1858_v38  ;;  %v696_v42 = vadd.f32 %v1661_v40, %v1858_v38 }
  0xda   : > { %v559_v43 = vpop.f32.mrf.mxu0  ;;  %v687_v44 = vpop.f32.mrf.mxu1 }
  0xdb   : > { %vm816_vm3 = vcmp.ge.f32.partialorder %v568_v41, 0.0  ;;  %v880_v45 = vmul.f32 0.01, %v568_v41  ;;  %vm848_vm4 = vcmp.ge.f32.partialorder %v696_v42, 0.0  ;;  %v912_v46 = vmul.f32 0.01, %v696_v42 }
  0xdc   : > { %v560_v47 = vadd.f32 %v1858_v38, %v559_v43  ;;  %v688_v48 = vadd.f32 %v1858_v38, %v687_v44  ;;  %v1630_v49 = vpop.f32.mrf.mxu0  ;;  %v1662_v50 = vpop.f32.mrf.mxu1 }
  0xdd   : > { %v944_v51 = vsel %vm816_vm3, %v568_v41, %v880_v45  ;;  %v976_v52 = vsel %vm848_vm4, %v696_v42, %v912_v46  ;;  %v571_v53 = vadd.f32 %v1630_v49, %v1858_v38  ;;  %v699_v54 = vadd.f32 %v1662_v50, %v1858_v38 }
  0xde   : > { %v1527_v55 = vpack.c.bf16 %v944_v51, %v944_v51  ;;  %v1559_v56 = vpack.c.bf16 %v976_v52, %v976_v52  ;;  %vm814_vm6 = vcmp.ge.f32.partialorder %v560_v47, 0.0  ;;  %v878_v57 = vmul.f32 0.01, %v560_v47  ;;  %v562_v58 = vpop.f32.mrf.mxu0  ;;  %v690_v59 = vpop.f32.mrf.mxu1 }
  0xdf   : > { %vm846_vm7 = vcmp.ge.f32.partialorder %v688_v48, 0.0  ;;  %v910_v60 = vmul.f32 0.01, %v688_v48  ;;  %vm817_vm8 = vcmp.ge.f32.partialorder %v571_v53, 0.0  ;;  %v881_v61 = vmul.f32 0.01, %v571_v53 }
  0xe0   : > { %1265 = vst.msk [vmem:[%s1869_s27 + $0x8] sm:$0xf] %vm1262_vm5, %v1527_v55  ;;  %1297 = vst.msk [vmem:[%s1869_s27 + $0x88] sm:$0xf] %vm1262_vm5, %v1559_v56  ;;  %v942_v62 = vsel %vm814_vm6, %v560_v47, %v878_v57  ;;  %vm849_vm9 = vcmp.ge.f32.partialorder %v699_v54, 0.0  ;;  %v563_v0 = vadd.f32 %v1858_v38, %v562_v58  ;;  %v1633_v1 = vpop.f32.mrf.mxu0  ;;  %v1665_v2 = vpop.f32.mrf.mxu1  ;;  %v691_v6 = vadd.f32 %v1858_v38, %v690_v59 }
  0xe1   : > { %v913_v63 = vmul.f32 0.01, %v699_v54  ;;  %v1525_v3 = vpack.c.bf16 %v942_v62, %v942_v62  ;;  %v974_v4 = vsel %vm846_vm7, %v688_v48, %v910_v60  ;;  %v945_v5 = vsel %vm817_vm8, %v571_v53, %v881_v61 }
  0xe2   : > { %v1557_v7 = vpack.c.bf16 %v974_v4, %v974_v4  ;;  %v1528_v8 = vpack.c.bf16 %v945_v5, %v945_v5  ;;  %vm815_vm10 = vcmp.ge.f32.partialorder %v563_v0, 0.0  ;;  %v575_v10 = vpop.f32.mrf.mxu0  ;;  %v703_v11 = vpop.f32.mrf.mxu1  ;;  %v879_v13 = vmul.f32 0.01, %v563_v0 }
  0xe3   : > { %v977_v9 = vsel %vm849_vm9, %v699_v54, %v913_v63  ;;  %1263 = vst.msk [vmem:[%s1869_s27] sm:$0xf] %vm1262_vm5, %v1525_v3  ;;  %vm847_vm11 = vcmp.ge.f32.partialorder %v691_v6, 0.0  ;;  %v911_v14 = vmul.f32 0.01, %v691_v6  ;;  %v584_v15 = vadd.f32 %v1633_v1, %v1858_v38 }
  0xe4   : > { %v1560_v12 = vpack.c.bf16 %v977_v9, %v977_v9  ;;  %1295 = vst.msk [vmem:[%s1869_s27 + $0x80] sm:$0xf] %vm1262_vm5, %v1557_v7  ;;  %1266 = vst.msk [vmem:[%s1869_s27 + $0xc] sm:$0xf] %vm1262_vm5, %v1528_v8  ;;  %v712_v16 = vadd.f32 %v1665_v2, %v1858_v38  ;;  %v576_v17 = vadd.f32 %v1858_v38, %v575_v10  ;;  %v1634_v19 = vpop.f32.mrf.mxu0  ;;  %v1666_v20 = vpop.f32.mrf.mxu1 }
  0xe5   : > { %v704_v18 = vadd.f32 %v1858_v38, %v703_v11  ;;  %v943_v21 = vsel %vm815_vm10, %v563_v0, %v879_v13  ;;  %v975_v22 = vsel %vm847_vm11, %v691_v6, %v911_v14  ;;  %v587_v23 = vadd.f32 %v1634_v19, %v1858_v38 }
  0xe6   : > { %1298 = vst.msk [vmem:[%s1869_s27 + $0x8c] sm:$0xf] %vm1262_vm5, %v1560_v12  ;;  %v715_v24 = vadd.f32 %v1666_v20, %v1858_v38  ;;  %v1526_v25 = vpack.c.bf16 %v943_v21, %v943_v21  ;;  %v1558_v26 = vpack.c.bf16 %v975_v22, %v975_v22  ;;  %vm820_vm12 = vcmp.ge.f32.partialorder %v584_v15, 0.0  ;;  %v578_v28 = vpop.f32.mrf.mxu0  ;;  %v706_v29 = vpop.f32.mrf.mxu1 }
  0xe7   : > { %v884_v27 = vmul.f32 0.01, %v584_v15  ;;  %vm852_vm13 = vcmp.ge.f32.partialorder %v712_v16, 0.0  ;;  %v916_v30 = vmul.f32 0.01, %v712_v16  ;;  %vm818_vm14 = vcmp.ge.f32.partialorder %v576_v17, 0.0 }
  0xe8   : > { %v882_v31 = vmul.f32 0.01, %v576_v17  ;;  %1264 = vst.msk [vmem:[%s1869_s27 + $0x4] sm:$0xf] %vm1262_vm5, %v1526_v25  ;;  %1296 = vst.msk [vmem:[%s1869_s27 + $0x84] sm:$0xf] %vm1262_vm5, %v1558_v26  ;;  %v1637_v34 = vpop.f32.mrf.mxu0  ;;  %v1669_v35 = vpop.f32.mrf.mxu1  ;;  %v579_v49 = vadd.f32 %v1858_v38, %v578_v28  ;;  %v707_v51 = vadd.f32 %v1858_v38, %v706_v29 }
  0xe9   : > { %v948_v32 = vsel %vm820_vm12, %v584_v15, %v884_v27  ;;  %vm850_vm15 = vcmp.ge.f32.partialorder %v704_v18, 0.0  ;;  %v914_v33 = vmul.f32 0.01, %v704_v18  ;;  %vm821_vm0 = vcmp.ge.f32.partialorder %v587_v23, 0.0 }
  0xea   : > { %v1531_v36 = vpack.c.bf16 %v948_v32, %v948_v32  ;;  %v980_v37 = vsel %vm852_vm13, %v712_v16, %v916_v30  ;;  %v946_v39 = vsel %vm818_vm14, %v576_v17, %v882_v31  ;;  %v885_v40 = vmul.f32 0.01, %v587_v23  ;;  %v591_v44 = vpop.f32.mrf.mxu0  ;;  %v719_v45 = vpop.f32.mrf.mxu1 }
  0xeb   : > { %v1563_v41 = vpack.c.bf16 %v980_v37, %v980_v37  ;;  %v1529_v42 = vpack.c.bf16 %v946_v39, %v946_v39  ;;  %v978_v43 = vsel %vm850_vm15, %v704_v18, %v914_v33  ;;  %vm853_vm1 = vcmp.ge.f32.partialorder %v715_v24, 0.0 }
  0xec   : > { %1269 = vst.msk [vmem:[%s1869_s27 + $0x18] sm:$0xf] %vm1262_vm5, %v1531_v36  ;;  %v1561_v46 = vpack.c.bf16 %v978_v43, %v978_v43  ;;  %v949_v47 = vsel %vm821_vm0, %v587_v23, %v885_v40  ;;  %v917_v48 = vmul.f32 0.01, %v715_v24  ;;  %v600_v52 = vadd.f32 %v1637_v34, %v1858_v38  ;;  %v1638_v54 = vpop.f32.mrf.mxu0  ;;  %v1670_v55 = vpop.f32.mrf.mxu1 }
  0xed   : > { %1301 = vst.msk [vmem:[%s1869_s27 + $0x98] sm:$0xf] %vm1262_vm5, %v1563_v41  ;;  %1267 = vst.msk [vmem:[%s1869_s27 + $0x10] sm:$0xf] %vm1262_vm5, %v1529_v42  ;;  %v1532_v50 = vpack.c.bf16 %v949_v47, %v949_v47  ;;  %v728_v53 = vadd.f32 %v1669_v35, %v1858_v38  ;;  %vm819_vm2 = vcmp.ge.f32.partialorder %v579_v49, 0.0  ;;  %v592_v58 = vadd.f32 %v1858_v38, %v591_v44 }
  0xee   : > { %1299 = vst.msk [vmem:[%s1869_s27 + $0x90] sm:$0xf] %vm1262_vm5, %v1561_v46  ;;  %v981_v56 = vsel %vm853_vm1, %v715_v24, %v917_v48  ;;  %v883_v57 = vmul.f32 0.01, %v579_v49  ;;  %vm851_vm3 = vcmp.ge.f32.partialorder %v707_v51, 0.0  ;;  %vm824_vm4 = vcmp.ge.f32.partialorder %v600_v52, 0.0  ;;  %v594_v61 = vpop.f32.mrf.mxu0  ;;  %v722_v62 = vpop.f32.mrf.mxu1 }
  0xef   : > { %1270 = vst.msk [vmem:[%s1869_s27 + $0x1c] sm:$0xf] %vm1262_vm5, %v1532_v50  ;;  %v1564_v59 = vpack.c.bf16 %v981_v56, %v981_v56  ;;  %v915_v60 = vmul.f32 0.01, %v707_v51  ;;  %v888_v0 = vmul.f32 0.01, %v600_v52  ;;  %v720_v10 = vadd.f32 %v1858_v38, %v719_v45 }
  0xf0   : > { %v947_v63 = vsel %vm819_vm2, %v579_v49, %v883_v57  ;;  %vm856_vm6 = vcmp.ge.f32.partialorder %v728_v53, 0.0  ;;  %v920_v1 = vmul.f32 0.01, %v728_v53  ;;  %vm822_vm7 = vcmp.ge.f32.partialorder %v592_v58, 0.0  ;;  %v1641_v5 = vpop.f32.mrf.mxu0  ;;  %v1673_v6 = vpop.f32.mrf.mxu1 }
  0xf1   : > { %1302 = vst.msk [vmem:[%s1869_s27 + $0x9c] sm:$0xf] %vm1262_vm5, %v1564_v59  ;;  %v1530_v2 = vpack.c.bf16 %v947_v63, %v947_v63  ;;  %v979_v3 = vsel %vm851_vm3, %v707_v51, %v915_v60  ;;  %v886_v4 = vmul.f32 0.01, %v592_v58  ;;  %v952_v8 = vsel %vm824_vm4, %v600_v52, %v888_v0 }
  0xf2   : > { %v1562_v7 = vpack.c.bf16 %v979_v3, %v979_v3  ;;  %v984_v9 = vsel %vm856_vm6, %v728_v53, %v920_v1  ;;  %v1535_v11 = vpack.c.bf16 %v952_v8, %v952_v8  ;;  %v603_v14 = vadd.f32 %v1638_v54, %v1858_v38  ;;  %v607_v15 = vpop.f32.mrf.mxu0  ;;  %v735_v16 = vpop.f32.mrf.mxu1 }
  0xf3   : > { %1268 = vst.msk [vmem:[%s1869_s27 + $0x14] sm:$0xf] %vm1262_vm5, %v1530_v2  ;;  %v1567_v12 = vpack.c.bf16 %v984_v9, %v984_v9  ;;  %v950_v13 = vsel %vm822_vm7, %v592_v58, %v886_v4  ;;  %vm854_vm8 = vcmp.ge.f32.partialorder %v720_v10, 0.0  ;;  %v918_v18 = vmul.f32 0.01, %v720_v10 }
  0xf4   : > { %1300 = vst.msk [vmem:[%s1869_s27 + $0x94] sm:$0xf] %vm1262_vm5, %v1562_v7  ;;  %v1533_v17 = vpack.c.bf16 %v950_v13, %v950_v13  ;;  %v731_v19 = vadd.f32 %v1670_v55, %v1858_v38  ;;  %1273 = vst.msk [vmem:[%s1869_s27 + $0x28] sm:$0xf] %vm1262_vm5, %v1535_v11  ;;  %vm825_vm9 = vcmp.ge.f32.partialorder %v603_v14, 0.0  ;;  %v595_v21 = vadd.f32 %v1858_v38, %v594_v61  ;;  %v1642_v23 = vpop.f32.mrf.mxu0  ;;  %v1674_v24 = vpop.f32.mrf.mxu1 }
  0xf5   : > { %1305 = vst.msk [vmem:[%s1869_s27 + $0xa8] sm:$0xf] %vm1262_vm5, %v1567_v12  ;;  %v889_v20 = vmul.f32 0.01, %v603_v14  ;;  %v723_v22 = vadd.f32 %v1858_v38, %v722_v62  ;;  %v982_v25 = vsel %vm854_vm8, %v720_v10, %v918_v18  ;;  %v616_v27 = vadd.f32 %v1641_v5, %v1858_v38 }
  0xf6   : > { %1271 = vst.msk [vmem:[%s1869_s27 + $0x20] sm:$0xf] %vm1262_vm5, %v1533_v17  ;;  %vm857_vm10 = vcmp.ge.f32.partialorder %v731_v19, 0.0  ;;  %v921_v26 = vmul.f32 0.01, %v731_v19  ;;  %v1565_v28 = vpack.c.bf16 %v982_v25, %v982_v25  ;;  %vm823_vm11 = vcmp.ge.f32.partialorder %v595_v21, 0.0  ;;  %v610_v31 = vpop.f32.mrf.mxu0  ;;  %v738_v32 = vpop.f32.mrf.mxu1 }
  0xf7   : > { %v953_v29 = vsel %vm825_vm9, %v603_v14, %v889_v20  ;;  %v887_v30 = vmul.f32 0.01, %v595_v21  ;;  %vm855_vm12 = vcmp.ge.f32.partialorder %v723_v22, 0.0  ;;  %v919_v35 = vmul.f32 0.01, %v723_v22 }
  0xf8   : > { %v1536_v33 = vpack.c.bf16 %v953_v29, %v953_v29  ;;  %v985_v34 = vsel %vm857_vm10, %v731_v19, %v921_v26  ;;  %1303 = vst.msk [vmem:[%s1869_s27 + $0xa0] sm:$0xf] %vm1262_vm5, %v1565_v28  ;;  %vm828_vm13 = vcmp.ge.f32.partialorder %v616_v27, 0.0  ;;  %v892_v39 = vmul.f32 0.01, %v616_v27  ;;  %v1645_v40 = vpop.f32.mrf.mxu0  ;;  %v1677_v41 = vpop.f32.mrf.mxu1 }
  0xf9   : > { %v1568_v36 = vpack.c.bf16 %v985_v34, %v985_v34  ;;  %v951_v37 = vsel %vm823_vm11, %v595_v21, %v887_v30  ;;  %v983_v43 = vsel %vm855_vm12, %v723_v22, %v919_v35  ;;  %v744_v44 = vadd.f32 %v1673_v6, %v1858_v38 }
  0xfa   : > { %1274 = vst.msk [vmem:[%s1869_s27 + $0x2c] sm:$0xf] %vm1262_vm5, %v1536_v33  ;;  %v1534_v42 = vpack.c.bf16 %v951_v37, %v951_v37  ;;  %v608_v45 = vadd.f32 %v1858_v38, %v607_v15  ;;  %v1566_v46 = vpack.c.bf16 %v983_v43, %v983_v43  ;;  %v956_v47 = vsel %vm828_vm13, %v616_v27, %v892_v39  ;;  %v623_v50 = vpop.f32.mrf.mxu0  ;;  %v751_v51 = vpop.f32.mrf.mxu1 }
  0xfb   : > { %1306 = vst.msk [vmem:[%s1869_s27 + $0xac] sm:$0xf] %vm1262_vm5, %v1568_v36  ;;  %v736_v48 = vadd.f32 %v1858_v38, %v735_v16  ;;  %v619_v49 = vadd.f32 %v1642_v23, %v1858_v38  ;;  %v1539_v52 = vpack.c.bf16 %v956_v47, %v956_v47  ;;  %vm860_vm14 = vcmp.ge.f32.partialorder %v744_v44, 0.0 }
  0xfc   : > { %1272 = vst.msk [vmem:[%s1869_s27 + $0x24] sm:$0xf] %vm1262_vm5, %v1534_v42  ;;  %v924_v53 = vmul.f32 0.01, %v744_v44  ;;  %vm826_vm15 = vcmp.ge.f32.partialorder %v608_v45, 0.0  ;;  %v1646_v56 = vpop.f32.mrf.mxu0  ;;  %v1678_v57 = vpop.f32.mrf.mxu1  ;;  %v747_v60 = vadd.f32 %v1674_v24, %v1858_v38  ;;  %v611_v61 = vadd.f32 %v1858_v38, %v610_v31 }
  0xfd   : > { %1304 = vst.msk [vmem:[%s1869_s27 + $0xa4] sm:$0xf] %vm1262_vm5, %v1566_v46  ;;  %v890_v54 = vmul.f32 0.01, %v608_v45  ;;  %vm858_vm0 = vcmp.ge.f32.partialorder %v736_v48, 0.0  ;;  %vm829_vm1 = vcmp.ge.f32.partialorder %v619_v49, 0.0  ;;  %v739_v1 = vadd.f32 %v1858_v38, %v738_v32 }
  0xfe   : > { %v922_v55 = vmul.f32 0.01, %v736_v48  ;;  %1277 = vst.msk [vmem:[%s1869_s27 + $0x38] sm:$0xf] %vm1262_vm5, %v1539_v52  ;;  %v988_v58 = vsel %vm860_vm14, %v744_v44, %v924_v53  ;;  %v893_v59 = vmul.f32 0.01, %v619_v49  ;;  %v1951_v2 = vpop.f32.mrf.mxu0  ;;  %v1953_v3 = vpop.f32.mrf.mxu1  ;;  %v632_v13 = vadd.f32 %v1645_v40, %v1858_v38 }
  0xff   : > { %v1571_v62 = vpack.c.bf16 %v988_v58, %v988_v58  ;;  %v954_v63 = vsel %vm826_vm15, %v608_v45, %v890_v54  ;;  %vm861_vm2 = vcmp.ge.f32.partialorder %v747_v60, 0.0  ;;  %v925_v8 = vmul.f32 0.01, %v747_v60 }
 0x100   : > { %v986_v0 = vsel %vm858_vm0, %v736_v48, %v922_v55  ;;  %v1537_v4 = vpack.c.bf16 %v954_v63, %v954_v63  ;;  %v957_v6 = vsel %vm829_vm1, %v619_v49, %v893_v59  ;;  %vm827_vm3 = vcmp.ge.f32.partialorder %v611_v61, 0.0  ;;  %v1649_v10 = vpop.f32.mrf.mxu0  ;;  %v1681_v11 = vpop.f32.mrf.mxu1 }
 0x101   : > { %v1569_v5 = vpack.c.bf16 %v986_v0, %v986_v0  ;;  %1309 = vst.msk [vmem:[%s1869_s27 + $0xb8] sm:$0xf] %vm1262_vm5, %v1571_v62  ;;  %v1540_v7 = vpack.c.bf16 %v957_v6, %v957_v6  ;;  %v891_v9 = vmul.f32 0.01, %v611_v61  ;;  %vm859_vm4 = vcmp.ge.f32.partialorder %v739_v1, 0.0 }
 0x102   : > { %1275 = vst.msk [vmem:[%s1869_s27 + $0x30] sm:$0xf] %vm1262_vm5, %v1537_v4  ;;  %v923_v12 = vmul.f32 0.01, %v739_v1  ;;  %v760_v14 = vadd.f32 %v1677_v41, %v1858_v38  ;;  %v989_v15 = vsel %vm861_vm2, %v747_v60, %v925_v8  ;;  %v624_v17 = vadd.f32 %v1858_v38, %v623_v50  ;;  %v639_v19 = vpop.f32.mrf.mxu0  ;;  %v1968_v20 = vpop.f32.mrf.mxu1 }
 0x103   : > { %1307 = vst.msk [vmem:[%s1869_s27 + $0xb0] sm:$0xf] %vm1262_vm5, %v1569_v5  ;;  %1278 = vst.msk [vmem:[%s1869_s27 + $0x3c] sm:$0xf] %vm1262_vm5, %v1540_v7  ;;  %v955_v16 = vsel %vm827_vm3, %v611_v61, %v891_v9  ;;  %v752_v18 = vadd.f32 %v1858_v38, %v751_v51  ;;  %v1572_v21 = vpack.c.bf16 %v989_v15, %v989_v15  ;;  %vm832_vm6 = vcmp.ge.f32.partialorder %v632_v13, 0.0 }
 0x104   : > { %v1538_v22 = vpack.c.bf16 %v955_v16, %v955_v16  ;;  %v987_v23 = vsel %vm859_vm4, %v739_v1, %v923_v12  ;;  %v896_v25 = vmul.f32 0.01, %v632_v13  ;;  %vm864_vm7 = vcmp.ge.f32.partialorder %v760_v14, 0.0  ;;  %v1970_v27 = vpop.f32.mrf.mxu0  ;;  %v1972_v28 = vpop.f32.mrf.mxu1 }
 0x105   : > { %v1570_v24 = vpack.c.bf16 %v987_v23, %v987_v23  ;;  %v928_v26 = vmul.f32 0.01, %v760_v14  ;;  %1310 = vst.msk [vmem:[%s1869_s27 + $0xbc] sm:$0xf] %vm1262_vm5, %v1572_v21  ;;  %vm830_vm8 = vcmp.ge.f32.partialorder %v624_v17, 0.0  ;;  %vm862_vm9 = vcmp.ge.f32.partialorder %v752_v18, 0.0 }
 0x106   : > { %1276 = vst.msk [vmem:[%s1869_s27 + $0x34] sm:$0xf] %vm1262_vm5, %v1538_v22  ;;  %v894_v29 = vmul.f32 0.01, %v624_v17  ;;  %v926_v30 = vmul.f32 0.01, %v752_v18  ;;  %v960_v31 = vsel %vm832_vm6, %v632_v13, %v896_v25  ;;  %v635_v33 = vadd.f32 %v1646_v56, %v1858_v38  ;;  %v1982_v35 = vpop.f32.mrf.mxu0  ;;  %v1984_v36 = vpop.f32.mrf.mxu1 }
 0x107   : > { %1308 = vst.msk [vmem:[%s1869_s27 + $0xb4] sm:$0xf] %vm1262_vm5, %v1570_v24  ;;  %v992_v32 = vsel %vm864_vm7, %v760_v14, %v928_v26  ;;  %v763_v34 = vadd.f32 %v1678_v57, %v1858_v38  ;;  %v1543_v37 = vpack.c.bf16 %v960_v31, %v960_v31  ;;  %v627_v48 = vadd.f32 %v1858_v38, %v1951_v2 }
 0x108   : > { %v1575_v39 = vpack.c.bf16 %v992_v32, %v992_v32  ;;  %v958_v40 = vsel %vm830_vm8, %v624_v17, %v894_v29  ;;  %v990_v41 = vsel %vm862_vm9, %v752_v18, %v926_v30  ;;  %vm833_vm10 = vcmp.ge.f32.partialorder %v635_v33, 0.0  ;;  %v1653_v45 = vpop.f32.mrf.mxu0  ;;  %v1986_v46 = vpop.f32.mrf.mxu1 }
 0x109   : > { %v1541_v42 = vpack.c.bf16 %v958_v40, %v958_v40  ;;  %v1573_v43 = vpack.c.bf16 %v990_v41, %v990_v41  ;;  %v897_v44 = vmul.f32 0.01, %v635_v33  ;;  %1281 = vst.msk [vmem:[%s1869_s27 + $0x48] sm:$0xf] %vm1262_vm5, %v1543_v37  ;;  %vm865_vm11 = vcmp.ge.f32.partialorder %v763_v34, 0.0 }
 0x10a   : > { %1313 = vst.msk [vmem:[%s1869_s27 + $0xc8] sm:$0xf] %vm1262_vm5, %v1575_v39  ;;  %v929_v47 = vmul.f32 0.01, %v763_v34  ;;  %v755_v49 = vadd.f32 %v1858_v38, %v1953_v3  ;;  %v648_v51 = vadd.f32 %v1649_v10, %v1858_v38  ;;  %v776_v52 = vadd.f32 %v1681_v11, %v1858_v38  ;;  %v655_v59 = vpop.f32.mrf.mxu0  ;;  %v783_v60 = vpop.f32.mrf.mxu1 }
 0x10b   : > { %1279 = vst.msk [vmem:[%s1869_s27 + $0x40] sm:$0xf] %vm1262_vm5, %v1541_v42  ;;  %1311 = vst.msk [vmem:[%s1869_s27 + $0xc0] sm:$0xf] %vm1262_vm5, %v1573_v43  ;;  %v961_v50 = vsel %vm833_vm10, %v635_v33, %v897_v44  ;;  %v640_v53 = vadd.f32 %v1858_v38, %v639_v19  ;;  %vm831_vm12 = vcmp.ge.f32.partialorder %v627_v48, 0.0  ;;  %v768_v6 = vadd.f32 %v1858_v38, %v1968_v20 }
 0x10c   : > { %v1544_v54 = vpack.c.bf16 %v961_v50, %v961_v50  ;;  %v993_v55 = vsel %vm865_vm11, %v763_v34, %v929_v47  ;;  %v895_v56 = vmul.f32 0.01, %v627_v48  ;;  %vm863_vm13 = vcmp.ge.f32.partialorder %v755_v49, 0.0  ;;  %v1654_v11 = vpop.f32.mrf.mxu0  ;;  %v1686_v12 = vpop.f32.mrf.mxu1 }
 0x10d   : > { %v1576_v57 = vpack.c.bf16 %v993_v55, %v993_v55  ;;  %v927_v58 = vmul.f32 0.01, %v755_v49  ;;  %vm836_vm14 = vcmp.ge.f32.partialorder %v648_v51, 0.0  ;;  %v900_v62 = vmul.f32 0.01, %v648_v51 }
 0x10e   : > { %1282 = vst.msk [vmem:[%s1869_s27 + $0x4c] sm:$0xf] %vm1262_vm5, %v1544_v54  ;;  %v959_v61 = vsel %vm831_vm12, %v627_v48, %v895_v56  ;;  %vm868_vm15 = vcmp.ge.f32.partialorder %v776_v52, 0.0  ;;  %v932_v63 = vmul.f32 0.01, %v776_v52  ;;  %vm834_vm0 = vcmp.ge.f32.partialorder %v640_v53, 0.0  ;;  %v658_v25 = vpop.f32.mrf.mxu0  ;;  %v786_v26 = vpop.f32.mrf.mxu1 }
 0x10f   : > { %1314 = vst.msk [vmem:[%s1869_s27 + $0xcc] sm:$0xf] %vm1262_vm5, %v1576_v57  ;;  %v1542_v0 = vpack.c.bf16 %v959_v61, %v959_v61  ;;  %v991_v1 = vsel %vm863_vm13, %v755_v49, %v927_v58  ;;  %v898_v2 = vmul.f32 0.01, %v640_v53  ;;  %v964_v4 = vsel %vm836_vm14, %v648_v51, %v900_v62 }
 0x110   : > { %v1574_v3 = vpack.c.bf16 %v991_v1, %v991_v1  ;;  %v996_v5 = vsel %vm868_vm15, %v776_v52, %v932_v63  ;;  %v1547_v7 = vpack.c.bf16 %v964_v4, %v964_v4  ;;  %v651_v10 = vadd.f32 %v1970_v27, %v1858_v38  ;;  %v1657_v42 = vpop.f32.mrf.mxu0  ;;  %v1689_v43 = vpop.f32.mrf.mxu1 }
 0x111   : > { %1280 = vst.msk [vmem:[%s1869_s27 + $0x44] sm:$0xf] %vm1262_vm5, %v1542_v0  ;;  %v1579_v8 = vpack.c.bf16 %v996_v5, %v996_v5  ;;  %v962_v9 = vsel %vm834_vm0, %v640_v53, %v898_v2  ;;  %vm866_vm1 = vcmp.ge.f32.partialorder %v768_v6, 0.0  ;;  %v930_v14 = vmul.f32 0.01, %v768_v6 }
 0x112   : > { %1312 = vst.msk [vmem:[%s1869_s27 + $0xc4] sm:$0xf] %vm1262_vm5, %v1574_v3  ;;  %v1545_v13 = vpack.c.bf16 %v962_v9, %v962_v9  ;;  %v779_v15 = vadd.f32 %v1972_v28, %v1858_v38  ;;  %1285 = vst.msk [vmem:[%s1869_s27 + $0x58] sm:$0xf] %vm1262_vm5, %v1547_v7  ;;  %vm837_vm2 = vcmp.ge.f32.partialorder %v651_v10, 0.0  ;;  %v643_v17 = vadd.f32 %v1858_v38, %v1982_v35  ;;  %v671_v56 = vpop.f32.mrf.mxu0  ;;  %v799_v57 = vpop.f32.mrf.mxu1 }
 0x113   : > { %1317 = vst.msk [vmem:[%s1869_s27 + $0xd8] sm:$0xf] %vm1262_vm5, %v1579_v8  ;;  %v901_v16 = vmul.f32 0.01, %v651_v10  ;;  %v771_v18 = vadd.f32 %v1858_v38, %v1984_v36  ;;  %v994_v19 = vsel %vm866_vm1, %v768_v6, %v930_v14  ;;  %v664_v21 = vadd.f32 %v1653_v45, %v1858_v38 }
 0x114   : > { %1283 = vst.msk [vmem:[%s1869_s27 + $0x50] sm:$0xf] %vm1262_vm5, %v1545_v13  ;;  %vm869_vm3 = vcmp.ge.f32.partialorder %v779_v15, 0.0  ;;  %v933_v20 = vmul.f32 0.01, %v779_v15  ;;  %v1577_v22 = vpack.c.bf16 %v994_v19, %v994_v19  ;;  %vm835_vm4 = vcmp.ge.f32.partialorder %v643_v17, 0.0  ;;  %v1658_v7 = vpop.f32.mrf.mxu0  ;;  %v1690_v8 = vpop.f32.mrf.mxu1 }
 0x115   : > { %v965_v23 = vsel %vm837_vm2, %v651_v10, %v901_v16  ;;  %v899_v24 = vmul.f32 0.01, %v643_v17  ;;  %vm867_vm6 = vcmp.ge.f32.partialorder %v771_v18, 0.0  ;;  %v931_v29 = vmul.f32 0.01, %v771_v18 }
 0x116   : > { %v1548_v27 = vpack.c.bf16 %v965_v23, %v965_v23  ;;  %v997_v28 = vsel %vm869_vm3, %v779_v15, %v933_v20  ;;  %1315 = vst.msk [vmem:[%s1869_s27 + $0xd0] sm:$0xf] %vm1262_vm5, %v1577_v22  ;;  %vm840_vm7 = vcmp.ge.f32.partialorder %v664_v21, 0.0  ;;  %v904_v32 = vmul.f32 0.01, %v664_v21  ;;  %v802_v22 = vpop.f32.mrf.mxu1 }
 0x117   : > { %v1580_v30 = vpack.c.bf16 %v997_v28, %v997_v28  ;;  %v963_v31 = vsel %vm835_vm4, %v643_v17, %v899_v24  ;;  %v995_v34 = vsel %vm867_vm6, %v771_v18, %v931_v29  ;;  %v792_v35 = vadd.f32 %v1986_v46, %v1858_v38 }
 0x118   : > { %1286 = vst.msk [vmem:[%s1869_s27 + $0x5c] sm:$0xf] %vm1262_vm5, %v1548_v27  ;;  %v1546_v33 = vpack.c.bf16 %v963_v31, %v963_v31  ;;  %v656_v36 = vadd.f32 %v1858_v38, %v655_v59  ;;  %v1578_v37 = vpack.c.bf16 %v995_v34, %v995_v34  ;;  %v968_v39 = vsel %vm840_vm7, %v664_v21, %v904_v32  ;;  %v674_v21 = vpop.f32.mrf.mxu0 }
 0x119   : > { %1318 = vst.msk [vmem:[%s1869_s27 + $0xdc] sm:$0xf] %vm1262_vm5, %v1580_v30  ;;  %v784_v40 = vadd.f32 %v1858_v38, %v783_v60  ;;  %v667_v41 = vadd.f32 %v1654_v11, %v1858_v38  ;;  %v1551_v44 = vpack.c.bf16 %v968_v39, %v968_v39  ;;  %vm872_vm8 = vcmp.ge.f32.partialorder %v792_v35, 0.0 }
 0x11a   : > { %1284 = vst.msk [vmem:[%s1869_s27 + $0x54] sm:$0xf] %vm1262_vm5, %v1546_v33  ;;  %v936_v45 = vmul.f32 0.01, %v792_v35  ;;  %vm838_vm9 = vcmp.ge.f32.partialorder %v656_v36, 0.0  ;;  %v795_v50 = vadd.f32 %v1686_v12, %v1858_v38  ;;  %v659_v51 = vadd.f32 %v1858_v38, %v658_v25 }
 0x11b   : > { %1316 = vst.msk [vmem:[%s1869_s27 + $0xd4] sm:$0xf] %vm1262_vm5, %v1578_v37  ;;  %v902_v46 = vmul.f32 0.01, %v656_v36  ;;  %vm870_vm10 = vcmp.ge.f32.partialorder %v784_v40, 0.0  ;;  %vm841_vm11 = vcmp.ge.f32.partialorder %v667_v41, 0.0  ;;  %v787_v55 = vadd.f32 %v1858_v38, %v786_v26 }
 0x11c   : > { %v934_v47 = vmul.f32 0.01, %v784_v40  ;;  %1289 = vst.msk [vmem:[%s1869_s27 + $0x68] sm:$0xf] %vm1262_vm5, %v1551_v44  ;;  %v1000_v48 = vsel %vm872_vm8, %v792_v35, %v936_v45  ;;  %v905_v49 = vmul.f32 0.01, %v667_v41  ;;  %v680_v1 = vadd.f32 %v1657_v42, %v1858_v38 }
 0x11d   : > { %v1583_v52 = vpack.c.bf16 %v1000_v48, %v1000_v48  ;;  %v966_v53 = vsel %vm838_vm9, %v656_v36, %v902_v46  ;;  %vm873_vm12 = vcmp.ge.f32.partialorder %v795_v50, 0.0  ;;  %v937_v62 = vmul.f32 0.01, %v795_v50 }
 0x11e   : > { %v998_v54 = vsel %vm870_vm10, %v784_v40, %v934_v47  ;;  %v1549_v58 = vpack.c.bf16 %v966_v53, %v966_v53  ;;  %v969_v60 = vsel %vm841_vm11, %v667_v41, %v905_v49  ;;  %vm839_vm13 = vcmp.ge.f32.partialorder %v659_v51, 0.0 }
 0x11f   : > { %v1581_v59 = vpack.c.bf16 %v998_v54, %v998_v54  ;;  %1321 = vst.msk [vmem:[%s1869_s27 + $0xe8] sm:$0xf] %vm1262_vm5, %v1583_v52  ;;  %v1552_v61 = vpack.c.bf16 %v969_v60, %v969_v60  ;;  %v903_v63 = vmul.f32 0.01, %v659_v51  ;;  %vm871_vm14 = vcmp.ge.f32.partialorder %v787_v55, 0.0 }
 0x120   : > { %1287 = vst.msk [vmem:[%s1869_s27 + $0x60] sm:$0xf] %vm1262_vm5, %v1549_v58  ;;  %v935_v0 = vmul.f32 0.01, %v787_v55  ;;  %v808_v2 = vadd.f32 %v1689_v43, %v1858_v38  ;;  %v1001_v3 = vsel %vm873_vm12, %v795_v50, %v937_v62  ;;  %v672_v5 = vadd.f32 %v1858_v38, %v671_v56 }
 0x121   : > { %1319 = vst.msk [vmem:[%s1869_s27 + $0xe0] sm:$0xf] %vm1262_vm5, %v1581_v59  ;;  %1290 = vst.msk [vmem:[%s1869_s27 + $0x6c] sm:$0xf] %vm1262_vm5, %v1552_v61  ;;  %v967_v4 = vsel %vm839_vm13, %v659_v51, %v903_v63  ;;  %v800_v6 = vadd.f32 %v1858_v38, %v799_v57  ;;  %v1584_v9 = vpack.c.bf16 %v1001_v3, %v1001_v3  ;;  %vm844_vm15 = vcmp.ge.f32.partialorder %v680_v1, 0.0 }
 0x122   : > { %v1550_v10 = vpack.c.bf16 %v967_v4, %v967_v4  ;;  %v999_v11 = vsel %vm871_vm14, %v787_v55, %v935_v0  ;;  %v908_v13 = vmul.f32 0.01, %v680_v1  ;;  %vm876_vm0 = vcmp.ge.f32.partialorder %v808_v2, 0.0 }
 0x123   : > { %v1582_v12 = vpack.c.bf16 %v999_v11, %v999_v11  ;;  %v940_v14 = vmul.f32 0.01, %v808_v2  ;;  %1322 = vst.msk [vmem:[%s1869_s27 + $0xec] sm:$0xf] %vm1262_vm5, %v1584_v9  ;;  %vm842_vm1 = vcmp.ge.f32.partialorder %v672_v5, 0.0  ;;  %vm874_vm2 = vcmp.ge.f32.partialorder %v800_v6, 0.0 }
 0x124   : > { %1288 = vst.msk [vmem:[%s1869_s27 + $0x64] sm:$0xf] %vm1262_vm5, %v1550_v10  ;;  %v906_v15 = vmul.f32 0.01, %v672_v5  ;;  %v938_v16 = vmul.f32 0.01, %v800_v6  ;;  %v972_v17 = vsel %vm844_vm15, %v680_v1, %v908_v13  ;;  %v683_v19 = vadd.f32 %v1658_v7, %v1858_v38 }
 0x125   : > { %1320 = vst.msk [vmem:[%s1869_s27 + $0xe4] sm:$0xf] %vm1262_vm5, %v1582_v12  ;;  %v1004_v18 = vsel %vm876_vm0, %v808_v2, %v940_v14  ;;  %v811_v20 = vadd.f32 %v1690_v8, %v1858_v38  ;;  %v1555_v23 = vpack.c.bf16 %v972_v17, %v972_v17  ;;  %v675_v31 = vadd.f32 %v1858_v38, %v674_v21 }
 0x126   : > { %v1587_v24 = vpack.c.bf16 %v1004_v18, %v1004_v18  ;;  %v970_v25 = vsel %vm842_vm1, %v672_v5, %v906_v15  ;;  %v1002_v26 = vsel %vm874_vm2, %v800_v6, %v938_v16  ;;  %vm845_vm3 = vcmp.ge.f32.partialorder %v683_v19, 0.0 }
 0x127   : > { %v1553_v27 = vpack.c.bf16 %v970_v25, %v970_v25  ;;  %v1585_v28 = vpack.c.bf16 %v1002_v26, %v1002_v26  ;;  %v909_v29 = vmul.f32 0.01, %v683_v19  ;;  %1293 = vst.msk [vmem:[%s1869_s27 + $0x78] sm:$0xf] %vm1262_vm5, %v1555_v23  ;;  %vm877_vm4 = vcmp.ge.f32.partialorder %v811_v20, 0.0 }
 0x128   : > { %1325 = vst.msk [vmem:[%s1869_s27 + $0xf8] sm:$0xf] %vm1262_vm5, %v1587_v24  ;;  %v941_v30 = vmul.f32 0.01, %v811_v20  ;;  %v803_v32 = vadd.f32 %v1858_v38, %v802_v22  ;;  %vm843_vm6 = vcmp.ge.f32.partialorder %v675_v31, 0.0 }
 0x129   : > { %1291 = vst.msk [vmem:[%s1869_s27 + $0x70] sm:$0xf] %vm1262_vm5, %v1553_v27  ;;  %1323 = vst.msk [vmem:[%s1869_s27 + $0xf0] sm:$0xf] %vm1262_vm5, %v1585_v28  ;;  %v973_v33 = vsel %vm845_vm3, %v683_v19, %v909_v29  ;;  %v907_v36 = vmul.f32 0.01, %v675_v31 }
 0x12a   : > { %v1556_v34 = vpack.c.bf16 %v973_v33, %v973_v33  ;;  %v1005_v35 = vsel %vm877_vm4, %v811_v20, %v941_v30  ;;  %vm875_vm7 = vcmp.ge.f32.partialorder %v803_v32, 0.0  ;;  %v939_v39 = vmul.f32 0.01, %v803_v32 }
 0x12b   : > { %v1588_v37 = vpack.c.bf16 %v1005_v35, %v1005_v35  ;;  %v971_v40 = vsel %vm843_vm6, %v675_v31, %v907_v36 }
 0x12c   : > { %1294 = vst.msk [vmem:[%s1869_s27 + $0x7c] sm:$0xf] %vm1262_vm5, %v1556_v34  ;;  %v1554_v38 = vpack.c.bf16 %v971_v40, %v971_v40  ;;  %v1003_v41 = vsel %vm875_vm7, %v803_v32, %v939_v39 }
 0x12d   : > { %1326 = vst.msk [vmem:[%s1869_s27 + $0xfc] sm:$0xf] %vm1262_vm5, %v1588_v37  ;;  %v1586_v42 = vpack.c.bf16 %v1003_v41, %v1003_v41 }
 0x12e   : > { %1292 = vst.msk [vmem:[%s1869_s27 + $0x74] sm:$0xf] %vm1262_vm5, %v1554_v38 }
 0x12f   : > { %1324 = vst.msk [vmem:[%s1869_s27 + $0xf4] sm:$0xf] %vm1262_vm5, %v1586_v42 }
 0x130 PF: > { %s13_s12 = sadd.s32 1, %s1744_s12  }
 0x131   : > { %p10_p4 = scmp.ge.s32.totalorder %s13_s12, 66  }
 0x133   :  { %12 = sbr.rel (!%p10_p4) target bundleno = 1 (0x1), region = 62 }

// kernel: resnet_encoder_forward.10
= control target key start
LH: loop header
LB: loop body
LE: loop exit
PB: predicated region body
PF: predicated region fallthrough
CT: control target
= control target key end

     0   :  { %s1776_s12 = smov 0   ;;  %s2101_s0 = inlined_call_operand.vmem [shape: bf16[8192,36], index: 0, kind: input, shape index: {}]   ;;  %s2102_s1 = inlined_call_operand.vmem [shape: bf16[36,8], index: 1, kind: input, shape index: {}]   ;;  %s2103_s2 = inlined_call_operand.vmem [shape: f32[1,8], index: 2, kind: input, shape index: {}]   ;;  %s2104_s3 = inlined_call_operand.vmem [shape: bf16[8192,8], index: 3, kind: output, shape index: {}]  }
   0x1 LB: > { %s1385_s13 = sadd.s32 4294967295, %s1754_s12   ;;  %p1389_p0 = scmp.ge.s32.totalorder %s1754_s12, 1  ;;  %s1754_s12 = sphi %s1776_s12, %s13_s12  }
   0x2   : > { %p138_p1 = scmp.lt.s32.totalorder %s1754_s12, 17 }
   0x4   : > { %p139_p2 = pnand %p1389_p0, %p138_p1 }
   0x5   : > { %s1390_s18 = sshll.u32 (!%p139_p2), %s1385_s13, 6 }
   0x6   : > { %142 = sbr.rel (%p139_p2) target bundleno = 304 (0x130), region = 32  ;;  %p163_p3 = scmp.lt.s32.totalorder (!%p139_p2), %s1390_s18, 1023 }
   0xb   : > { %v1713_v0 = vld [vmem:[%s2102_s1 + $0x10] ss:$0 sps:$4 sm:$0x33]   ;;  %vm523_vm0 = vcmask 1041408   ;;  %v1714_v1 = vld [vmem:[%s2102_s1 + $0x8] sm:$0xff]   ;;  %v1715_v3 = vld [vmem:[%s2102_s1] sm:$0xff]  }
   0xc   : > { %1703 = vmatprep.subr.msk.bf16.mxu0 %vm523_vm0, %v1713_v0  ;;  %1704 = vmatprep.subr.msk.bf16.mxu1 %vm523_vm0, %v1713_v0  ;;  %v525_v2 = vsel %vm523_vm0, %v1713_v0, 0  ;;  %s2106_s18 = smov (!%p163_p3, %s1390_s18), 1023  ;;  %vm426_vm1 = vcmask 293888   ;;  %v1870_v36 = vld [vmem:[%s2103_s2] ss:$0 sm:$0xff]  ;;  %vm1264_vm4 = vcmask 60416  }
   0xd   : > { %1628 = vmatpush3.bf16.msra.mxu0 %v525_v2  ;;  %1700 = vmatpush3.bf16.msra.mxu1 %v525_v2  ;;  %s1391_s21 = sshll.u32 %s2106_s18, 2 }
   0xe   : > { %1629 = vmatprep.subr.bf16.mxu0 %v1714_v1  ;;  %1698 = vmatprep.subr.bf16.mxu1 %v1714_v1  ;;  %s1801_s24 = scalar_lea.vmem %s2101_s0, %s1391_s21  ;;  %s1881_s29 = scalar_lea.vmem %s2104_s3, %s1391_s21 }
   0xf   : > { %v1716_v4 = vld [vmem:[%s1801_s24] sm:$0xff]   ;;  %v1718_v6 = vld [vmem:[%s1801_s24 + $0x8] sm:$0xff]   ;;  %v1720_v8 = vld [vmem:[%s1801_s24 + $0x10] sm:$0xff]  }
  0x10   : > { %v1717_v5 = vld [vmem:[%s1801_s24 + $0x80] sm:$0xff]   ;;  %1633 = vmatprep.mubr.msk.bf16.mxu0 %vm426_vm1, %v1716_v4  ;;  %v1719_v7 = vld [vmem:[%s1801_s24 + $0x88] sm:$0xff]   ;;  %v1721_v9 = vld [vmem:[%s1801_s24 + $0x90] sm:$0xff]  }
  0x11   : > { %1630 = vmatpush3.bf16.msra.mxu0 %v1714_v1  ;;  %1701 = vmatpush3.bf16.msra.mxu1 %v1714_v1  ;;  %v1722_v10 = vld [vmem:[%s1801_s24 + $0x18] sm:$0xff]   ;;  %v1724_v12 = vld [vmem:[%s1801_s24 + $0x20] sm:$0xff]   ;;  %v1726_v14 = vld [vmem:[%s1801_s24 + $0x28] sm:$0xff]  }
  0x12   : > { %1631 = vmatprep.subr.bf16.mxu0 %v1715_v3  ;;  %1699 = vmatprep.subr.bf16.mxu1 %v1715_v3  ;;  %v1723_v11 = vld [vmem:[%s1801_s24 + $0x98] sm:$0xff]   ;;  %v1725_v13 = vld [vmem:[%s1801_s24 + $0xa0] sm:$0xff]   ;;  %v1727_v15 = vld [vmem:[%s1801_s24 + $0xa8] sm:$0xff]  }
  0x13   : > { %1665 = vmatprep.mubr.msk.bf16.mxu1 %vm426_vm1, %v1717_v5  ;;  %v1728_v16 = vld [vmem:[%s1801_s24 + $0x30] sm:$0xff]   ;;  %v1730_v18 = vld [vmem:[%s1801_s24 + $0x38] sm:$0xff]   ;;  %v1732_v20 = vld [vmem:[%s1801_s24 + $0x40] sm:$0xff]  }
  0x14   : > { %v1729_v17 = vld [vmem:[%s1801_s24 + $0xb0] sm:$0xff]   ;;  %v1731_v19 = vld [vmem:[%s1801_s24 + $0xb8] sm:$0xff]   ;;  %v1733_v21 = vld [vmem:[%s1801_s24 + $0xc0] sm:$0xff]  }
  0x15   : > { %1632 = vmatpush3.bf16.msra.mxu0 %v1715_v3  ;;  %1702 = vmatpush3.bf16.msra.mxu1 %v1715_v3  ;;  %v1734_v22 = vld [vmem:[%s1801_s24 + $0x48] sm:$0xff]   ;;  %v1736_v24 = vld [vmem:[%s1801_s24 + $0x50] sm:$0xff]   ;;  %v1738_v26 = vld [vmem:[%s1801_s24 + $0x58] sm:$0xff]  }
  0x16   : > { %v1735_v23 = vld [vmem:[%s1801_s24 + $0xc8] sm:$0xff]   ;;  %v1737_v25 = vld [vmem:[%s1801_s24 + $0xd0] sm:$0xff]   ;;  %v1739_v27 = vld [vmem:[%s1801_s24 + $0xd8] sm:$0xff]  }
  0x17   : > { %v1740_v28 = vld [vmem:[%s1801_s24 + $0x60] sm:$0xff]   ;;  %v1742_v30 = vld [vmem:[%s1801_s24 + $0x68] sm:$0xff]   ;;  %v1744_v32 = vld [vmem:[%s1801_s24 + $0x70] sm:$0xff]  }
  0x18   : > { %1634 = vmatmul.mubr.msk.bf16.vlgmr.msra.gmra.mxu0 %vm426_vm1, %v1718_v6  ;;  %1666 = vmatmul.mubr.msk.bf16.vlgmr.msra.gmra.mxu1 %vm426_vm1, %v1719_v7  ;;  %v1741_v29 = vld [vmem:[%s1801_s24 + $0xe0] sm:$0xff]   ;;  %v1743_v31 = vld [vmem:[%s1801_s24 + $0xe8] sm:$0xff]   ;;  %v1745_v33 = vld [vmem:[%s1801_s24 + $0xf0] sm:$0xff]  }
  0x19   : > { %1637 = vmatprep.mubr.msk.bf16.mxu0 %vm426_vm1, %v1720_v8  ;;  %1669 = vmatprep.mubr.msk.bf16.mxu1 %vm426_vm1, %v1721_v9  ;;  %v1746_v34 = vld [vmem:[%s1801_s24 + $0x78] sm:$0xff]  }
  0x1a   : > { %v1747_v35 = vld [vmem:[%s1801_s24 + $0xf8] sm:$0xff]  }
  0x20   : > { %1638 = vmatmul.mubr.msk.bf16.gmra.mxu0 %vm426_vm1, %v1722_v10  ;;  %1670 = vmatmul.mubr.msk.bf16.gmra.mxu1 %vm426_vm1, %v1723_v11 }
  0x21   : > { %1641 = vmatprep.mubr.msk.bf16.mxu0 %vm426_vm1, %v1724_v12  ;;  %1673 = vmatprep.mubr.msk.bf16.mxu1 %vm426_vm1, %v1725_v13 }
  0x28   : > { %1642 = vmatmul.mubr.msk.bf16.gmra.mxu0 %vm426_vm1, %v1726_v14  ;;  %1674 = vmatmul.mubr.msk.bf16.gmra.mxu1 %vm426_vm1, %v1727_v15 }
  0x29   : > { %1645 = vmatprep.mubr.msk.bf16.mxu0 %vm426_vm1, %v1728_v16  ;;  %1677 = vmatprep.mubr.msk.bf16.mxu1 %vm426_vm1, %v1729_v17 }
  0x30   : > { %1646 = vmatmul.mubr.msk.bf16.gmra.mxu0 %vm426_vm1, %v1730_v18  ;;  %1678 = vmatmul.mubr.msk.bf16.gmra.mxu1 %vm426_vm1, %v1731_v19 }
  0x31   : > { %1649 = vmatprep.mubr.msk.bf16.mxu0 %vm426_vm1, %v1732_v20  ;;  %1681 = vmatprep.mubr.msk.bf16.mxu1 %vm426_vm1, %v1733_v21 }
  0x38   : > { %1650 = vmatmul.mubr.msk.bf16.gmra.mxu0 %vm426_vm1, %v1734_v22  ;;  %1682 = vmatmul.mubr.msk.bf16.gmra.mxu1 %vm426_vm1, %v1735_v23 }
  0x39   : > { %1653 = vmatprep.mubr.msk.bf16.mxu0 %vm426_vm1, %v1736_v24  ;;  %1685 = vmatprep.mubr.msk.bf16.mxu1 %vm426_vm1, %v1737_v25 }
  0x40   : > { %1654 = vmatmul.mubr.msk.bf16.gmra.mxu0 %vm426_vm1, %v1738_v26  ;;  %1686 = vmatmul.mubr.msk.bf16.gmra.mxu1 %vm426_vm1, %v1739_v27 }
  0x41   : > { %1657 = vmatprep.mubr.msk.bf16.mxu0 %vm426_vm1, %v1740_v28  ;;  %1689 = vmatprep.mubr.msk.bf16.mxu1 %vm426_vm1, %v1741_v29 }
  0x48   : > { %1658 = vmatmul.mubr.msk.bf16.gmra.mxu0 %vm426_vm1, %v1742_v30  ;;  %1690 = vmatmul.mubr.msk.bf16.gmra.mxu1 %vm426_vm1, %v1743_v31 }
  0x49   : > { %1661 = vmatprep.mubr.msk.bf16.mxu0 %vm426_vm1, %v1744_v32  ;;  %1693 = vmatprep.mubr.msk.bf16.mxu1 %vm426_vm1, %v1745_v33 }
  0x50   : > { %1662 = vmatmul.mubr.msk.bf16.gmra.mxu0 %vm426_vm1, %v1746_v34  ;;  %1694 = vmatmul.mubr.msk.bf16.gmra.mxu1 %vm426_vm1, %v1747_v35 }
  0xd8   : > { %v1635_v37 = vpop.f32.mrf.mxu0  ;;  %v1667_v38 = vpop.f32.mrf.mxu1 }
  0xd9   : > { %v570_v39 = vadd.f32 %v1635_v37, %v1870_v36  ;;  %v698_v40 = vadd.f32 %v1667_v38, %v1870_v36 }
  0xda   : > { %v561_v41 = vpop.f32.mrf.mxu0  ;;  %v689_v42 = vpop.f32.mrf.mxu1 }
  0xdb   : > { %vm818_vm2 = vcmp.ge.f32.partialorder %v570_v39, 0.0  ;;  %v882_v43 = vmul.f32 0.01, %v570_v39  ;;  %vm850_vm3 = vcmp.ge.f32.partialorder %v698_v40, 0.0  ;;  %v914_v44 = vmul.f32 0.01, %v698_v40 }
  0xdc   : > { %v562_v45 = vadd.f32 %v1870_v36, %v561_v41  ;;  %v690_v46 = vadd.f32 %v1870_v36, %v689_v42  ;;  %v1636_v47 = vpop.f32.mrf.mxu0  ;;  %v1668_v48 = vpop.f32.mrf.mxu1 }
  0xdd   : > { %v946_v49 = vsel %vm818_vm2, %v570_v39, %v882_v43  ;;  %v978_v50 = vsel %vm850_vm3, %v698_v40, %v914_v44  ;;  %v573_v51 = vadd.f32 %v1636_v47, %v1870_v36  ;;  %v701_v52 = vadd.f32 %v1668_v48, %v1870_v36 }
  0xde   : > { %v1530_v53 = vpack.c.bf16 %v946_v49, %v946_v49  ;;  %v1562_v54 = vpack.c.bf16 %v978_v50, %v978_v50  ;;  %vm816_vm5 = vcmp.ge.f32.partialorder %v562_v45, 0.0  ;;  %v880_v55 = vmul.f32 0.01, %v562_v45  ;;  %v564_v56 = vpop.f32.mrf.mxu0  ;;  %v692_v57 = vpop.f32.mrf.mxu1 }
  0xdf   : > { %vm848_vm6 = vcmp.ge.f32.partialorder %v690_v46, 0.0  ;;  %v912_v58 = vmul.f32 0.01, %v690_v46  ;;  %vm819_vm7 = vcmp.ge.f32.partialorder %v573_v51, 0.0  ;;  %v883_v59 = vmul.f32 0.01, %v573_v51 }
  0xe0   : > { %1267 = vst.msk [vmem:[%s1881_s29 + $0x8] sm:$0xf] %vm1264_vm4, %v1530_v53  ;;  %1299 = vst.msk [vmem:[%s1881_s29 + $0x88] sm:$0xf] %vm1264_vm4, %v1562_v54  ;;  %v944_v60 = vsel %vm816_vm5, %v562_v45, %v880_v55  ;;  %vm851_vm8 = vcmp.ge.f32.partialorder %v701_v52, 0.0  ;;  %v565_v62 = vadd.f32 %v1870_v36, %v564_v56  ;;  %v1639_v63 = vpop.f32.mrf.mxu0  ;;  %v1671_v0 = vpop.f32.mrf.mxu1  ;;  %v693_v4 = vadd.f32 %v1870_v36, %v692_v57 }
  0xe1   : > { %v915_v61 = vmul.f32 0.01, %v701_v52  ;;  %v1528_v1 = vpack.c.bf16 %v944_v60, %v944_v60  ;;  %v976_v2 = vsel %vm848_vm6, %v690_v46, %v912_v58  ;;  %v947_v3 = vsel %vm819_vm7, %v573_v51, %v883_v59 }
  0xe2   : > { %v1560_v5 = vpack.c.bf16 %v976_v2, %v976_v2  ;;  %v1531_v6 = vpack.c.bf16 %v947_v3, %v947_v3  ;;  %vm817_vm9 = vcmp.ge.f32.partialorder %v565_v62, 0.0  ;;  %v577_v8 = vpop.f32.mrf.mxu0  ;;  %v705_v9 = vpop.f32.mrf.mxu1  ;;  %v881_v11 = vmul.f32 0.01, %v565_v62 }
  0xe3   : > { %v979_v7 = vsel %vm851_vm8, %v701_v52, %v915_v61  ;;  %1265 = vst.msk [vmem:[%s1881_s29] sm:$0xf] %vm1264_vm4, %v1528_v1  ;;  %vm849_vm10 = vcmp.ge.f32.partialorder %v693_v4, 0.0  ;;  %v913_v12 = vmul.f32 0.01, %v693_v4  ;;  %v586_v13 = vadd.f32 %v1639_v63, %v1870_v36 }
  0xe4   : > { %v1563_v10 = vpack.c.bf16 %v979_v7, %v979_v7  ;;  %1297 = vst.msk [vmem:[%s1881_s29 + $0x80] sm:$0xf] %vm1264_vm4, %v1560_v5  ;;  %1268 = vst.msk [vmem:[%s1881_s29 + $0xc] sm:$0xf] %vm1264_vm4, %v1531_v6  ;;  %v714_v14 = vadd.f32 %v1671_v0, %v1870_v36  ;;  %v578_v15 = vadd.f32 %v1870_v36, %v577_v8  ;;  %v1640_v17 = vpop.f32.mrf.mxu0  ;;  %v1672_v18 = vpop.f32.mrf.mxu1 }
  0xe5   : > { %v706_v16 = vadd.f32 %v1870_v36, %v705_v9  ;;  %v945_v19 = vsel %vm817_vm9, %v565_v62, %v881_v11  ;;  %v977_v20 = vsel %vm849_vm10, %v693_v4, %v913_v12  ;;  %v589_v21 = vadd.f32 %v1640_v17, %v1870_v36 }
  0xe6   : > { %1300 = vst.msk [vmem:[%s1881_s29 + $0x8c] sm:$0xf] %vm1264_vm4, %v1563_v10  ;;  %v717_v22 = vadd.f32 %v1672_v18, %v1870_v36  ;;  %v1529_v23 = vpack.c.bf16 %v945_v19, %v945_v19  ;;  %v1561_v24 = vpack.c.bf16 %v977_v20, %v977_v20  ;;  %vm822_vm11 = vcmp.ge.f32.partialorder %v586_v13, 0.0  ;;  %v580_v26 = vpop.f32.mrf.mxu0  ;;  %v708_v27 = vpop.f32.mrf.mxu1 }
  0xe7   : > { %v886_v25 = vmul.f32 0.01, %v586_v13  ;;  %vm854_vm12 = vcmp.ge.f32.partialorder %v714_v14, 0.0  ;;  %v918_v28 = vmul.f32 0.01, %v714_v14  ;;  %vm820_vm13 = vcmp.ge.f32.partialorder %v578_v15, 0.0 }
  0xe8   : > { %v884_v29 = vmul.f32 0.01, %v578_v15  ;;  %1266 = vst.msk [vmem:[%s1881_s29 + $0x4] sm:$0xf] %vm1264_vm4, %v1529_v23  ;;  %1298 = vst.msk [vmem:[%s1881_s29 + $0x84] sm:$0xf] %vm1264_vm4, %v1561_v24  ;;  %v1643_v32 = vpop.f32.mrf.mxu0  ;;  %v1675_v33 = vpop.f32.mrf.mxu1  ;;  %v581_v47 = vadd.f32 %v1870_v36, %v580_v26  ;;  %v709_v49 = vadd.f32 %v1870_v36, %v708_v27 }
  0xe9   : > { %v950_v30 = vsel %vm822_vm11, %v586_v13, %v886_v25  ;;  %vm852_vm14 = vcmp.ge.f32.partialorder %v706_v16, 0.0  ;;  %v916_v31 = vmul.f32 0.01, %v706_v16  ;;  %vm823_vm15 = vcmp.ge.f32.partialorder %v589_v21, 0.0 }
  0xea   : > { %v1534_v34 = vpack.c.bf16 %v950_v30, %v950_v30  ;;  %v982_v35 = vsel %vm854_vm12, %v714_v14, %v918_v28  ;;  %v948_v37 = vsel %vm820_vm13, %v578_v15, %v884_v29  ;;  %v887_v38 = vmul.f32 0.01, %v589_v21  ;;  %v593_v42 = vpop.f32.mrf.mxu0  ;;  %v721_v43 = vpop.f32.mrf.mxu1 }
  0xeb   : > { %v1566_v39 = vpack.c.bf16 %v982_v35, %v982_v35  ;;  %v1532_v40 = vpack.c.bf16 %v948_v37, %v948_v37  ;;  %v980_v41 = vsel %vm852_vm14, %v706_v16, %v916_v31  ;;  %vm855_vm0 = vcmp.ge.f32.partialorder %v717_v22, 0.0 }
  0xec   : > { %1271 = vst.msk [vmem:[%s1881_s29 + $0x18] sm:$0xf] %vm1264_vm4, %v1534_v34  ;;  %v1564_v44 = vpack.c.bf16 %v980_v41, %v980_v41  ;;  %v951_v45 = vsel %vm823_vm15, %v589_v21, %v887_v38  ;;  %v919_v46 = vmul.f32 0.01, %v717_v22  ;;  %v602_v50 = vadd.f32 %v1643_v32, %v1870_v36  ;;  %v1644_v52 = vpop.f32.mrf.mxu0  ;;  %v1676_v53 = vpop.f32.mrf.mxu1 }
  0xed   : > { %1303 = vst.msk [vmem:[%s1881_s29 + $0x98] sm:$0xf] %vm1264_vm4, %v1566_v39  ;;  %1269 = vst.msk [vmem:[%s1881_s29 + $0x10] sm:$0xf] %vm1264_vm4, %v1532_v40  ;;  %v1535_v48 = vpack.c.bf16 %v951_v45, %v951_v45  ;;  %v730_v51 = vadd.f32 %v1675_v33, %v1870_v36  ;;  %vm821_vm1 = vcmp.ge.f32.partialorder %v581_v47, 0.0  ;;  %v594_v56 = vadd.f32 %v1870_v36, %v593_v42 }
  0xee   : > { %1301 = vst.msk [vmem:[%s1881_s29 + $0x90] sm:$0xf] %vm1264_vm4, %v1564_v44  ;;  %v983_v54 = vsel %vm855_vm0, %v717_v22, %v919_v46  ;;  %v885_v55 = vmul.f32 0.01, %v581_v47  ;;  %vm853_vm2 = vcmp.ge.f32.partialorder %v709_v49, 0.0  ;;  %vm826_vm3 = vcmp.ge.f32.partialorder %v602_v50, 0.0  ;;  %v596_v59 = vpop.f32.mrf.mxu0  ;;  %v724_v60 = vpop.f32.mrf.mxu1 }
  0xef   : > { %1272 = vst.msk [vmem:[%s1881_s29 + $0x1c] sm:$0xf] %vm1264_vm4, %v1535_v48  ;;  %v1567_v57 = vpack.c.bf16 %v983_v54, %v983_v54  ;;  %v917_v58 = vmul.f32 0.01, %v709_v49  ;;  %v890_v62 = vmul.f32 0.01, %v602_v50  ;;  %v722_v8 = vadd.f32 %v1870_v36, %v721_v43 }
  0xf0   : > { %v949_v61 = vsel %vm821_vm1, %v581_v47, %v885_v55  ;;  %vm858_vm5 = vcmp.ge.f32.partialorder %v730_v51, 0.0  ;;  %v922_v63 = vmul.f32 0.01, %v730_v51  ;;  %vm824_vm6 = vcmp.ge.f32.partialorder %v594_v56, 0.0  ;;  %v1647_v3 = vpop.f32.mrf.mxu0  ;;  %v1679_v4 = vpop.f32.mrf.mxu1 }
  0xf1   : > { %1304 = vst.msk [vmem:[%s1881_s29 + $0x9c] sm:$0xf] %vm1264_vm4, %v1567_v57  ;;  %v1533_v0 = vpack.c.bf16 %v949_v61, %v949_v61  ;;  %v981_v1 = vsel %vm853_vm2, %v709_v49, %v917_v58  ;;  %v888_v2 = vmul.f32 0.01, %v594_v56  ;;  %v954_v6 = vsel %vm826_vm3, %v602_v50, %v890_v62 }
  0xf2   : > { %v1565_v5 = vpack.c.bf16 %v981_v1, %v981_v1  ;;  %v986_v7 = vsel %vm858_vm5, %v730_v51, %v922_v63  ;;  %v1538_v9 = vpack.c.bf16 %v954_v6, %v954_v6  ;;  %v605_v12 = vadd.f32 %v1644_v52, %v1870_v36  ;;  %v609_v13 = vpop.f32.mrf.mxu0  ;;  %v737_v14 = vpop.f32.mrf.mxu1 }
  0xf3   : > { %1270 = vst.msk [vmem:[%s1881_s29 + $0x14] sm:$0xf] %vm1264_vm4, %v1533_v0  ;;  %v1570_v10 = vpack.c.bf16 %v986_v7, %v986_v7  ;;  %v952_v11 = vsel %vm824_vm6, %v594_v56, %v888_v2  ;;  %vm856_vm7 = vcmp.ge.f32.partialorder %v722_v8, 0.0  ;;  %v920_v16 = vmul.f32 0.01, %v722_v8 }
  0xf4   : > { %1302 = vst.msk [vmem:[%s1881_s29 + $0x94] sm:$0xf] %vm1264_vm4, %v1565_v5  ;;  %v1536_v15 = vpack.c.bf16 %v952_v11, %v952_v11  ;;  %v733_v17 = vadd.f32 %v1676_v53, %v1870_v36  ;;  %1275 = vst.msk [vmem:[%s1881_s29 + $0x28] sm:$0xf] %vm1264_vm4, %v1538_v9  ;;  %vm827_vm8 = vcmp.ge.f32.partialorder %v605_v12, 0.0  ;;  %v597_v19 = vadd.f32 %v1870_v36, %v596_v59  ;;  %v1648_v21 = vpop.f32.mrf.mxu0  ;;  %v1680_v22 = vpop.f32.mrf.mxu1 }
  0xf5   : > { %1307 = vst.msk [vmem:[%s1881_s29 + $0xa8] sm:$0xf] %vm1264_vm4, %v1570_v10  ;;  %v891_v18 = vmul.f32 0.01, %v605_v12  ;;  %v725_v20 = vadd.f32 %v1870_v36, %v724_v60  ;;  %v984_v23 = vsel %vm856_vm7, %v722_v8, %v920_v16  ;;  %v618_v25 = vadd.f32 %v1647_v3, %v1870_v36 }
  0xf6   : > { %1273 = vst.msk [vmem:[%s1881_s29 + $0x20] sm:$0xf] %vm1264_vm4, %v1536_v15  ;;  %vm859_vm9 = vcmp.ge.f32.partialorder %v733_v17, 0.0  ;;  %v923_v24 = vmul.f32 0.01, %v733_v17  ;;  %v1568_v26 = vpack.c.bf16 %v984_v23, %v984_v23  ;;  %vm825_vm10 = vcmp.ge.f32.partialorder %v597_v19, 0.0  ;;  %v612_v29 = vpop.f32.mrf.mxu0  ;;  %v740_v30 = vpop.f32.mrf.mxu1 }
  0xf7   : > { %v955_v27 = vsel %vm827_vm8, %v605_v12, %v891_v18  ;;  %v889_v28 = vmul.f32 0.01, %v597_v19  ;;  %vm857_vm11 = vcmp.ge.f32.partialorder %v725_v20, 0.0  ;;  %v921_v33 = vmul.f32 0.01, %v725_v20 }
  0xf8   : > { %v1539_v31 = vpack.c.bf16 %v955_v27, %v955_v27  ;;  %v987_v32 = vsel %vm859_vm9, %v733_v17, %v923_v24  ;;  %1305 = vst.msk [vmem:[%s1881_s29 + $0xa0] sm:$0xf] %vm1264_vm4, %v1568_v26  ;;  %vm830_vm12 = vcmp.ge.f32.partialorder %v618_v25, 0.0  ;;  %v894_v37 = vmul.f32 0.01, %v618_v25  ;;  %v1651_v38 = vpop.f32.mrf.mxu0  ;;  %v1683_v39 = vpop.f32.mrf.mxu1 }
  0xf9   : > { %v1571_v34 = vpack.c.bf16 %v987_v32, %v987_v32  ;;  %v953_v35 = vsel %vm825_vm10, %v597_v19, %v889_v28  ;;  %v985_v41 = vsel %vm857_vm11, %v725_v20, %v921_v33  ;;  %v746_v42 = vadd.f32 %v1679_v4, %v1870_v36 }
  0xfa   : > { %1276 = vst.msk [vmem:[%s1881_s29 + $0x2c] sm:$0xf] %vm1264_vm4, %v1539_v31  ;;  %v1537_v40 = vpack.c.bf16 %v953_v35, %v953_v35  ;;  %v610_v43 = vadd.f32 %v1870_v36, %v609_v13  ;;  %v1569_v44 = vpack.c.bf16 %v985_v41, %v985_v41  ;;  %v958_v45 = vsel %vm830_vm12, %v618_v25, %v894_v37  ;;  %v625_v48 = vpop.f32.mrf.mxu0  ;;  %v753_v49 = vpop.f32.mrf.mxu1 }
  0xfb   : > { %1308 = vst.msk [vmem:[%s1881_s29 + $0xac] sm:$0xf] %vm1264_vm4, %v1571_v34  ;;  %v738_v46 = vadd.f32 %v1870_v36, %v737_v14  ;;  %v621_v47 = vadd.f32 %v1648_v21, %v1870_v36  ;;  %v1542_v50 = vpack.c.bf16 %v958_v45, %v958_v45  ;;  %vm862_vm13 = vcmp.ge.f32.partialorder %v746_v42, 0.0 }
  0xfc   : > { %1274 = vst.msk [vmem:[%s1881_s29 + $0x24] sm:$0xf] %vm1264_vm4, %v1537_v40  ;;  %v926_v51 = vmul.f32 0.01, %v746_v42  ;;  %vm828_vm14 = vcmp.ge.f32.partialorder %v610_v43, 0.0  ;;  %v1652_v54 = vpop.f32.mrf.mxu0  ;;  %v1684_v55 = vpop.f32.mrf.mxu1  ;;  %v749_v58 = vadd.f32 %v1680_v22, %v1870_v36  ;;  %v613_v59 = vadd.f32 %v1870_v36, %v612_v29 }
  0xfd   : > { %1306 = vst.msk [vmem:[%s1881_s29 + $0xa4] sm:$0xf] %vm1264_vm4, %v1569_v44  ;;  %v892_v52 = vmul.f32 0.01, %v610_v43  ;;  %vm860_vm15 = vcmp.ge.f32.partialorder %v738_v46, 0.0  ;;  %vm831_vm0 = vcmp.ge.f32.partialorder %v621_v47, 0.0  ;;  %v741_v63 = vadd.f32 %v1870_v36, %v740_v30 }
  0xfe   : > { %v924_v53 = vmul.f32 0.01, %v738_v46  ;;  %1279 = vst.msk [vmem:[%s1881_s29 + $0x38] sm:$0xf] %vm1264_vm4, %v1542_v50  ;;  %v990_v56 = vsel %vm862_vm13, %v746_v42, %v926_v51  ;;  %v895_v57 = vmul.f32 0.01, %v621_v47  ;;  %v1963_v0 = vpop.f32.mrf.mxu0  ;;  %v1965_v1 = vpop.f32.mrf.mxu1  ;;  %v634_v11 = vadd.f32 %v1651_v38, %v1870_v36 }
  0xff   : > { %v1574_v60 = vpack.c.bf16 %v990_v56, %v990_v56  ;;  %v956_v61 = vsel %vm828_vm14, %v610_v43, %v892_v52  ;;  %vm863_vm1 = vcmp.ge.f32.partialorder %v749_v58, 0.0  ;;  %v927_v6 = vmul.f32 0.01, %v749_v58 }
 0x100   : > { %v988_v62 = vsel %vm860_vm15, %v738_v46, %v924_v53  ;;  %v1540_v2 = vpack.c.bf16 %v956_v61, %v956_v61  ;;  %v959_v4 = vsel %vm831_vm0, %v621_v47, %v895_v57  ;;  %vm829_vm2 = vcmp.ge.f32.partialorder %v613_v59, 0.0  ;;  %v1655_v8 = vpop.f32.mrf.mxu0  ;;  %v1687_v9 = vpop.f32.mrf.mxu1 }
 0x101   : > { %v1572_v3 = vpack.c.bf16 %v988_v62, %v988_v62  ;;  %1311 = vst.msk [vmem:[%s1881_s29 + $0xb8] sm:$0xf] %vm1264_vm4, %v1574_v60  ;;  %v1543_v5 = vpack.c.bf16 %v959_v4, %v959_v4  ;;  %v893_v7 = vmul.f32 0.01, %v613_v59  ;;  %vm861_vm3 = vcmp.ge.f32.partialorder %v741_v63, 0.0 }
 0x102   : > { %1277 = vst.msk [vmem:[%s1881_s29 + $0x30] sm:$0xf] %vm1264_vm4, %v1540_v2  ;;  %v925_v10 = vmul.f32 0.01, %v741_v63  ;;  %v762_v12 = vadd.f32 %v1683_v39, %v1870_v36  ;;  %v991_v13 = vsel %vm863_vm1, %v749_v58, %v927_v6  ;;  %v626_v15 = vadd.f32 %v1870_v36, %v625_v48  ;;  %v641_v17 = vpop.f32.mrf.mxu0  ;;  %v1980_v18 = vpop.f32.mrf.mxu1 }
 0x103   : > { %1309 = vst.msk [vmem:[%s1881_s29 + $0xb0] sm:$0xf] %vm1264_vm4, %v1572_v3  ;;  %1280 = vst.msk [vmem:[%s1881_s29 + $0x3c] sm:$0xf] %vm1264_vm4, %v1543_v5  ;;  %v957_v14 = vsel %vm829_vm2, %v613_v59, %v893_v7  ;;  %v754_v16 = vadd.f32 %v1870_v36, %v753_v49  ;;  %v1575_v19 = vpack.c.bf16 %v991_v13, %v991_v13  ;;  %vm834_vm5 = vcmp.ge.f32.partialorder %v634_v11, 0.0 }
 0x104   : > { %v1541_v20 = vpack.c.bf16 %v957_v14, %v957_v14  ;;  %v989_v21 = vsel %vm861_vm3, %v741_v63, %v925_v10  ;;  %v898_v23 = vmul.f32 0.01, %v634_v11  ;;  %vm866_vm6 = vcmp.ge.f32.partialorder %v762_v12, 0.0  ;;  %v1982_v25 = vpop.f32.mrf.mxu0  ;;  %v1984_v26 = vpop.f32.mrf.mxu1 }
 0x105   : > { %v1573_v22 = vpack.c.bf16 %v989_v21, %v989_v21  ;;  %v930_v24 = vmul.f32 0.01, %v762_v12  ;;  %1312 = vst.msk [vmem:[%s1881_s29 + $0xbc] sm:$0xf] %vm1264_vm4, %v1575_v19  ;;  %vm832_vm7 = vcmp.ge.f32.partialorder %v626_v15, 0.0  ;;  %vm864_vm8 = vcmp.ge.f32.partialorder %v754_v16, 0.0 }
 0x106   : > { %1278 = vst.msk [vmem:[%s1881_s29 + $0x34] sm:$0xf] %vm1264_vm4, %v1541_v20  ;;  %v896_v27 = vmul.f32 0.01, %v626_v15  ;;  %v928_v28 = vmul.f32 0.01, %v754_v16  ;;  %v962_v29 = vsel %vm834_vm5, %v634_v11, %v898_v23  ;;  %v637_v31 = vadd.f32 %v1652_v54, %v1870_v36  ;;  %v1994_v33 = vpop.f32.mrf.mxu0  ;;  %v1996_v34 = vpop.f32.mrf.mxu1 }
 0x107   : > { %1310 = vst.msk [vmem:[%s1881_s29 + $0xb4] sm:$0xf] %vm1264_vm4, %v1573_v22  ;;  %v994_v30 = vsel %vm866_vm6, %v762_v12, %v930_v24  ;;  %v765_v32 = vadd.f32 %v1684_v55, %v1870_v36  ;;  %v1546_v35 = vpack.c.bf16 %v962_v29, %v962_v29  ;;  %v629_v46 = vadd.f32 %v1870_v36, %v1963_v0 }
 0x108   : > { %v1578_v37 = vpack.c.bf16 %v994_v30, %v994_v30  ;;  %v960_v38 = vsel %vm832_vm7, %v626_v15, %v896_v27  ;;  %v992_v39 = vsel %vm864_vm8, %v754_v16, %v928_v28  ;;  %vm835_vm9 = vcmp.ge.f32.partialorder %v637_v31, 0.0  ;;  %v1659_v43 = vpop.f32.mrf.mxu0  ;;  %v1998_v44 = vpop.f32.mrf.mxu1 }
 0x109   : > { %v1544_v40 = vpack.c.bf16 %v960_v38, %v960_v38  ;;  %v1576_v41 = vpack.c.bf16 %v992_v39, %v992_v39  ;;  %v899_v42 = vmul.f32 0.01, %v637_v31  ;;  %1283 = vst.msk [vmem:[%s1881_s29 + $0x48] sm:$0xf] %vm1264_vm4, %v1546_v35  ;;  %vm867_vm10 = vcmp.ge.f32.partialorder %v765_v32, 0.0 }
 0x10a   : > { %1315 = vst.msk [vmem:[%s1881_s29 + $0xc8] sm:$0xf] %vm1264_vm4, %v1578_v37  ;;  %v931_v45 = vmul.f32 0.01, %v765_v32  ;;  %v757_v47 = vadd.f32 %v1870_v36, %v1965_v1  ;;  %v650_v49 = vadd.f32 %v1655_v8, %v1870_v36  ;;  %v778_v50 = vadd.f32 %v1687_v9, %v1870_v36  ;;  %v657_v57 = vpop.f32.mrf.mxu0  ;;  %v785_v58 = vpop.f32.mrf.mxu1 }
 0x10b   : > { %1281 = vst.msk [vmem:[%s1881_s29 + $0x40] sm:$0xf] %vm1264_vm4, %v1544_v40  ;;  %1313 = vst.msk [vmem:[%s1881_s29 + $0xc0] sm:$0xf] %vm1264_vm4, %v1576_v41  ;;  %v963_v48 = vsel %vm835_vm9, %v637_v31, %v899_v42  ;;  %v642_v51 = vadd.f32 %v1870_v36, %v641_v17  ;;  %vm833_vm11 = vcmp.ge.f32.partialorder %v629_v46, 0.0  ;;  %v770_v4 = vadd.f32 %v1870_v36, %v1980_v18 }
 0x10c   : > { %v1547_v52 = vpack.c.bf16 %v963_v48, %v963_v48  ;;  %v995_v53 = vsel %vm867_vm10, %v765_v32, %v931_v45  ;;  %v897_v54 = vmul.f32 0.01, %v629_v46  ;;  %vm865_vm12 = vcmp.ge.f32.partialorder %v757_v47, 0.0  ;;  %v1660_v9 = vpop.f32.mrf.mxu0  ;;  %v1692_v10 = vpop.f32.mrf.mxu1 }
 0x10d   : > { %v1579_v55 = vpack.c.bf16 %v995_v53, %v995_v53  ;;  %v929_v56 = vmul.f32 0.01, %v757_v47  ;;  %vm838_vm13 = vcmp.ge.f32.partialorder %v650_v49, 0.0  ;;  %v902_v60 = vmul.f32 0.01, %v650_v49 }
 0x10e   : > { %1284 = vst.msk [vmem:[%s1881_s29 + $0x4c] sm:$0xf] %vm1264_vm4, %v1547_v52  ;;  %v961_v59 = vsel %vm833_vm11, %v629_v46, %v897_v54  ;;  %vm870_vm14 = vcmp.ge.f32.partialorder %v778_v50, 0.0  ;;  %v934_v61 = vmul.f32 0.01, %v778_v50  ;;  %vm836_vm15 = vcmp.ge.f32.partialorder %v642_v51, 0.0  ;;  %v660_v23 = vpop.f32.mrf.mxu0  ;;  %v788_v24 = vpop.f32.mrf.mxu1 }
 0x10f   : > { %1316 = vst.msk [vmem:[%s1881_s29 + $0xcc] sm:$0xf] %vm1264_vm4, %v1579_v55  ;;  %v1545_v62 = vpack.c.bf16 %v961_v59, %v961_v59  ;;  %v993_v63 = vsel %vm865_vm12, %v757_v47, %v929_v56  ;;  %v900_v0 = vmul.f32 0.01, %v642_v51  ;;  %v966_v2 = vsel %vm838_vm13, %v650_v49, %v902_v60 }
 0x110   : > { %v1577_v1 = vpack.c.bf16 %v993_v63, %v993_v63  ;;  %v998_v3 = vsel %vm870_vm14, %v778_v50, %v934_v61  ;;  %v1550_v5 = vpack.c.bf16 %v966_v2, %v966_v2  ;;  %v653_v8 = vadd.f32 %v1982_v25, %v1870_v36  ;;  %v1663_v40 = vpop.f32.mrf.mxu0  ;;  %v1695_v41 = vpop.f32.mrf.mxu1 }
 0x111   : > { %1282 = vst.msk [vmem:[%s1881_s29 + $0x44] sm:$0xf] %vm1264_vm4, %v1545_v62  ;;  %v1582_v6 = vpack.c.bf16 %v998_v3, %v998_v3  ;;  %v964_v7 = vsel %vm836_vm15, %v642_v51, %v900_v0  ;;  %vm868_vm0 = vcmp.ge.f32.partialorder %v770_v4, 0.0  ;;  %v932_v12 = vmul.f32 0.01, %v770_v4 }
 0x112   : > { %1314 = vst.msk [vmem:[%s1881_s29 + $0xc4] sm:$0xf] %vm1264_vm4, %v1577_v1  ;;  %v1548_v11 = vpack.c.bf16 %v964_v7, %v964_v7  ;;  %v781_v13 = vadd.f32 %v1984_v26, %v1870_v36  ;;  %1287 = vst.msk [vmem:[%s1881_s29 + $0x58] sm:$0xf] %vm1264_vm4, %v1550_v5  ;;  %vm839_vm1 = vcmp.ge.f32.partialorder %v653_v8, 0.0  ;;  %v645_v15 = vadd.f32 %v1870_v36, %v1994_v33  ;;  %v673_v54 = vpop.f32.mrf.mxu0  ;;  %v801_v55 = vpop.f32.mrf.mxu1 }
 0x113   : > { %1319 = vst.msk [vmem:[%s1881_s29 + $0xd8] sm:$0xf] %vm1264_vm4, %v1582_v6  ;;  %v903_v14 = vmul.f32 0.01, %v653_v8  ;;  %v773_v16 = vadd.f32 %v1870_v36, %v1996_v34  ;;  %v996_v17 = vsel %vm868_vm0, %v770_v4, %v932_v12  ;;  %v666_v19 = vadd.f32 %v1659_v43, %v1870_v36 }
 0x114   : > { %1285 = vst.msk [vmem:[%s1881_s29 + $0x50] sm:$0xf] %vm1264_vm4, %v1548_v11  ;;  %vm871_vm2 = vcmp.ge.f32.partialorder %v781_v13, 0.0  ;;  %v935_v18 = vmul.f32 0.01, %v781_v13  ;;  %v1580_v20 = vpack.c.bf16 %v996_v17, %v996_v17  ;;  %vm837_vm3 = vcmp.ge.f32.partialorder %v645_v15, 0.0  ;;  %v1664_v5 = vpop.f32.mrf.mxu0  ;;  %v1696_v6 = vpop.f32.mrf.mxu1 }
 0x115   : > { %v967_v21 = vsel %vm839_vm1, %v653_v8, %v903_v14  ;;  %v901_v22 = vmul.f32 0.01, %v645_v15  ;;  %vm869_vm5 = vcmp.ge.f32.partialorder %v773_v16, 0.0  ;;  %v933_v27 = vmul.f32 0.01, %v773_v16 }
 0x116   : > { %v1551_v25 = vpack.c.bf16 %v967_v21, %v967_v21  ;;  %v999_v26 = vsel %vm871_vm2, %v781_v13, %v935_v18  ;;  %1317 = vst.msk [vmem:[%s1881_s29 + $0xd0] sm:$0xf] %vm1264_vm4, %v1580_v20  ;;  %vm842_vm6 = vcmp.ge.f32.partialorder %v666_v19, 0.0  ;;  %v906_v30 = vmul.f32 0.01, %v666_v19  ;;  %v804_v20 = vpop.f32.mrf.mxu1 }
 0x117   : > { %v1583_v28 = vpack.c.bf16 %v999_v26, %v999_v26  ;;  %v965_v29 = vsel %vm837_vm3, %v645_v15, %v901_v22  ;;  %v997_v32 = vsel %vm869_vm5, %v773_v16, %v933_v27  ;;  %v794_v33 = vadd.f32 %v1998_v44, %v1870_v36 }
 0x118   : > { %1288 = vst.msk [vmem:[%s1881_s29 + $0x5c] sm:$0xf] %vm1264_vm4, %v1551_v25  ;;  %v1549_v31 = vpack.c.bf16 %v965_v29, %v965_v29  ;;  %v658_v34 = vadd.f32 %v1870_v36, %v657_v57  ;;  %v1581_v35 = vpack.c.bf16 %v997_v32, %v997_v32  ;;  %v970_v37 = vsel %vm842_vm6, %v666_v19, %v906_v30  ;;  %v676_v19 = vpop.f32.mrf.mxu0 }
 0x119   : > { %1320 = vst.msk [vmem:[%s1881_s29 + $0xdc] sm:$0xf] %vm1264_vm4, %v1583_v28  ;;  %v786_v38 = vadd.f32 %v1870_v36, %v785_v58  ;;  %v669_v39 = vadd.f32 %v1660_v9, %v1870_v36  ;;  %v1554_v42 = vpack.c.bf16 %v970_v37, %v970_v37  ;;  %vm874_vm7 = vcmp.ge.f32.partialorder %v794_v33, 0.0 }
 0x11a   : > { %1286 = vst.msk [vmem:[%s1881_s29 + $0x54] sm:$0xf] %vm1264_vm4, %v1549_v31  ;;  %v938_v43 = vmul.f32 0.01, %v794_v33  ;;  %vm840_vm8 = vcmp.ge.f32.partialorder %v658_v34, 0.0  ;;  %v797_v48 = vadd.f32 %v1692_v10, %v1870_v36  ;;  %v661_v49 = vadd.f32 %v1870_v36, %v660_v23 }
 0x11b   : > { %1318 = vst.msk [vmem:[%s1881_s29 + $0xd4] sm:$0xf] %vm1264_vm4, %v1581_v35  ;;  %v904_v44 = vmul.f32 0.01, %v658_v34  ;;  %vm872_vm9 = vcmp.ge.f32.partialorder %v786_v38, 0.0  ;;  %vm843_vm10 = vcmp.ge.f32.partialorder %v669_v39, 0.0  ;;  %v789_v53 = vadd.f32 %v1870_v36, %v788_v24 }
 0x11c   : > { %v936_v45 = vmul.f32 0.01, %v786_v38  ;;  %1291 = vst.msk [vmem:[%s1881_s29 + $0x68] sm:$0xf] %vm1264_vm4, %v1554_v42  ;;  %v1002_v46 = vsel %vm874_vm7, %v794_v33, %v938_v43  ;;  %v907_v47 = vmul.f32 0.01, %v669_v39  ;;  %v682_v63 = vadd.f32 %v1663_v40, %v1870_v36 }
 0x11d   : > { %v1586_v50 = vpack.c.bf16 %v1002_v46, %v1002_v46  ;;  %v968_v51 = vsel %vm840_vm8, %v658_v34, %v904_v44  ;;  %vm875_vm11 = vcmp.ge.f32.partialorder %v797_v48, 0.0  ;;  %v939_v60 = vmul.f32 0.01, %v797_v48 }
 0x11e   : > { %v1000_v52 = vsel %vm872_vm9, %v786_v38, %v936_v45  ;;  %v1552_v56 = vpack.c.bf16 %v968_v51, %v968_v51  ;;  %v971_v58 = vsel %vm843_vm10, %v669_v39, %v907_v47  ;;  %vm841_vm12 = vcmp.ge.f32.partialorder %v661_v49, 0.0 }
 0x11f   : > { %v1584_v57 = vpack.c.bf16 %v1000_v52, %v1000_v52  ;;  %1323 = vst.msk [vmem:[%s1881_s29 + $0xe8] sm:$0xf] %vm1264_vm4, %v1586_v50  ;;  %v1555_v59 = vpack.c.bf16 %v971_v58, %v971_v58  ;;  %v905_v61 = vmul.f32 0.01, %v661_v49  ;;  %vm873_vm13 = vcmp.ge.f32.partialorder %v789_v53, 0.0 }
 0x120   : > { %1289 = vst.msk [vmem:[%s1881_s29 + $0x60] sm:$0xf] %vm1264_vm4, %v1552_v56  ;;  %v937_v62 = vmul.f32 0.01, %v789_v53  ;;  %v810_v0 = vadd.f32 %v1695_v41, %v1870_v36  ;;  %v1003_v1 = vsel %vm875_vm11, %v797_v48, %v939_v60  ;;  %v674_v3 = vadd.f32 %v1870_v36, %v673_v54 }
 0x121   : > { %1321 = vst.msk [vmem:[%s1881_s29 + $0xe0] sm:$0xf] %vm1264_vm4, %v1584_v57  ;;  %1292 = vst.msk [vmem:[%s1881_s29 + $0x6c] sm:$0xf] %vm1264_vm4, %v1555_v59  ;;  %v969_v2 = vsel %vm841_vm12, %v661_v49, %v905_v61  ;;  %v802_v4 = vadd.f32 %v1870_v36, %v801_v55  ;;  %v1587_v7 = vpack.c.bf16 %v1003_v1, %v1003_v1  ;;  %vm846_vm14 = vcmp.ge.f32.partialorder %v682_v63, 0.0 }
 0x122   : > { %v1553_v8 = vpack.c.bf16 %v969_v2, %v969_v2  ;;  %v1001_v9 = vsel %vm873_vm13, %v789_v53, %v937_v62  ;;  %v910_v11 = vmul.f32 0.01, %v682_v63  ;;  %vm878_vm15 = vcmp.ge.f32.partialorder %v810_v0, 0.0 }
 0x123   : > { %v1585_v10 = vpack.c.bf16 %v1001_v9, %v1001_v9  ;;  %v942_v12 = vmul.f32 0.01, %v810_v0  ;;  %1324 = vst.msk [vmem:[%s1881_s29 + $0xec] sm:$0xf] %vm1264_vm4, %v1587_v7  ;;  %vm844_vm0 = vcmp.ge.f32.partialorder %v674_v3, 0.0  ;;  %vm876_vm1 = vcmp.ge.f32.partialorder %v802_v4, 0.0 }
 0x124   : > { %1290 = vst.msk [vmem:[%s1881_s29 + $0x64] sm:$0xf] %vm1264_vm4, %v1553_v8  ;;  %v908_v13 = vmul.f32 0.01, %v674_v3  ;;  %v940_v14 = vmul.f32 0.01, %v802_v4  ;;  %v974_v15 = vsel %vm846_vm14, %v682_v63, %v910_v11  ;;  %v685_v17 = vadd.f32 %v1664_v5, %v1870_v36 }
 0x125   : > { %1322 = vst.msk [vmem:[%s1881_s29 + $0xe4] sm:$0xf] %vm1264_vm4, %v1585_v10  ;;  %v1006_v16 = vsel %vm878_vm15, %v810_v0, %v942_v12  ;;  %v813_v18 = vadd.f32 %v1696_v6, %v1870_v36  ;;  %v1558_v21 = vpack.c.bf16 %v974_v15, %v974_v15  ;;  %v677_v29 = vadd.f32 %v1870_v36, %v676_v19 }
 0x126   : > { %v1590_v22 = vpack.c.bf16 %v1006_v16, %v1006_v16  ;;  %v972_v23 = vsel %vm844_vm0, %v674_v3, %v908_v13  ;;  %v1004_v24 = vsel %vm876_vm1, %v802_v4, %v940_v14  ;;  %vm847_vm2 = vcmp.ge.f32.partialorder %v685_v17, 0.0 }
 0x127   : > { %v1556_v25 = vpack.c.bf16 %v972_v23, %v972_v23  ;;  %v1588_v26 = vpack.c.bf16 %v1004_v24, %v1004_v24  ;;  %v911_v27 = vmul.f32 0.01, %v685_v17  ;;  %1295 = vst.msk [vmem:[%s1881_s29 + $0x78] sm:$0xf] %vm1264_vm4, %v1558_v21  ;;  %vm879_vm3 = vcmp.ge.f32.partialorder %v813_v18, 0.0 }
 0x128   : > { %1327 = vst.msk [vmem:[%s1881_s29 + $0xf8] sm:$0xf] %vm1264_vm4, %v1590_v22  ;;  %v943_v28 = vmul.f32 0.01, %v813_v18  ;;  %v805_v30 = vadd.f32 %v1870_v36, %v804_v20  ;;  %vm845_vm5 = vcmp.ge.f32.partialorder %v677_v29, 0.0 }
 0x129   : > { %1293 = vst.msk [vmem:[%s1881_s29 + $0x70] sm:$0xf] %vm1264_vm4, %v1556_v25  ;;  %1325 = vst.msk [vmem:[%s1881_s29 + $0xf0] sm:$0xf] %vm1264_vm4, %v1588_v26  ;;  %v975_v31 = vsel %vm847_vm2, %v685_v17, %v911_v27  ;;  %v909_v34 = vmul.f32 0.01, %v677_v29 }
 0x12a   : > { %v1559_v32 = vpack.c.bf16 %v975_v31, %v975_v31  ;;  %v1007_v33 = vsel %vm879_vm3, %v813_v18, %v943_v28  ;;  %vm877_vm6 = vcmp.ge.f32.partialorder %v805_v30, 0.0  ;;  %v941_v37 = vmul.f32 0.01, %v805_v30 }
 0x12b   : > { %v1591_v35 = vpack.c.bf16 %v1007_v33, %v1007_v33  ;;  %v973_v38 = vsel %vm845_vm5, %v677_v29, %v909_v34 }
 0x12c   : > { %1296 = vst.msk [vmem:[%s1881_s29 + $0x7c] sm:$0xf] %vm1264_vm4, %v1559_v32  ;;  %v1557_v36 = vpack.c.bf16 %v973_v38, %v973_v38  ;;  %v1005_v39 = vsel %vm877_vm6, %v805_v30, %v941_v37 }
 0x12d   : > { %1328 = vst.msk [vmem:[%s1881_s29 + $0xfc] sm:$0xf] %vm1264_vm4, %v1591_v35  ;;  %v1589_v40 = vpack.c.bf16 %v1005_v39, %v1005_v39 }
 0x12e   : > { %1294 = vst.msk [vmem:[%s1881_s29 + $0x74] sm:$0xf] %vm1264_vm4, %v1557_v36 }
 0x12f   : > { %1326 = vst.msk [vmem:[%s1881_s29 + $0xf4] sm:$0xf] %vm1264_vm4, %v1589_v40 }
 0x130 PF: > { %s13_s12 = sadd.s32 1, %s1754_s12  }
 0x131   : > { %p10_p4 = scmp.ge.s32.totalorder %s13_s12, 18  }
 0x133   :  { %12 = sbr.rel (!%p10_p4) target bundleno = 1 (0x1), region = 62 }

// kernel: resnet_encoder_forward.11
= control target key start
LH: loop header
LB: loop body
LE: loop exit
PB: predicated region body
PF: predicated region fallthrough
CT: control target
= control target key end

     0   :  { %s1806_s12 = smov 0   ;;  %s2137_s0 = inlined_call_operand.vmem [shape: bf16[2048,72], index: 0, kind: input, shape index: {}]   ;;  %s2138_s1 = inlined_call_operand.vmem [shape: bf16[72,8], index: 1, kind: input, shape index: {}]   ;;  %s2139_s2 = inlined_call_operand.vmem [shape: f32[1,8], index: 2, kind: input, shape index: {}]   ;;  %s2140_s3 = inlined_call_operand.vmem [shape: bf16[2048,8], index: 3, kind: output, shape index: {}]  }
   0x1 LB: > { %s1401_s13 = sadd.s32 4294967295, %s1784_s12   ;;  %p1405_p0 = scmp.ge.s32.totalorder %s1784_s12, 1  ;;  %s1784_s12 = sphi %s1806_s12, %s13_s12  }
   0x2   : > { %p138_p1 = scmp.lt.s32.totalorder %s1784_s12, 5 }
   0x4   : > { %p139_p2 = pnand %p1405_p0, %p138_p1 }
   0x5   : > { %s1406_s18 = sshll.u32 (!%p139_p2), %s1401_s13, 6 }
   0x6   : > { %142 = sbr.rel (%p139_p2) target bundleno = 312 (0x138), region = 32  ;;  %p163_p3 = scmp.lt.s32.totalorder (!%p139_p2), %s1406_s18, 255 }
   0xb   : > { %v1741_v0 = vld [vmem:[%s2138_s1 + $0x20] ss:$0 sps:$4 sm:$0xff]   ;;  %vm539_vm0 = vcmask 1043456   ;;  %v1742_v1 = vld [vmem:[%s2138_s1 + $0x18] sm:$0xff]   ;;  %v1743_v3 = vld [vmem:[%s2138_s1 + $0x10] sm:$0xff]   ;;  %s2142_s18 = smov (!%p163_p3, %s1406_s18), 255 }
   0xc   : > { %1731 = vmatprep.subr.msk.bf16.mxu0 %vm539_vm0, %v1741_v0  ;;  %1732 = vmatprep.subr.msk.bf16.mxu1 %vm539_vm0, %v1741_v0  ;;  %v541_v2 = vsel %vm539_vm0, %v1741_v0, 0  ;;  %v1744_v4 = vld [vmem:[%s2138_s1 + $0x8] sm:$0xff]   ;;  %s1407_s23 = sshll.u32 %s2142_s18, 2  ;;  %vm442_vm1 = vcmask 588800   ;;  %v1745_v7 = vld [vmem:[%s2138_s1] sm:$0xff]   ;;  %vm1280_vm4 = vcmask 60416  }
   0xd   : > { %1648 = vmatpush3.bf16.msra.mxu0 %v541_v2  ;;  %1726 = vmatpush3.bf16.msra.mxu1 %v541_v2  ;;  %s1834_s26 = scalar_lea.vmem %s2137_s0, %s1407_s23  ;;  %v1906_v38 = vld [vmem:[%s2139_s2] ss:$0 sm:$0xff]  ;;  %s1917_s6 = scalar_lea.vmem %s2140_s3, %s1407_s23 }
   0xe   : > { %1649 = vmatprep.subr.bf16.mxu0 %v1742_v1  ;;  %1722 = vmatprep.subr.bf16.mxu1 %v1742_v1  ;;  %v1746_v5 = vld [vmem:[%s1834_s26] sm:$0xff]   ;;  %v1748_v8 = vld [vmem:[%s1834_s26 + $0x8] sm:$0xff]   ;;  %v1750_v10 = vld [vmem:[%s1834_s26 + $0x10] sm:$0xff]  }
   0xf   : > { %v1747_v6 = vld [vmem:[%s1834_s26 + $0x80] sm:$0xff]   ;;  %1657 = vmatprep.mubr.msk.bf16.mxu0 %vm442_vm1, %v1746_v5  ;;  %v1749_v9 = vld [vmem:[%s1834_s26 + $0x88] sm:$0xff]   ;;  %v1751_v11 = vld [vmem:[%s1834_s26 + $0x90] sm:$0xff]  }
  0x10   : > { %1689 = vmatprep.mubr.msk.bf16.mxu1 %vm442_vm1, %v1747_v6  ;;  %v1752_v12 = vld [vmem:[%s1834_s26 + $0x18] sm:$0xff]   ;;  %v1754_v14 = vld [vmem:[%s1834_s26 + $0x20] sm:$0xff]   ;;  %v1756_v16 = vld [vmem:[%s1834_s26 + $0x28] sm:$0xff]  }
  0x11   : > { %1650 = vmatpush3.bf16.msra.mxu0 %v1742_v1  ;;  %1727 = vmatpush3.bf16.msra.mxu1 %v1742_v1  ;;  %v1753_v13 = vld [vmem:[%s1834_s26 + $0x98] sm:$0xff]   ;;  %v1755_v15 = vld [vmem:[%s1834_s26 + $0xa0] sm:$0xff]   ;;  %v1757_v17 = vld [vmem:[%s1834_s26 + $0xa8] sm:$0xff]  }
  0x12   : > { %1651 = vmatprep.subr.bf16.mxu0 %v1743_v3  ;;  %1723 = vmatprep.subr.bf16.mxu1 %v1743_v3  ;;  %v1758_v18 = vld [vmem:[%s1834_s26 + $0x30] sm:$0xff]   ;;  %v1760_v20 = vld [vmem:[%s1834_s26 + $0x38] sm:$0xff]   ;;  %v1762_v22 = vld [vmem:[%s1834_s26 + $0x40] sm:$0xff]  }
  0x13   : > { %v1759_v19 = vld [vmem:[%s1834_s26 + $0xb0] sm:$0xff]   ;;  %v1761_v21 = vld [vmem:[%s1834_s26 + $0xb8] sm:$0xff]   ;;  %v1763_v23 = vld [vmem:[%s1834_s26 + $0xc0] sm:$0xff]  }
  0x14   : > { %v1764_v24 = vld [vmem:[%s1834_s26 + $0x48] sm:$0xff]   ;;  %v1766_v26 = vld [vmem:[%s1834_s26 + $0x50] sm:$0xff]   ;;  %v1768_v28 = vld [vmem:[%s1834_s26 + $0x58] sm:$0xff]  }
  0x15   : > { %1652 = vmatpush3.bf16.msra.mxu0 %v1743_v3  ;;  %1728 = vmatpush3.bf16.msra.mxu1 %v1743_v3  ;;  %v1765_v25 = vld [vmem:[%s1834_s26 + $0xc8] sm:$0xff]   ;;  %v1767_v27 = vld [vmem:[%s1834_s26 + $0xd0] sm:$0xff]   ;;  %v1769_v29 = vld [vmem:[%s1834_s26 + $0xd8] sm:$0xff]  }
  0x16   : > { %1653 = vmatprep.subr.bf16.mxu0 %v1744_v4  ;;  %1724 = vmatprep.subr.bf16.mxu1 %v1744_v4  ;;  %v1770_v30 = vld [vmem:[%s1834_s26 + $0x60] sm:$0xff]   ;;  %v1772_v32 = vld [vmem:[%s1834_s26 + $0x68] sm:$0xff]   ;;  %v1774_v34 = vld [vmem:[%s1834_s26 + $0x70] sm:$0xff]  }
  0x17   : > { %v1771_v31 = vld [vmem:[%s1834_s26 + $0xe0] sm:$0xff]   ;;  %v1773_v33 = vld [vmem:[%s1834_s26 + $0xe8] sm:$0xff]   ;;  %v1775_v35 = vld [vmem:[%s1834_s26 + $0xf0] sm:$0xff]  }
  0x18   : > { %v1776_v36 = vld [vmem:[%s1834_s26 + $0x78] sm:$0xff]  }
  0x19   : > { %1654 = vmatpush3.bf16.msra.mxu0 %v1744_v4  ;;  %1729 = vmatpush3.bf16.msra.mxu1 %v1744_v4  ;;  %v1777_v37 = vld [vmem:[%s1834_s26 + $0xf8] sm:$0xff]  }
  0x1a   : > { %1655 = vmatprep.subr.bf16.mxu0 %v1745_v7  ;;  %1725 = vmatprep.subr.bf16.mxu1 %v1745_v7 }
  0x1d   : > { %1656 = vmatpush3.bf16.msra.mxu0 %v1745_v7  ;;  %1730 = vmatpush3.bf16.msra.mxu1 %v1745_v7 }
  0x20   : > { %1658 = vmatmul.mubr.msk.bf16.vlgmr.msra.gmra.mxu0 %vm442_vm1, %v1748_v8  ;;  %1690 = vmatmul.mubr.msk.bf16.vlgmr.msra.gmra.mxu1 %vm442_vm1, %v1749_v9 }
  0x21   : > { %1661 = vmatprep.mubr.msk.bf16.mxu0 %vm442_vm1, %v1750_v10  ;;  %1693 = vmatprep.mubr.msk.bf16.mxu1 %vm442_vm1, %v1751_v11 }
  0x28   : > { %1662 = vmatmul.mubr.msk.bf16.gmra.mxu0 %vm442_vm1, %v1752_v12  ;;  %1694 = vmatmul.mubr.msk.bf16.gmra.mxu1 %vm442_vm1, %v1753_v13 }
  0x29   : > { %1665 = vmatprep.mubr.msk.bf16.mxu0 %vm442_vm1, %v1754_v14  ;;  %1697 = vmatprep.mubr.msk.bf16.mxu1 %vm442_vm1, %v1755_v15 }
  0x30   : > { %1666 = vmatmul.mubr.msk.bf16.gmra.mxu0 %vm442_vm1, %v1756_v16  ;;  %1698 = vmatmul.mubr.msk.bf16.gmra.mxu1 %vm442_vm1, %v1757_v17 }
  0x31   : > { %1669 = vmatprep.mubr.msk.bf16.mxu0 %vm442_vm1, %v1758_v18  ;;  %1701 = vmatprep.mubr.msk.bf16.mxu1 %vm442_vm1, %v1759_v19 }
  0x38   : > { %1670 = vmatmul.mubr.msk.bf16.gmra.mxu0 %vm442_vm1, %v1760_v20  ;;  %1702 = vmatmul.mubr.msk.bf16.gmra.mxu1 %vm442_vm1, %v1761_v21 }
  0x39   : > { %1673 = vmatprep.mubr.msk.bf16.mxu0 %vm442_vm1, %v1762_v22  ;;  %1705 = vmatprep.mubr.msk.bf16.mxu1 %vm442_vm1, %v1763_v23 }
  0x40   : > { %1674 = vmatmul.mubr.msk.bf16.gmra.mxu0 %vm442_vm1, %v1764_v24  ;;  %1706 = vmatmul.mubr.msk.bf16.gmra.mxu1 %vm442_vm1, %v1765_v25 }
  0x41   : > { %1677 = vmatprep.mubr.msk.bf16.mxu0 %vm442_vm1, %v1766_v26  ;;  %1709 = vmatprep.mubr.msk.bf16.mxu1 %vm442_vm1, %v1767_v27 }
  0x48   : > { %1678 = vmatmul.mubr.msk.bf16.gmra.mxu0 %vm442_vm1, %v1768_v28  ;;  %1710 = vmatmul.mubr.msk.bf16.gmra.mxu1 %vm442_vm1, %v1769_v29 }
  0x49   : > { %1681 = vmatprep.mubr.msk.bf16.mxu0 %vm442_vm1, %v1770_v30  ;;  %1713 = vmatprep.mubr.msk.bf16.mxu1 %vm442_vm1, %v1771_v31 }
  0x50   : > { %1682 = vmatmul.mubr.msk.bf16.gmra.mxu0 %vm442_vm1, %v1772_v32  ;;  %1714 = vmatmul.mubr.msk.bf16.gmra.mxu1 %vm442_vm1, %v1773_v33 }
  0x51   : > { %1685 = vmatprep.mubr.msk.bf16.mxu0 %vm442_vm1, %v1774_v34  ;;  %1717 = vmatprep.mubr.msk.bf16.mxu1 %vm442_vm1, %v1775_v35 }
  0x58   : > { %1686 = vmatmul.mubr.msk.bf16.gmra.mxu0 %vm442_vm1, %v1776_v36  ;;  %1718 = vmatmul.mubr.msk.bf16.gmra.mxu1 %vm442_vm1, %v1777_v37 }
  0xe0   : > { %v1659_v39 = vpop.f32.mrf.mxu0  ;;  %v1691_v40 = vpop.f32.mrf.mxu1 }
  0xe1   : > { %v586_v41 = vadd.f32 %v1659_v39, %v1906_v38  ;;  %v714_v42 = vadd.f32 %v1691_v40, %v1906_v38 }
  0xe2   : > { %v577_v43 = vpop.f32.mrf.mxu0  ;;  %v705_v44 = vpop.f32.mrf.mxu1 }
  0xe3   : > { %vm834_vm2 = vcmp.ge.f32.partialorder %v586_v41, 0.0  ;;  %v898_v45 = vmul.f32 0.01, %v586_v41  ;;  %vm866_vm3 = vcmp.ge.f32.partialorder %v714_v42, 0.0  ;;  %v930_v46 = vmul.f32 0.01, %v714_v42 }
  0xe4   : > { %v578_v47 = vadd.f32 %v1906_v38, %v577_v43  ;;  %v706_v48 = vadd.f32 %v1906_v38, %v705_v44  ;;  %v1660_v49 = vpop.f32.mrf.mxu0  ;;  %v1692_v50 = vpop.f32.mrf.mxu1 }
  0xe5   : > { %v962_v51 = vsel %vm834_vm2, %v586_v41, %v898_v45  ;;  %v994_v52 = vsel %vm866_vm3, %v714_v42, %v930_v46  ;;  %v589_v53 = vadd.f32 %v1660_v49, %v1906_v38  ;;  %v717_v54 = vadd.f32 %v1692_v50, %v1906_v38 }
  0xe6   : > { %v1548_v55 = vpack.c.bf16 %v962_v51, %v962_v51  ;;  %v1580_v56 = vpack.c.bf16 %v994_v52, %v994_v52  ;;  %vm832_vm5 = vcmp.ge.f32.partialorder %v578_v47, 0.0  ;;  %v896_v57 = vmul.f32 0.01, %v578_v47  ;;  %v580_v58 = vpop.f32.mrf.mxu0  ;;  %v708_v59 = vpop.f32.mrf.mxu1 }
  0xe7   : > { %vm864_vm6 = vcmp.ge.f32.partialorder %v706_v48, 0.0  ;;  %v928_v60 = vmul.f32 0.01, %v706_v48  ;;  %vm835_vm7 = vcmp.ge.f32.partialorder %v589_v53, 0.0  ;;  %v899_v61 = vmul.f32 0.01, %v589_v53 }
  0xe8   : > { %1283 = vst.msk [vmem:[%s1917_s6 + $0x8] sm:$0xf] %vm1280_vm4, %v1548_v55  ;;  %1315 = vst.msk [vmem:[%s1917_s6 + $0x88] sm:$0xf] %vm1280_vm4, %v1580_v56  ;;  %v960_v62 = vsel %vm832_vm5, %v578_v47, %v896_v57  ;;  %vm867_vm8 = vcmp.ge.f32.partialorder %v717_v54, 0.0  ;;  %v581_v0 = vadd.f32 %v1906_v38, %v580_v58  ;;  %v1663_v1 = vpop.f32.mrf.mxu0  ;;  %v1695_v2 = vpop.f32.mrf.mxu1  ;;  %v709_v6 = vadd.f32 %v1906_v38, %v708_v59 }
  0xe9   : > { %v931_v63 = vmul.f32 0.01, %v717_v54  ;;  %v1546_v3 = vpack.c.bf16 %v960_v62, %v960_v62  ;;  %v992_v4 = vsel %vm864_vm6, %v706_v48, %v928_v60  ;;  %v963_v5 = vsel %vm835_vm7, %v589_v53, %v899_v61 }
  0xea   : > { %v1578_v7 = vpack.c.bf16 %v992_v4, %v992_v4  ;;  %v1549_v8 = vpack.c.bf16 %v963_v5, %v963_v5  ;;  %vm833_vm9 = vcmp.ge.f32.partialorder %v581_v0, 0.0  ;;  %v593_v10 = vpop.f32.mrf.mxu0  ;;  %v721_v11 = vpop.f32.mrf.mxu1  ;;  %v897_v13 = vmul.f32 0.01, %v581_v0 }
  0xeb   : > { %v995_v9 = vsel %vm867_vm8, %v717_v54, %v931_v63  ;;  %1281 = vst.msk [vmem:[%s1917_s6] sm:$0xf] %vm1280_vm4, %v1546_v3  ;;  %vm865_vm10 = vcmp.ge.f32.partialorder %v709_v6, 0.0  ;;  %v929_v14 = vmul.f32 0.01, %v709_v6  ;;  %v602_v15 = vadd.f32 %v1663_v1, %v1906_v38 }
  0xec   : > { %v1581_v12 = vpack.c.bf16 %v995_v9, %v995_v9  ;;  %1313 = vst.msk [vmem:[%s1917_s6 + $0x80] sm:$0xf] %vm1280_vm4, %v1578_v7  ;;  %1284 = vst.msk [vmem:[%s1917_s6 + $0xc] sm:$0xf] %vm1280_vm4, %v1549_v8  ;;  %v730_v16 = vadd.f32 %v1695_v2, %v1906_v38  ;;  %v594_v17 = vadd.f32 %v1906_v38, %v593_v10  ;;  %v1664_v19 = vpop.f32.mrf.mxu0  ;;  %v1696_v20 = vpop.f32.mrf.mxu1 }
  0xed   : > { %v722_v18 = vadd.f32 %v1906_v38, %v721_v11  ;;  %v961_v21 = vsel %vm833_vm9, %v581_v0, %v897_v13  ;;  %v993_v22 = vsel %vm865_vm10, %v709_v6, %v929_v14  ;;  %v605_v23 = vadd.f32 %v1664_v19, %v1906_v38 }
  0xee   : > { %1316 = vst.msk [vmem:[%s1917_s6 + $0x8c] sm:$0xf] %vm1280_vm4, %v1581_v12  ;;  %v733_v24 = vadd.f32 %v1696_v20, %v1906_v38  ;;  %v1547_v25 = vpack.c.bf16 %v961_v21, %v961_v21  ;;  %v1579_v26 = vpack.c.bf16 %v993_v22, %v993_v22  ;;  %vm838_vm11 = vcmp.ge.f32.partialorder %v602_v15, 0.0  ;;  %v596_v28 = vpop.f32.mrf.mxu0  ;;  %v724_v29 = vpop.f32.mrf.mxu1 }
  0xef   : > { %v902_v27 = vmul.f32 0.01, %v602_v15  ;;  %vm870_vm12 = vcmp.ge.f32.partialorder %v730_v16, 0.0  ;;  %v934_v30 = vmul.f32 0.01, %v730_v16  ;;  %vm836_vm13 = vcmp.ge.f32.partialorder %v594_v17, 0.0 }
  0xf0   : > { %v900_v31 = vmul.f32 0.01, %v594_v17  ;;  %1282 = vst.msk [vmem:[%s1917_s6 + $0x4] sm:$0xf] %vm1280_vm4, %v1547_v25  ;;  %1314 = vst.msk [vmem:[%s1917_s6 + $0x84] sm:$0xf] %vm1280_vm4, %v1579_v26  ;;  %v1667_v34 = vpop.f32.mrf.mxu0  ;;  %v1699_v35 = vpop.f32.mrf.mxu1  ;;  %v597_v49 = vadd.f32 %v1906_v38, %v596_v28  ;;  %v725_v51 = vadd.f32 %v1906_v38, %v724_v29 }
  0xf1   : > { %v966_v32 = vsel %vm838_vm11, %v602_v15, %v902_v27  ;;  %vm868_vm14 = vcmp.ge.f32.partialorder %v722_v18, 0.0  ;;  %v932_v33 = vmul.f32 0.01, %v722_v18  ;;  %vm839_vm15 = vcmp.ge.f32.partialorder %v605_v23, 0.0 }
  0xf2   : > { %v1552_v36 = vpack.c.bf16 %v966_v32, %v966_v32  ;;  %v998_v37 = vsel %vm870_vm12, %v730_v16, %v934_v30  ;;  %v964_v39 = vsel %vm836_vm13, %v594_v17, %v900_v31  ;;  %v903_v40 = vmul.f32 0.01, %v605_v23  ;;  %v609_v44 = vpop.f32.mrf.mxu0  ;;  %v737_v45 = vpop.f32.mrf.mxu1 }
  0xf3   : > { %v1584_v41 = vpack.c.bf16 %v998_v37, %v998_v37  ;;  %v1550_v42 = vpack.c.bf16 %v964_v39, %v964_v39  ;;  %v996_v43 = vsel %vm868_vm14, %v722_v18, %v932_v33  ;;  %vm871_vm0 = vcmp.ge.f32.partialorder %v733_v24, 0.0 }
  0xf4   : > { %1287 = vst.msk [vmem:[%s1917_s6 + $0x18] sm:$0xf] %vm1280_vm4, %v1552_v36  ;;  %v1582_v46 = vpack.c.bf16 %v996_v43, %v996_v43  ;;  %v967_v47 = vsel %vm839_vm15, %v605_v23, %v903_v40  ;;  %v935_v48 = vmul.f32 0.01, %v733_v24  ;;  %v618_v52 = vadd.f32 %v1667_v34, %v1906_v38  ;;  %v1668_v54 = vpop.f32.mrf.mxu0  ;;  %v1700_v55 = vpop.f32.mrf.mxu1 }
  0xf5   : > { %1319 = vst.msk [vmem:[%s1917_s6 + $0x98] sm:$0xf] %vm1280_vm4, %v1584_v41  ;;  %1285 = vst.msk [vmem:[%s1917_s6 + $0x10] sm:$0xf] %vm1280_vm4, %v1550_v42  ;;  %v1553_v50 = vpack.c.bf16 %v967_v47, %v967_v47  ;;  %v746_v53 = vadd.f32 %v1699_v35, %v1906_v38  ;;  %vm837_vm1 = vcmp.ge.f32.partialorder %v597_v49, 0.0  ;;  %v610_v58 = vadd.f32 %v1906_v38, %v609_v44 }
  0xf6   : > { %1317 = vst.msk [vmem:[%s1917_s6 + $0x90] sm:$0xf] %vm1280_vm4, %v1582_v46  ;;  %v999_v56 = vsel %vm871_vm0, %v733_v24, %v935_v48  ;;  %v901_v57 = vmul.f32 0.01, %v597_v49  ;;  %vm869_vm2 = vcmp.ge.f32.partialorder %v725_v51, 0.0  ;;  %vm842_vm3 = vcmp.ge.f32.partialorder %v618_v52, 0.0  ;;  %v612_v61 = vpop.f32.mrf.mxu0  ;;  %v740_v62 = vpop.f32.mrf.mxu1 }
  0xf7   : > { %1288 = vst.msk [vmem:[%s1917_s6 + $0x1c] sm:$0xf] %vm1280_vm4, %v1553_v50  ;;  %v1585_v59 = vpack.c.bf16 %v999_v56, %v999_v56  ;;  %v933_v60 = vmul.f32 0.01, %v725_v51  ;;  %v906_v0 = vmul.f32 0.01, %v618_v52  ;;  %v738_v10 = vadd.f32 %v1906_v38, %v737_v45 }
  0xf8   : > { %v965_v63 = vsel %vm837_vm1, %v597_v49, %v901_v57  ;;  %vm874_vm5 = vcmp.ge.f32.partialorder %v746_v53, 0.0  ;;  %v938_v1 = vmul.f32 0.01, %v746_v53  ;;  %vm840_vm6 = vcmp.ge.f32.partialorder %v610_v58, 0.0  ;;  %v1671_v5 = vpop.f32.mrf.mxu0  ;;  %v1703_v6 = vpop.f32.mrf.mxu1 }
  0xf9   : > { %1320 = vst.msk [vmem:[%s1917_s6 + $0x9c] sm:$0xf] %vm1280_vm4, %v1585_v59  ;;  %v1551_v2 = vpack.c.bf16 %v965_v63, %v965_v63  ;;  %v997_v3 = vsel %vm869_vm2, %v725_v51, %v933_v60  ;;  %v904_v4 = vmul.f32 0.01, %v610_v58  ;;  %v970_v8 = vsel %vm842_vm3, %v618_v52, %v906_v0 }
  0xfa   : > { %v1583_v7 = vpack.c.bf16 %v997_v3, %v997_v3  ;;  %v1002_v9 = vsel %vm874_vm5, %v746_v53, %v938_v1  ;;  %v1556_v11 = vpack.c.bf16 %v970_v8, %v970_v8  ;;  %v621_v14 = vadd.f32 %v1668_v54, %v1906_v38  ;;  %v625_v15 = vpop.f32.mrf.mxu0  ;;  %v753_v16 = vpop.f32.mrf.mxu1 }
  0xfb   : > { %1286 = vst.msk [vmem:[%s1917_s6 + $0x14] sm:$0xf] %vm1280_vm4, %v1551_v2  ;;  %v1588_v12 = vpack.c.bf16 %v1002_v9, %v1002_v9  ;;  %v968_v13 = vsel %vm840_vm6, %v610_v58, %v904_v4  ;;  %vm872_vm7 = vcmp.ge.f32.partialorder %v738_v10, 0.0  ;;  %v936_v18 = vmul.f32 0.01, %v738_v10 }
  0xfc   : > { %1318 = vst.msk [vmem:[%s1917_s6 + $0x94] sm:$0xf] %vm1280_vm4, %v1583_v7  ;;  %v1554_v17 = vpack.c.bf16 %v968_v13, %v968_v13  ;;  %v749_v19 = vadd.f32 %v1700_v55, %v1906_v38  ;;  %1291 = vst.msk [vmem:[%s1917_s6 + $0x28] sm:$0xf] %vm1280_vm4, %v1556_v11  ;;  %vm843_vm8 = vcmp.ge.f32.partialorder %v621_v14, 0.0  ;;  %v613_v21 = vadd.f32 %v1906_v38, %v612_v61  ;;  %v1672_v23 = vpop.f32.mrf.mxu0  ;;  %v1704_v24 = vpop.f32.mrf.mxu1 }
  0xfd   : > { %1323 = vst.msk [vmem:[%s1917_s6 + $0xa8] sm:$0xf] %vm1280_vm4, %v1588_v12  ;;  %v907_v20 = vmul.f32 0.01, %v621_v14  ;;  %v741_v22 = vadd.f32 %v1906_v38, %v740_v62  ;;  %v1000_v25 = vsel %vm872_vm7, %v738_v10, %v936_v18  ;;  %v634_v27 = vadd.f32 %v1671_v5, %v1906_v38 }
  0xfe   : > { %1289 = vst.msk [vmem:[%s1917_s6 + $0x20] sm:$0xf] %vm1280_vm4, %v1554_v17  ;;  %vm875_vm9 = vcmp.ge.f32.partialorder %v749_v19, 0.0  ;;  %v939_v26 = vmul.f32 0.01, %v749_v19  ;;  %v1586_v28 = vpack.c.bf16 %v1000_v25, %v1000_v25  ;;  %vm841_vm10 = vcmp.ge.f32.partialorder %v613_v21, 0.0  ;;  %v628_v31 = vpop.f32.mrf.mxu0  ;;  %v756_v32 = vpop.f32.mrf.mxu1 }
  0xff   : > { %v971_v29 = vsel %vm843_vm8, %v621_v14, %v907_v20  ;;  %v905_v30 = vmul.f32 0.01, %v613_v21  ;;  %vm873_vm11 = vcmp.ge.f32.partialorder %v741_v22, 0.0  ;;  %v937_v35 = vmul.f32 0.01, %v741_v22 }
 0x100   : > { %v1557_v33 = vpack.c.bf16 %v971_v29, %v971_v29  ;;  %v1003_v34 = vsel %vm875_vm9, %v749_v19, %v939_v26  ;;  %1321 = vst.msk [vmem:[%s1917_s6 + $0xa0] sm:$0xf] %vm1280_vm4, %v1586_v28  ;;  %vm846_vm12 = vcmp.ge.f32.partialorder %v634_v27, 0.0  ;;  %v910_v39 = vmul.f32 0.01, %v634_v27  ;;  %v1675_v40 = vpop.f32.mrf.mxu0  ;;  %v1707_v41 = vpop.f32.mrf.mxu1 }
 0x101   : > { %v1589_v36 = vpack.c.bf16 %v1003_v34, %v1003_v34  ;;  %v969_v37 = vsel %vm841_vm10, %v613_v21, %v905_v30  ;;  %v1001_v43 = vsel %vm873_vm11, %v741_v22, %v937_v35  ;;  %v762_v44 = vadd.f32 %v1703_v6, %v1906_v38 }
 0x102   : > { %1292 = vst.msk [vmem:[%s1917_s6 + $0x2c] sm:$0xf] %vm1280_vm4, %v1557_v33  ;;  %v1555_v42 = vpack.c.bf16 %v969_v37, %v969_v37  ;;  %v626_v45 = vadd.f32 %v1906_v38, %v625_v15  ;;  %v1587_v46 = vpack.c.bf16 %v1001_v43, %v1001_v43  ;;  %v974_v47 = vsel %vm846_vm12, %v634_v27, %v910_v39  ;;  %v641_v50 = vpop.f32.mrf.mxu0  ;;  %v769_v51 = vpop.f32.mrf.mxu1 }
 0x103   : > { %1324 = vst.msk [vmem:[%s1917_s6 + $0xac] sm:$0xf] %vm1280_vm4, %v1589_v36  ;;  %v754_v48 = vadd.f32 %v1906_v38, %v753_v16  ;;  %v637_v49 = vadd.f32 %v1672_v23, %v1906_v38  ;;  %v1560_v52 = vpack.c.bf16 %v974_v47, %v974_v47  ;;  %vm878_vm13 = vcmp.ge.f32.partialorder %v762_v44, 0.0 }
 0x104   : > { %1290 = vst.msk [vmem:[%s1917_s6 + $0x24] sm:$0xf] %vm1280_vm4, %v1555_v42  ;;  %v942_v53 = vmul.f32 0.01, %v762_v44  ;;  %vm844_vm14 = vcmp.ge.f32.partialorder %v626_v45, 0.0  ;;  %v1676_v56 = vpop.f32.mrf.mxu0  ;;  %v1708_v57 = vpop.f32.mrf.mxu1  ;;  %v765_v60 = vadd.f32 %v1704_v24, %v1906_v38  ;;  %v629_v61 = vadd.f32 %v1906_v38, %v628_v31 }
 0x105   : > { %1322 = vst.msk [vmem:[%s1917_s6 + $0xa4] sm:$0xf] %vm1280_vm4, %v1587_v46  ;;  %v908_v54 = vmul.f32 0.01, %v626_v45  ;;  %vm876_vm15 = vcmp.ge.f32.partialorder %v754_v48, 0.0  ;;  %vm847_vm0 = vcmp.ge.f32.partialorder %v637_v49, 0.0  ;;  %v757_v1 = vadd.f32 %v1906_v38, %v756_v32 }
 0x106   : > { %v940_v55 = vmul.f32 0.01, %v754_v48  ;;  %1295 = vst.msk [vmem:[%s1917_s6 + $0x38] sm:$0xf] %vm1280_vm4, %v1560_v52  ;;  %v1006_v58 = vsel %vm878_vm13, %v762_v44, %v942_v53  ;;  %v911_v59 = vmul.f32 0.01, %v637_v49  ;;  %v1999_v2 = vpop.f32.mrf.mxu0  ;;  %v2001_v3 = vpop.f32.mrf.mxu1  ;;  %v650_v13 = vadd.f32 %v1675_v40, %v1906_v38 }
 0x107   : > { %v1592_v62 = vpack.c.bf16 %v1006_v58, %v1006_v58  ;;  %v972_v63 = vsel %vm844_vm14, %v626_v45, %v908_v54  ;;  %vm879_vm1 = vcmp.ge.f32.partialorder %v765_v60, 0.0  ;;  %v943_v8 = vmul.f32 0.01, %v765_v60 }
 0x108   : > { %v1004_v0 = vsel %vm876_vm15, %v754_v48, %v940_v55  ;;  %v1558_v4 = vpack.c.bf16 %v972_v63, %v972_v63  ;;  %v975_v6 = vsel %vm847_vm0, %v637_v49, %v911_v59  ;;  %vm845_vm2 = vcmp.ge.f32.partialorder %v629_v61, 0.0  ;;  %v1679_v10 = vpop.f32.mrf.mxu0  ;;  %v1711_v11 = vpop.f32.mrf.mxu1 }
 0x109   : > { %v1590_v5 = vpack.c.bf16 %v1004_v0, %v1004_v0  ;;  %1327 = vst.msk [vmem:[%s1917_s6 + $0xb8] sm:$0xf] %vm1280_vm4, %v1592_v62  ;;  %v1561_v7 = vpack.c.bf16 %v975_v6, %v975_v6  ;;  %v909_v9 = vmul.f32 0.01, %v629_v61  ;;  %vm877_vm3 = vcmp.ge.f32.partialorder %v757_v1, 0.0 }
 0x10a   : > { %1293 = vst.msk [vmem:[%s1917_s6 + $0x30] sm:$0xf] %vm1280_vm4, %v1558_v4  ;;  %v941_v12 = vmul.f32 0.01, %v757_v1  ;;  %v778_v14 = vadd.f32 %v1707_v41, %v1906_v38  ;;  %v1007_v15 = vsel %vm879_vm1, %v765_v60, %v943_v8  ;;  %v642_v17 = vadd.f32 %v1906_v38, %v641_v50  ;;  %v657_v19 = vpop.f32.mrf.mxu0  ;;  %v2016_v20 = vpop.f32.mrf.mxu1 }
 0x10b   : > { %1325 = vst.msk [vmem:[%s1917_s6 + $0xb0] sm:$0xf] %vm1280_vm4, %v1590_v5  ;;  %1296 = vst.msk [vmem:[%s1917_s6 + $0x3c] sm:$0xf] %vm1280_vm4, %v1561_v7  ;;  %v973_v16 = vsel %vm845_vm2, %v629_v61, %v909_v9  ;;  %v770_v18 = vadd.f32 %v1906_v38, %v769_v51  ;;  %v1593_v21 = vpack.c.bf16 %v1007_v15, %v1007_v15  ;;  %vm850_vm5 = vcmp.ge.f32.partialorder %v650_v13, 0.0 }
 0x10c   : > { %v1559_v22 = vpack.c.bf16 %v973_v16, %v973_v16  ;;  %v1005_v23 = vsel %vm877_vm3, %v757_v1, %v941_v12  ;;  %v914_v25 = vmul.f32 0.01, %v650_v13  ;;  %vm882_vm6 = vcmp.ge.f32.partialorder %v778_v14, 0.0  ;;  %v2018_v27 = vpop.f32.mrf.mxu0  ;;  %v2020_v28 = vpop.f32.mrf.mxu1 }
 0x10d   : > { %v1591_v24 = vpack.c.bf16 %v1005_v23, %v1005_v23  ;;  %v946_v26 = vmul.f32 0.01, %v778_v14  ;;  %1328 = vst.msk [vmem:[%s1917_s6 + $0xbc] sm:$0xf] %vm1280_vm4, %v1593_v21  ;;  %vm848_vm7 = vcmp.ge.f32.partialorder %v642_v17, 0.0  ;;  %vm880_vm8 = vcmp.ge.f32.partialorder %v770_v18, 0.0 }
 0x10e   : > { %1294 = vst.msk [vmem:[%s1917_s6 + $0x34] sm:$0xf] %vm1280_vm4, %v1559_v22  ;;  %v912_v29 = vmul.f32 0.01, %v642_v17  ;;  %v944_v30 = vmul.f32 0.01, %v770_v18  ;;  %v978_v31 = vsel %vm850_vm5, %v650_v13, %v914_v25  ;;  %v653_v33 = vadd.f32 %v1676_v56, %v1906_v38  ;;  %v2030_v35 = vpop.f32.mrf.mxu0  ;;  %v2032_v36 = vpop.f32.mrf.mxu1 }
 0x10f   : > { %1326 = vst.msk [vmem:[%s1917_s6 + $0xb4] sm:$0xf] %vm1280_vm4, %v1591_v24  ;;  %v1010_v32 = vsel %vm882_vm6, %v778_v14, %v946_v26  ;;  %v781_v34 = vadd.f32 %v1708_v57, %v1906_v38  ;;  %v1564_v37 = vpack.c.bf16 %v978_v31, %v978_v31  ;;  %v645_v48 = vadd.f32 %v1906_v38, %v1999_v2 }
 0x110   : > { %v1596_v39 = vpack.c.bf16 %v1010_v32, %v1010_v32  ;;  %v976_v40 = vsel %vm848_vm7, %v642_v17, %v912_v29  ;;  %v1008_v41 = vsel %vm880_vm8, %v770_v18, %v944_v30  ;;  %vm851_vm9 = vcmp.ge.f32.partialorder %v653_v33, 0.0  ;;  %v1683_v45 = vpop.f32.mrf.mxu0  ;;  %v2034_v46 = vpop.f32.mrf.mxu1 }
 0x111   : > { %v1562_v42 = vpack.c.bf16 %v976_v40, %v976_v40  ;;  %v1594_v43 = vpack.c.bf16 %v1008_v41, %v1008_v41  ;;  %v915_v44 = vmul.f32 0.01, %v653_v33  ;;  %1299 = vst.msk [vmem:[%s1917_s6 + $0x48] sm:$0xf] %vm1280_vm4, %v1564_v37  ;;  %vm883_vm10 = vcmp.ge.f32.partialorder %v781_v34, 0.0 }
 0x112   : > { %1331 = vst.msk [vmem:[%s1917_s6 + $0xc8] sm:$0xf] %vm1280_vm4, %v1596_v39  ;;  %v947_v47 = vmul.f32 0.01, %v781_v34  ;;  %v773_v49 = vadd.f32 %v1906_v38, %v2001_v3  ;;  %v666_v51 = vadd.f32 %v1679_v10, %v1906_v38  ;;  %v794_v52 = vadd.f32 %v1711_v11, %v1906_v38  ;;  %v673_v59 = vpop.f32.mrf.mxu0  ;;  %v801_v60 = vpop.f32.mrf.mxu1 }
 0x113   : > { %1297 = vst.msk [vmem:[%s1917_s6 + $0x40] sm:$0xf] %vm1280_vm4, %v1562_v42  ;;  %1329 = vst.msk [vmem:[%s1917_s6 + $0xc0] sm:$0xf] %vm1280_vm4, %v1594_v43  ;;  %v979_v50 = vsel %vm851_vm9, %v653_v33, %v915_v44  ;;  %v658_v53 = vadd.f32 %v1906_v38, %v657_v19  ;;  %vm849_vm11 = vcmp.ge.f32.partialorder %v645_v48, 0.0  ;;  %v786_v6 = vadd.f32 %v1906_v38, %v2016_v20 }
 0x114   : > { %v1565_v54 = vpack.c.bf16 %v979_v50, %v979_v50  ;;  %v1011_v55 = vsel %vm883_vm10, %v781_v34, %v947_v47  ;;  %v913_v56 = vmul.f32 0.01, %v645_v48  ;;  %vm881_vm12 = vcmp.ge.f32.partialorder %v773_v49, 0.0  ;;  %v1684_v11 = vpop.f32.mrf.mxu0  ;;  %v1716_v12 = vpop.f32.mrf.mxu1 }
 0x115   : > { %v1597_v57 = vpack.c.bf16 %v1011_v55, %v1011_v55  ;;  %v945_v58 = vmul.f32 0.01, %v773_v49  ;;  %vm854_vm13 = vcmp.ge.f32.partialorder %v666_v51, 0.0  ;;  %v918_v62 = vmul.f32 0.01, %v666_v51 }
 0x116   : > { %1300 = vst.msk [vmem:[%s1917_s6 + $0x4c] sm:$0xf] %vm1280_vm4, %v1565_v54  ;;  %v977_v61 = vsel %vm849_vm11, %v645_v48, %v913_v56  ;;  %vm886_vm14 = vcmp.ge.f32.partialorder %v794_v52, 0.0  ;;  %v950_v63 = vmul.f32 0.01, %v794_v52  ;;  %vm852_vm15 = vcmp.ge.f32.partialorder %v658_v53, 0.0  ;;  %v676_v25 = vpop.f32.mrf.mxu0  ;;  %v804_v26 = vpop.f32.mrf.mxu1 }
 0x117   : > { %1332 = vst.msk [vmem:[%s1917_s6 + $0xcc] sm:$0xf] %vm1280_vm4, %v1597_v57  ;;  %v1563_v0 = vpack.c.bf16 %v977_v61, %v977_v61  ;;  %v1009_v1 = vsel %vm881_vm12, %v773_v49, %v945_v58  ;;  %v916_v2 = vmul.f32 0.01, %v658_v53  ;;  %v982_v4 = vsel %vm854_vm13, %v666_v51, %v918_v62 }
 0x118   : > { %v1595_v3 = vpack.c.bf16 %v1009_v1, %v1009_v1  ;;  %v1014_v5 = vsel %vm886_vm14, %v794_v52, %v950_v63  ;;  %v1568_v7 = vpack.c.bf16 %v982_v4, %v982_v4  ;;  %v669_v10 = vadd.f32 %v2018_v27, %v1906_v38  ;;  %v1687_v42 = vpop.f32.mrf.mxu0  ;;  %v1719_v43 = vpop.f32.mrf.mxu1 }
 0x119   : > { %1298 = vst.msk [vmem:[%s1917_s6 + $0x44] sm:$0xf] %vm1280_vm4, %v1563_v0  ;;  %v1600_v8 = vpack.c.bf16 %v1014_v5, %v1014_v5  ;;  %v980_v9 = vsel %vm852_vm15, %v658_v53, %v916_v2  ;;  %vm884_vm0 = vcmp.ge.f32.partialorder %v786_v6, 0.0  ;;  %v948_v14 = vmul.f32 0.01, %v786_v6 }
 0x11a   : > { %1330 = vst.msk [vmem:[%s1917_s6 + $0xc4] sm:$0xf] %vm1280_vm4, %v1595_v3  ;;  %v1566_v13 = vpack.c.bf16 %v980_v9, %v980_v9  ;;  %v797_v15 = vadd.f32 %v2020_v28, %v1906_v38  ;;  %1303 = vst.msk [vmem:[%s1917_s6 + $0x58] sm:$0xf] %vm1280_vm4, %v1568_v7  ;;  %vm855_vm1 = vcmp.ge.f32.partialorder %v669_v10, 0.0  ;;  %v661_v17 = vadd.f32 %v1906_v38, %v2030_v35  ;;  %v689_v56 = vpop.f32.mrf.mxu0  ;;  %v817_v57 = vpop.f32.mrf.mxu1 }
 0x11b   : > { %1335 = vst.msk [vmem:[%s1917_s6 + $0xd8] sm:$0xf] %vm1280_vm4, %v1600_v8  ;;  %v919_v16 = vmul.f32 0.01, %v669_v10  ;;  %v789_v18 = vadd.f32 %v1906_v38, %v2032_v36  ;;  %v1012_v19 = vsel %vm884_vm0, %v786_v6, %v948_v14  ;;  %v682_v21 = vadd.f32 %v1683_v45, %v1906_v38 }
 0x11c   : > { %1301 = vst.msk [vmem:[%s1917_s6 + $0x50] sm:$0xf] %vm1280_vm4, %v1566_v13  ;;  %vm887_vm2 = vcmp.ge.f32.partialorder %v797_v15, 0.0  ;;  %v951_v20 = vmul.f32 0.01, %v797_v15  ;;  %v1598_v22 = vpack.c.bf16 %v1012_v19, %v1012_v19  ;;  %vm853_vm3 = vcmp.ge.f32.partialorder %v661_v17, 0.0  ;;  %v1688_v7 = vpop.f32.mrf.mxu0  ;;  %v1720_v8 = vpop.f32.mrf.mxu1 }
 0x11d   : > { %v983_v23 = vsel %vm855_vm1, %v669_v10, %v919_v16  ;;  %v917_v24 = vmul.f32 0.01, %v661_v17  ;;  %vm885_vm5 = vcmp.ge.f32.partialorder %v789_v18, 0.0  ;;  %v949_v29 = vmul.f32 0.01, %v789_v18 }
 0x11e   : > { %v1569_v27 = vpack.c.bf16 %v983_v23, %v983_v23  ;;  %v1015_v28 = vsel %vm887_vm2, %v797_v15, %v951_v20  ;;  %1333 = vst.msk [vmem:[%s1917_s6 + $0xd0] sm:$0xf] %vm1280_vm4, %v1598_v22  ;;  %vm858_vm6 = vcmp.ge.f32.partialorder %v682_v21, 0.0  ;;  %v922_v32 = vmul.f32 0.01, %v682_v21  ;;  %v820_v22 = vpop.f32.mrf.mxu1 }
 0x11f   : > { %v1601_v30 = vpack.c.bf16 %v1015_v28, %v1015_v28  ;;  %v981_v31 = vsel %vm853_vm3, %v661_v17, %v917_v24  ;;  %v1013_v34 = vsel %vm885_vm5, %v789_v18, %v949_v29  ;;  %v810_v35 = vadd.f32 %v2034_v46, %v1906_v38 }
 0x120   : > { %1304 = vst.msk [vmem:[%s1917_s6 + $0x5c] sm:$0xf] %vm1280_vm4, %v1569_v27  ;;  %v1567_v33 = vpack.c.bf16 %v981_v31, %v981_v31  ;;  %v674_v36 = vadd.f32 %v1906_v38, %v673_v59  ;;  %v1599_v37 = vpack.c.bf16 %v1013_v34, %v1013_v34  ;;  %v986_v39 = vsel %vm858_vm6, %v682_v21, %v922_v32  ;;  %v692_v21 = vpop.f32.mrf.mxu0 }
 0x121   : > { %1336 = vst.msk [vmem:[%s1917_s6 + $0xdc] sm:$0xf] %vm1280_vm4, %v1601_v30  ;;  %v802_v40 = vadd.f32 %v1906_v38, %v801_v60  ;;  %v685_v41 = vadd.f32 %v1684_v11, %v1906_v38  ;;  %v1572_v44 = vpack.c.bf16 %v986_v39, %v986_v39  ;;  %vm890_vm7 = vcmp.ge.f32.partialorder %v810_v35, 0.0 }
 0x122   : > { %1302 = vst.msk [vmem:[%s1917_s6 + $0x54] sm:$0xf] %vm1280_vm4, %v1567_v33  ;;  %v954_v45 = vmul.f32 0.01, %v810_v35  ;;  %vm856_vm8 = vcmp.ge.f32.partialorder %v674_v36, 0.0  ;;  %v813_v50 = vadd.f32 %v1716_v12, %v1906_v38  ;;  %v677_v51 = vadd.f32 %v1906_v38, %v676_v25 }
 0x123   : > { %1334 = vst.msk [vmem:[%s1917_s6 + $0xd4] sm:$0xf] %vm1280_vm4, %v1599_v37  ;;  %v920_v46 = vmul.f32 0.01, %v674_v36  ;;  %vm888_vm9 = vcmp.ge.f32.partialorder %v802_v40, 0.0  ;;  %vm859_vm10 = vcmp.ge.f32.partialorder %v685_v41, 0.0  ;;  %v805_v55 = vadd.f32 %v1906_v38, %v804_v26 }
 0x124   : > { %v952_v47 = vmul.f32 0.01, %v802_v40  ;;  %1307 = vst.msk [vmem:[%s1917_s6 + $0x68] sm:$0xf] %vm1280_vm4, %v1572_v44  ;;  %v1018_v48 = vsel %vm890_vm7, %v810_v35, %v954_v45  ;;  %v923_v49 = vmul.f32 0.01, %v685_v41  ;;  %v698_v1 = vadd.f32 %v1687_v42, %v1906_v38 }
 0x125   : > { %v1604_v52 = vpack.c.bf16 %v1018_v48, %v1018_v48  ;;  %v984_v53 = vsel %vm856_vm8, %v674_v36, %v920_v46  ;;  %vm891_vm11 = vcmp.ge.f32.partialorder %v813_v50, 0.0  ;;  %v955_v62 = vmul.f32 0.01, %v813_v50 }
 0x126   : > { %v1016_v54 = vsel %vm888_vm9, %v802_v40, %v952_v47  ;;  %v1570_v58 = vpack.c.bf16 %v984_v53, %v984_v53  ;;  %v987_v60 = vsel %vm859_vm10, %v685_v41, %v923_v49  ;;  %vm857_vm12 = vcmp.ge.f32.partialorder %v677_v51, 0.0 }
 0x127   : > { %v1602_v59 = vpack.c.bf16 %v1016_v54, %v1016_v54  ;;  %1339 = vst.msk [vmem:[%s1917_s6 + $0xe8] sm:$0xf] %vm1280_vm4, %v1604_v52  ;;  %v1573_v61 = vpack.c.bf16 %v987_v60, %v987_v60  ;;  %v921_v63 = vmul.f32 0.01, %v677_v51  ;;  %vm889_vm13 = vcmp.ge.f32.partialorder %v805_v55, 0.0 }
 0x128   : > { %1305 = vst.msk [vmem:[%s1917_s6 + $0x60] sm:$0xf] %vm1280_vm4, %v1570_v58  ;;  %v953_v0 = vmul.f32 0.01, %v805_v55  ;;  %v826_v2 = vadd.f32 %v1719_v43, %v1906_v38  ;;  %v1019_v3 = vsel %vm891_vm11, %v813_v50, %v955_v62  ;;  %v690_v5 = vadd.f32 %v1906_v38, %v689_v56 }
 0x129   : > { %1337 = vst.msk [vmem:[%s1917_s6 + $0xe0] sm:$0xf] %vm1280_vm4, %v1602_v59  ;;  %1308 = vst.msk [vmem:[%s1917_s6 + $0x6c] sm:$0xf] %vm1280_vm4, %v1573_v61  ;;  %v985_v4 = vsel %vm857_vm12, %v677_v51, %v921_v63  ;;  %v818_v6 = vadd.f32 %v1906_v38, %v817_v57  ;;  %v1605_v9 = vpack.c.bf16 %v1019_v3, %v1019_v3  ;;  %vm862_vm14 = vcmp.ge.f32.partialorder %v698_v1, 0.0 }
 0x12a   : > { %v1571_v10 = vpack.c.bf16 %v985_v4, %v985_v4  ;;  %v1017_v11 = vsel %vm889_vm13, %v805_v55, %v953_v0  ;;  %v926_v13 = vmul.f32 0.01, %v698_v1  ;;  %vm894_vm15 = vcmp.ge.f32.partialorder %v826_v2, 0.0 }
 0x12b   : > { %v1603_v12 = vpack.c.bf16 %v1017_v11, %v1017_v11  ;;  %v958_v14 = vmul.f32 0.01, %v826_v2  ;;  %1340 = vst.msk [vmem:[%s1917_s6 + $0xec] sm:$0xf] %vm1280_vm4, %v1605_v9  ;;  %vm860_vm0 = vcmp.ge.f32.partialorder %v690_v5, 0.0  ;;  %vm892_vm1 = vcmp.ge.f32.partialorder %v818_v6, 0.0 }
 0x12c   : > { %1306 = vst.msk [vmem:[%s1917_s6 + $0x64] sm:$0xf] %vm1280_vm4, %v1571_v10  ;;  %v924_v15 = vmul.f32 0.01, %v690_v5  ;;  %v956_v16 = vmul.f32 0.01, %v818_v6  ;;  %v990_v17 = vsel %vm862_vm14, %v698_v1, %v926_v13  ;;  %v701_v19 = vadd.f32 %v1688_v7, %v1906_v38 }
 0x12d   : > { %1338 = vst.msk [vmem:[%s1917_s6 + $0xe4] sm:$0xf] %vm1280_vm4, %v1603_v12  ;;  %v1022_v18 = vsel %vm894_vm15, %v826_v2, %v958_v14  ;;  %v829_v20 = vadd.f32 %v1720_v8, %v1906_v38  ;;  %v1576_v23 = vpack.c.bf16 %v990_v17, %v990_v17  ;;  %v693_v31 = vadd.f32 %v1906_v38, %v692_v21 }
 0x12e   : > { %v1608_v24 = vpack.c.bf16 %v1022_v18, %v1022_v18  ;;  %v988_v25 = vsel %vm860_vm0, %v690_v5, %v924_v15  ;;  %v1020_v26 = vsel %vm892_vm1, %v818_v6, %v956_v16  ;;  %vm863_vm2 = vcmp.ge.f32.partialorder %v701_v19, 0.0 }
 0x12f   : > { %v1574_v27 = vpack.c.bf16 %v988_v25, %v988_v25  ;;  %v1606_v28 = vpack.c.bf16 %v1020_v26, %v1020_v26  ;;  %v927_v29 = vmul.f32 0.01, %v701_v19  ;;  %1311 = vst.msk [vmem:[%s1917_s6 + $0x78] sm:$0xf] %vm1280_vm4, %v1576_v23  ;;  %vm895_vm3 = vcmp.ge.f32.partialorder %v829_v20, 0.0 }
 0x130   : > { %1343 = vst.msk [vmem:[%s1917_s6 + $0xf8] sm:$0xf] %vm1280_vm4, %v1608_v24  ;;  %v959_v30 = vmul.f32 0.01, %v829_v20  ;;  %v821_v32 = vadd.f32 %v1906_v38, %v820_v22  ;;  %vm861_vm5 = vcmp.ge.f32.partialorder %v693_v31, 0.0 }
 0x131   : > { %1309 = vst.msk [vmem:[%s1917_s6 + $0x70] sm:$0xf] %vm1280_vm4, %v1574_v27  ;;  %1341 = vst.msk [vmem:[%s1917_s6 + $0xf0] sm:$0xf] %vm1280_vm4, %v1606_v28  ;;  %v991_v33 = vsel %vm863_vm2, %v701_v19, %v927_v29  ;;  %v925_v36 = vmul.f32 0.01, %v693_v31 }
 0x132   : > { %v1577_v34 = vpack.c.bf16 %v991_v33, %v991_v33  ;;  %v1023_v35 = vsel %vm895_vm3, %v829_v20, %v959_v30  ;;  %vm893_vm6 = vcmp.ge.f32.partialorder %v821_v32, 0.0  ;;  %v957_v39 = vmul.f32 0.01, %v821_v32 }
 0x133   : > { %v1609_v37 = vpack.c.bf16 %v1023_v35, %v1023_v35  ;;  %v989_v40 = vsel %vm861_vm5, %v693_v31, %v925_v36 }
 0x134   : > { %1312 = vst.msk [vmem:[%s1917_s6 + $0x7c] sm:$0xf] %vm1280_vm4, %v1577_v34  ;;  %v1575_v38 = vpack.c.bf16 %v989_v40, %v989_v40  ;;  %v1021_v41 = vsel %vm893_vm6, %v821_v32, %v957_v39 }
 0x135   : > { %1344 = vst.msk [vmem:[%s1917_s6 + $0xfc] sm:$0xf] %vm1280_vm4, %v1609_v37  ;;  %v1607_v42 = vpack.c.bf16 %v1021_v41, %v1021_v41 }
 0x136   : > { %1310 = vst.msk [vmem:[%s1917_s6 + $0x74] sm:$0xf] %vm1280_vm4, %v1575_v38 }
 0x137   : > { %1342 = vst.msk [vmem:[%s1917_s6 + $0xf4] sm:$0xf] %vm1280_vm4, %v1607_v42 }
 0x138 PF: > { %s13_s12 = sadd.s32 1, %s1784_s12  }
 0x139   : > { %p10_p4 = scmp.ge.s32.totalorder %s13_s12, 6  }
 0x13b   :  { %12 = sbr.rel (!%p10_p4) target bundleno = 1 (0x1), region = 62 }

// kernel: resnet_encoder_forward.12
= control target key start
LH: loop header
LB: loop body
LE: loop exit
PB: predicated region body
PF: predicated region fallthrough
CT: control target
= control target key end

     0   :  { %s1614_s12 = smov 0   ;;  %s1918_s0 = inlined_call_operand.vmem [shape: bf16[2048,72], index: 0, kind: input, shape index: {}]   ;;  %s1919_s1 = inlined_call_operand.vmem [shape: bf16[72,8], index: 1, kind: input, shape index: {}]   ;;  %s1920_s2 = inlined_call_operand.vmem [shape: f32[1,8], index: 2, kind: input, shape index: {}]   ;;  %s1921_s3 = inlined_call_operand.vmem [shape: bf16[2048,8], index: 3, kind: output, shape index: {}]  }
   0x1 LB: > { %s1209_s13 = sadd.s32 4294967295, %s1592_s12   ;;  %p1213_p0 = scmp.ge.s32.totalorder %s1592_s12, 1  ;;  %s1592_s12 = sphi %s1614_s12, %s13_s12  }
   0x2   : > { %p138_p1 = scmp.lt.s32.totalorder %s1592_s12, 5 }
   0x4   : > { %p139_p2 = pnand %p1213_p0, %p138_p1 }
   0x5   : > { %s1214_s18 = sshll.u32 (!%p139_p2), %s1209_s13, 6 }
   0x6   : > { %142 = sbr.rel (%p139_p2) target bundleno = 292 (0x124), region = 32  ;;  %p163_p3 = scmp.lt.s32.totalorder (!%p139_p2), %s1214_s18, 255 }
   0xb   : > { %v1549_v0 = vld [vmem:[%s1919_s1 + $0x20] ss:$0 sps:$4 sm:$0xff]   ;;  %vm539_vm0 = vcmask 1043456   ;;  %v1550_v1 = vld [vmem:[%s1919_s1 + $0x18] sm:$0xff]   ;;  %v1551_v3 = vld [vmem:[%s1919_s1 + $0x10] sm:$0xff]   ;;  %s1923_s18 = smov (!%p163_p3, %s1214_s18), 255 }
   0xc   : > { %1539 = vmatprep.subr.msk.bf16.mxu0 %vm539_vm0, %v1549_v0  ;;  %1540 = vmatprep.subr.msk.bf16.mxu1 %vm539_vm0, %v1549_v0  ;;  %v541_v2 = vsel %vm539_vm0, %v1549_v0, 0  ;;  %v1552_v4 = vld [vmem:[%s1919_s1 + $0x8] sm:$0xff]   ;;  %s1215_s23 = sshll.u32 %s1923_s18, 2  ;;  %vm442_vm1 = vcmask 588800   ;;  %v1553_v7 = vld [vmem:[%s1919_s1] sm:$0xff]   ;;  %vm1088_vm2 = vcmask 60416  }
   0xd   : > { %1456 = vmatpush3.bf16.msra.mxu0 %v541_v2  ;;  %1534 = vmatpush3.bf16.msra.mxu1 %v541_v2  ;;  %s1642_s26 = scalar_lea.vmem %s1918_s0, %s1215_s23  ;;  %v1714_v38 = vld [vmem:[%s1920_s2] ss:$0 sm:$0xff]  ;;  %s1723_s6 = scalar_lea.vmem %s1921_s3, %s1215_s23 }
   0xe   : > { %1457 = vmatprep.subr.bf16.mxu0 %v1550_v1  ;;  %1530 = vmatprep.subr.bf16.mxu1 %v1550_v1  ;;  %v1554_v5 = vld [vmem:[%s1642_s26] sm:$0xff]   ;;  %v1556_v8 = vld [vmem:[%s1642_s26 + $0x8] sm:$0xff]   ;;  %v1558_v10 = vld [vmem:[%s1642_s26 + $0x10] sm:$0xff]  }
   0xf   : > { %v1555_v6 = vld [vmem:[%s1642_s26 + $0x80] sm:$0xff]   ;;  %1465 = vmatprep.mubr.msk.bf16.mxu0 %vm442_vm1, %v1554_v5  ;;  %v1557_v9 = vld [vmem:[%s1642_s26 + $0x88] sm:$0xff]   ;;  %v1559_v11 = vld [vmem:[%s1642_s26 + $0x90] sm:$0xff]  }
  0x10   : > { %1497 = vmatprep.mubr.msk.bf16.mxu1 %vm442_vm1, %v1555_v6  ;;  %v1560_v12 = vld [vmem:[%s1642_s26 + $0x18] sm:$0xff]   ;;  %v1562_v14 = vld [vmem:[%s1642_s26 + $0x20] sm:$0xff]   ;;  %v1564_v16 = vld [vmem:[%s1642_s26 + $0x28] sm:$0xff]  }
  0x11   : > { %1458 = vmatpush3.bf16.msra.mxu0 %v1550_v1  ;;  %1535 = vmatpush3.bf16.msra.mxu1 %v1550_v1  ;;  %v1561_v13 = vld [vmem:[%s1642_s26 + $0x98] sm:$0xff]   ;;  %v1563_v15 = vld [vmem:[%s1642_s26 + $0xa0] sm:$0xff]   ;;  %v1565_v17 = vld [vmem:[%s1642_s26 + $0xa8] sm:$0xff]  }
  0x12   : > { %1459 = vmatprep.subr.bf16.mxu0 %v1551_v3  ;;  %1531 = vmatprep.subr.bf16.mxu1 %v1551_v3  ;;  %v1566_v18 = vld [vmem:[%s1642_s26 + $0x30] sm:$0xff]   ;;  %v1568_v20 = vld [vmem:[%s1642_s26 + $0x38] sm:$0xff]   ;;  %v1570_v22 = vld [vmem:[%s1642_s26 + $0x40] sm:$0xff]  }
  0x13   : > { %v1567_v19 = vld [vmem:[%s1642_s26 + $0xb0] sm:$0xff]   ;;  %v1569_v21 = vld [vmem:[%s1642_s26 + $0xb8] sm:$0xff]   ;;  %v1571_v23 = vld [vmem:[%s1642_s26 + $0xc0] sm:$0xff]  }
  0x14   : > { %v1572_v24 = vld [vmem:[%s1642_s26 + $0x48] sm:$0xff]   ;;  %v1574_v26 = vld [vmem:[%s1642_s26 + $0x50] sm:$0xff]   ;;  %v1576_v28 = vld [vmem:[%s1642_s26 + $0x58] sm:$0xff]  }
  0x15   : > { %1460 = vmatpush3.bf16.msra.mxu0 %v1551_v3  ;;  %1536 = vmatpush3.bf16.msra.mxu1 %v1551_v3  ;;  %v1573_v25 = vld [vmem:[%s1642_s26 + $0xc8] sm:$0xff]   ;;  %v1575_v27 = vld [vmem:[%s1642_s26 + $0xd0] sm:$0xff]   ;;  %v1577_v29 = vld [vmem:[%s1642_s26 + $0xd8] sm:$0xff]  }
  0x16   : > { %1461 = vmatprep.subr.bf16.mxu0 %v1552_v4  ;;  %1532 = vmatprep.subr.bf16.mxu1 %v1552_v4  ;;  %v1578_v30 = vld [vmem:[%s1642_s26 + $0x60] sm:$0xff]   ;;  %v1580_v32 = vld [vmem:[%s1642_s26 + $0x68] sm:$0xff]   ;;  %v1582_v34 = vld [vmem:[%s1642_s26 + $0x70] sm:$0xff]  }
  0x17   : > { %v1579_v31 = vld [vmem:[%s1642_s26 + $0xe0] sm:$0xff]   ;;  %v1581_v33 = vld [vmem:[%s1642_s26 + $0xe8] sm:$0xff]   ;;  %v1583_v35 = vld [vmem:[%s1642_s26 + $0xf0] sm:$0xff]  }
  0x18   : > { %v1584_v36 = vld [vmem:[%s1642_s26 + $0x78] sm:$0xff]  }
  0x19   : > { %1462 = vmatpush3.bf16.msra.mxu0 %v1552_v4  ;;  %1537 = vmatpush3.bf16.msra.mxu1 %v1552_v4  ;;  %v1585_v37 = vld [vmem:[%s1642_s26 + $0xf8] sm:$0xff]  }
  0x1a   : > { %1463 = vmatprep.subr.bf16.mxu0 %v1553_v7  ;;  %1533 = vmatprep.subr.bf16.mxu1 %v1553_v7 }
  0x1d   : > { %1464 = vmatpush3.bf16.msra.mxu0 %v1553_v7  ;;  %1538 = vmatpush3.bf16.msra.mxu1 %v1553_v7 }
  0x20   : > { %1466 = vmatmul.mubr.msk.bf16.vlgmr.msra.gmra.mxu0 %vm442_vm1, %v1556_v8  ;;  %1498 = vmatmul.mubr.msk.bf16.vlgmr.msra.gmra.mxu1 %vm442_vm1, %v1557_v9 }
  0x21   : > { %1469 = vmatprep.mubr.msk.bf16.mxu0 %vm442_vm1, %v1558_v10  ;;  %1501 = vmatprep.mubr.msk.bf16.mxu1 %vm442_vm1, %v1559_v11 }
  0x28   : > { %1470 = vmatmul.mubr.msk.bf16.gmra.mxu0 %vm442_vm1, %v1560_v12  ;;  %1502 = vmatmul.mubr.msk.bf16.gmra.mxu1 %vm442_vm1, %v1561_v13 }
  0x29   : > { %1473 = vmatprep.mubr.msk.bf16.mxu0 %vm442_vm1, %v1562_v14  ;;  %1505 = vmatprep.mubr.msk.bf16.mxu1 %vm442_vm1, %v1563_v15 }
  0x30   : > { %1474 = vmatmul.mubr.msk.bf16.gmra.mxu0 %vm442_vm1, %v1564_v16  ;;  %1506 = vmatmul.mubr.msk.bf16.gmra.mxu1 %vm442_vm1, %v1565_v17 }
  0x31   : > { %1477 = vmatprep.mubr.msk.bf16.mxu0 %vm442_vm1, %v1566_v18  ;;  %1509 = vmatprep.mubr.msk.bf16.mxu1 %vm442_vm1, %v1567_v19 }
  0x38   : > { %1478 = vmatmul.mubr.msk.bf16.gmra.mxu0 %vm442_vm1, %v1568_v20  ;;  %1510 = vmatmul.mubr.msk.bf16.gmra.mxu1 %vm442_vm1, %v1569_v21 }
  0x39   : > { %1481 = vmatprep.mubr.msk.bf16.mxu0 %vm442_vm1, %v1570_v22  ;;  %1513 = vmatprep.mubr.msk.bf16.mxu1 %vm442_vm1, %v1571_v23 }
  0x40   : > { %1482 = vmatmul.mubr.msk.bf16.gmra.mxu0 %vm442_vm1, %v1572_v24  ;;  %1514 = vmatmul.mubr.msk.bf16.gmra.mxu1 %vm442_vm1, %v1573_v25 }
  0x41   : > { %1485 = vmatprep.mubr.msk.bf16.mxu0 %vm442_vm1, %v1574_v26  ;;  %1517 = vmatprep.mubr.msk.bf16.mxu1 %vm442_vm1, %v1575_v27 }
  0x48   : > { %1486 = vmatmul.mubr.msk.bf16.gmra.mxu0 %vm442_vm1, %v1576_v28  ;;  %1518 = vmatmul.mubr.msk.bf16.gmra.mxu1 %vm442_vm1, %v1577_v29 }
  0x49   : > { %1489 = vmatprep.mubr.msk.bf16.mxu0 %vm442_vm1, %v1578_v30  ;;  %1521 = vmatprep.mubr.msk.bf16.mxu1 %vm442_vm1, %v1579_v31 }
  0x50   : > { %1490 = vmatmul.mubr.msk.bf16.gmra.mxu0 %vm442_vm1, %v1580_v32  ;;  %1522 = vmatmul.mubr.msk.bf16.gmra.mxu1 %vm442_vm1, %v1581_v33 }
  0x51   : > { %1493 = vmatprep.mubr.msk.bf16.mxu0 %vm442_vm1, %v1582_v34  ;;  %1525 = vmatprep.mubr.msk.bf16.mxu1 %vm442_vm1, %v1583_v35 }
  0x58   : > { %1494 = vmatmul.mubr.msk.bf16.gmra.mxu0 %vm442_vm1, %v1584_v36  ;;  %1526 = vmatmul.mubr.msk.bf16.gmra.mxu1 %vm442_vm1, %v1585_v37 }
  0xe0   : > { %v1467_v39 = vpop.f32.mrf.mxu0  ;;  %v1499_v40 = vpop.f32.mrf.mxu1 }
  0xe1   : > { %v586_v41 = vadd.f32 %v1467_v39, %v1714_v38  ;;  %v714_v42 = vadd.f32 %v1499_v40, %v1714_v38 }
  0xe2   : > { %v577_v43 = vpop.f32.mrf.mxu0  ;;  %v705_v44 = vpop.f32.mrf.mxu1 }
  0xe3   : > { %v1356_v45 = vpack.c.bf16 %v586_v41, %v586_v41  ;;  %v1388_v46 = vpack.c.bf16 %v714_v42, %v714_v42  ;;  %v578_v47 = vadd.f32 %v1714_v38, %v577_v43  ;;  %v706_v48 = vadd.f32 %v1714_v38, %v705_v44 }
  0xe4   : > { %v1468_v49 = vpop.f32.mrf.mxu0  ;;  %v1500_v50 = vpop.f32.mrf.mxu1 }
  0xe5   : > { %1091 = vst.msk [vmem:[%s1723_s6 + $0x8] sm:$0xf] %vm1088_vm2, %v1356_v45  ;;  %1123 = vst.msk [vmem:[%s1723_s6 + $0x88] sm:$0xf] %vm1088_vm2, %v1388_v46  ;;  %v1354_v51 = vpack.c.bf16 %v578_v47, %v578_v47  ;;  %v1386_v52 = vpack.c.bf16 %v706_v48, %v706_v48  ;;  %v589_v53 = vadd.f32 %v1468_v49, %v1714_v38 }
  0xe6   : > { %v717_v54 = vadd.f32 %v1500_v50, %v1714_v38  ;;  %v580_v55 = vpop.f32.mrf.mxu0  ;;  %v708_v56 = vpop.f32.mrf.mxu1 }
  0xe7   : > { %1089 = vst.msk [vmem:[%s1723_s6] sm:$0xf] %vm1088_vm2, %v1354_v51  ;;  %1121 = vst.msk [vmem:[%s1723_s6 + $0x80] sm:$0xf] %vm1088_vm2, %v1386_v52  ;;  %v1357_v57 = vpack.c.bf16 %v589_v53, %v589_v53  ;;  %v581_v59 = vadd.f32 %v1714_v38, %v580_v55  ;;  %v709_v60 = vadd.f32 %v1714_v38, %v708_v56 }
  0xe8   : > { %v1389_v58 = vpack.c.bf16 %v717_v54, %v717_v54  ;;  %v1471_v61 = vpop.f32.mrf.mxu0  ;;  %v1503_v62 = vpop.f32.mrf.mxu1 }
  0xe9   : > { %1092 = vst.msk [vmem:[%s1723_s6 + $0xc] sm:$0xf] %vm1088_vm2, %v1357_v57  ;;  %v1355_v63 = vpack.c.bf16 %v581_v59, %v581_v59  ;;  %v1387_v0 = vpack.c.bf16 %v709_v60, %v709_v60  ;;  %v602_v1 = vadd.f32 %v1471_v61, %v1714_v38  ;;  %v730_v2 = vadd.f32 %v1503_v62, %v1714_v38 }
  0xea   : > { %1124 = vst.msk [vmem:[%s1723_s6 + $0x8c] sm:$0xf] %vm1088_vm2, %v1389_v58  ;;  %v593_v3 = vpop.f32.mrf.mxu0  ;;  %v721_v4 = vpop.f32.mrf.mxu1 }
  0xeb   : > { %1090 = vst.msk [vmem:[%s1723_s6 + $0x4] sm:$0xf] %vm1088_vm2, %v1355_v63  ;;  %1122 = vst.msk [vmem:[%s1723_s6 + $0x84] sm:$0xf] %vm1088_vm2, %v1387_v0  ;;  %v1360_v5 = vpack.c.bf16 %v602_v1, %v602_v1  ;;  %v1392_v6 = vpack.c.bf16 %v730_v2, %v730_v2  ;;  %v594_v7 = vadd.f32 %v1714_v38, %v593_v3 }
  0xec   : > { %v722_v8 = vadd.f32 %v1714_v38, %v721_v4  ;;  %v1472_v9 = vpop.f32.mrf.mxu0  ;;  %v1504_v10 = vpop.f32.mrf.mxu1 }
  0xed   : > { %1095 = vst.msk [vmem:[%s1723_s6 + $0x18] sm:$0xf] %vm1088_vm2, %v1360_v5  ;;  %1127 = vst.msk [vmem:[%s1723_s6 + $0x98] sm:$0xf] %vm1088_vm2, %v1392_v6  ;;  %v1358_v11 = vpack.c.bf16 %v594_v7, %v594_v7  ;;  %v605_v13 = vadd.f32 %v1472_v9, %v1714_v38  ;;  %v733_v14 = vadd.f32 %v1504_v10, %v1714_v38 }
  0xee   : > { %v1390_v12 = vpack.c.bf16 %v722_v8, %v722_v8  ;;  %v596_v15 = vpop.f32.mrf.mxu0  ;;  %v724_v16 = vpop.f32.mrf.mxu1 }
  0xef   : > { %1093 = vst.msk [vmem:[%s1723_s6 + $0x10] sm:$0xf] %vm1088_vm2, %v1358_v11  ;;  %v1361_v17 = vpack.c.bf16 %v605_v13, %v605_v13  ;;  %v1393_v18 = vpack.c.bf16 %v733_v14, %v733_v14  ;;  %v597_v19 = vadd.f32 %v1714_v38, %v596_v15  ;;  %v725_v20 = vadd.f32 %v1714_v38, %v724_v16 }
  0xf0   : > { %1125 = vst.msk [vmem:[%s1723_s6 + $0x90] sm:$0xf] %vm1088_vm2, %v1390_v12  ;;  %v1475_v21 = vpop.f32.mrf.mxu0  ;;  %v1507_v22 = vpop.f32.mrf.mxu1 }
  0xf1   : > { %1096 = vst.msk [vmem:[%s1723_s6 + $0x1c] sm:$0xf] %vm1088_vm2, %v1361_v17  ;;  %1128 = vst.msk [vmem:[%s1723_s6 + $0x9c] sm:$0xf] %vm1088_vm2, %v1393_v18  ;;  %v1359_v23 = vpack.c.bf16 %v597_v19, %v597_v19  ;;  %v1391_v24 = vpack.c.bf16 %v725_v20, %v725_v20  ;;  %v618_v25 = vadd.f32 %v1475_v21, %v1714_v38 }
  0xf2   : > { %v746_v26 = vadd.f32 %v1507_v22, %v1714_v38  ;;  %v609_v27 = vpop.f32.mrf.mxu0  ;;  %v737_v28 = vpop.f32.mrf.mxu1 }
  0xf3   : > { %1094 = vst.msk [vmem:[%s1723_s6 + $0x14] sm:$0xf] %vm1088_vm2, %v1359_v23  ;;  %1126 = vst.msk [vmem:[%s1723_s6 + $0x94] sm:$0xf] %vm1088_vm2, %v1391_v24  ;;  %v1364_v29 = vpack.c.bf16 %v618_v25, %v618_v25  ;;  %v610_v31 = vadd.f32 %v1714_v38, %v609_v27  ;;  %v738_v32 = vadd.f32 %v1714_v38, %v737_v28 }
  0xf4   : > { %v1396_v30 = vpack.c.bf16 %v746_v26, %v746_v26  ;;  %v1476_v33 = vpop.f32.mrf.mxu0  ;;  %v1508_v34 = vpop.f32.mrf.mxu1 }
  0xf5   : > { %1099 = vst.msk [vmem:[%s1723_s6 + $0x28] sm:$0xf] %vm1088_vm2, %v1364_v29  ;;  %v1362_v35 = vpack.c.bf16 %v610_v31, %v610_v31  ;;  %v1394_v36 = vpack.c.bf16 %v738_v32, %v738_v32  ;;  %v621_v37 = vadd.f32 %v1476_v33, %v1714_v38  ;;  %v749_v39 = vadd.f32 %v1508_v34, %v1714_v38 }
  0xf6   : > { %1131 = vst.msk [vmem:[%s1723_s6 + $0xa8] sm:$0xf] %vm1088_vm2, %v1396_v30  ;;  %v612_v40 = vpop.f32.mrf.mxu0  ;;  %v740_v41 = vpop.f32.mrf.mxu1 }
  0xf7   : > { %1097 = vst.msk [vmem:[%s1723_s6 + $0x20] sm:$0xf] %vm1088_vm2, %v1362_v35  ;;  %1129 = vst.msk [vmem:[%s1723_s6 + $0xa0] sm:$0xf] %vm1088_vm2, %v1394_v36  ;;  %v1365_v42 = vpack.c.bf16 %v621_v37, %v621_v37  ;;  %v1397_v43 = vpack.c.bf16 %v749_v39, %v749_v39  ;;  %v613_v44 = vadd.f32 %v1714_v38, %v612_v40 }
  0xf8   : > { %v741_v45 = vadd.f32 %v1714_v38, %v740_v41  ;;  %v1479_v46 = vpop.f32.mrf.mxu0  ;;  %v1511_v47 = vpop.f32.mrf.mxu1 }
  0xf9   : > { %1100 = vst.msk [vmem:[%s1723_s6 + $0x2c] sm:$0xf] %vm1088_vm2, %v1365_v42  ;;  %1132 = vst.msk [vmem:[%s1723_s6 + $0xac] sm:$0xf] %vm1088_vm2, %v1397_v43  ;;  %v1363_v48 = vpack.c.bf16 %v613_v44, %v613_v44  ;;  %v634_v50 = vadd.f32 %v1479_v46, %v1714_v38  ;;  %v762_v51 = vadd.f32 %v1511_v47, %v1714_v38 }
  0xfa   : > { %v1395_v49 = vpack.c.bf16 %v741_v45, %v741_v45  ;;  %v625_v52 = vpop.f32.mrf.mxu0  ;;  %v753_v53 = vpop.f32.mrf.mxu1 }
  0xfb   : > { %1098 = vst.msk [vmem:[%s1723_s6 + $0x24] sm:$0xf] %vm1088_vm2, %v1363_v48  ;;  %v1368_v54 = vpack.c.bf16 %v634_v50, %v634_v50  ;;  %v1400_v55 = vpack.c.bf16 %v762_v51, %v762_v51  ;;  %v626_v56 = vadd.f32 %v1714_v38, %v625_v52  ;;  %v754_v57 = vadd.f32 %v1714_v38, %v753_v53 }
  0xfc   : > { %1130 = vst.msk [vmem:[%s1723_s6 + $0xa4] sm:$0xf] %vm1088_vm2, %v1395_v49  ;;  %v1480_v58 = vpop.f32.mrf.mxu0  ;;  %v1512_v59 = vpop.f32.mrf.mxu1 }
  0xfd   : > { %1103 = vst.msk [vmem:[%s1723_s6 + $0x38] sm:$0xf] %vm1088_vm2, %v1368_v54  ;;  %1135 = vst.msk [vmem:[%s1723_s6 + $0xb8] sm:$0xf] %vm1088_vm2, %v1400_v55  ;;  %v1366_v60 = vpack.c.bf16 %v626_v56, %v626_v56  ;;  %v1398_v61 = vpack.c.bf16 %v754_v57, %v754_v57  ;;  %v637_v62 = vadd.f32 %v1480_v58, %v1714_v38 }
  0xfe   : > { %v765_v63 = vadd.f32 %v1512_v59, %v1714_v38  ;;  %v628_v0 = vpop.f32.mrf.mxu0  ;;  %v756_v1 = vpop.f32.mrf.mxu1 }
  0xff   : > { %1101 = vst.msk [vmem:[%s1723_s6 + $0x30] sm:$0xf] %vm1088_vm2, %v1366_v60  ;;  %1133 = vst.msk [vmem:[%s1723_s6 + $0xb0] sm:$0xf] %vm1088_vm2, %v1398_v61  ;;  %v1369_v2 = vpack.c.bf16 %v637_v62, %v637_v62  ;;  %v629_v4 = vadd.f32 %v1714_v38, %v628_v0  ;;  %v757_v5 = vadd.f32 %v1714_v38, %v756_v1 }
 0x100   : > { %v1401_v3 = vpack.c.bf16 %v765_v63, %v765_v63  ;;  %v1483_v6 = vpop.f32.mrf.mxu0  ;;  %v1515_v7 = vpop.f32.mrf.mxu1 }
 0x101   : > { %1104 = vst.msk [vmem:[%s1723_s6 + $0x3c] sm:$0xf] %vm1088_vm2, %v1369_v2  ;;  %v1367_v8 = vpack.c.bf16 %v629_v4, %v629_v4  ;;  %v1399_v9 = vpack.c.bf16 %v757_v5, %v757_v5  ;;  %v650_v10 = vadd.f32 %v1483_v6, %v1714_v38  ;;  %v778_v11 = vadd.f32 %v1515_v7, %v1714_v38 }
 0x102   : > { %1136 = vst.msk [vmem:[%s1723_s6 + $0xbc] sm:$0xf] %vm1088_vm2, %v1401_v3  ;;  %v641_v12 = vpop.f32.mrf.mxu0  ;;  %v769_v13 = vpop.f32.mrf.mxu1 }
 0x103   : > { %1102 = vst.msk [vmem:[%s1723_s6 + $0x34] sm:$0xf] %vm1088_vm2, %v1367_v8  ;;  %1134 = vst.msk [vmem:[%s1723_s6 + $0xb4] sm:$0xf] %vm1088_vm2, %v1399_v9  ;;  %v1372_v14 = vpack.c.bf16 %v650_v10, %v650_v10  ;;  %v1404_v15 = vpack.c.bf16 %v778_v11, %v778_v11  ;;  %v642_v16 = vadd.f32 %v1714_v38, %v641_v12 }
 0x104   : > { %v770_v17 = vadd.f32 %v1714_v38, %v769_v13  ;;  %v1484_v18 = vpop.f32.mrf.mxu0  ;;  %v1516_v19 = vpop.f32.mrf.mxu1 }
 0x105   : > { %1107 = vst.msk [vmem:[%s1723_s6 + $0x48] sm:$0xf] %vm1088_vm2, %v1372_v14  ;;  %1139 = vst.msk [vmem:[%s1723_s6 + $0xc8] sm:$0xf] %vm1088_vm2, %v1404_v15  ;;  %v1370_v20 = vpack.c.bf16 %v642_v16, %v642_v16  ;;  %v653_v22 = vadd.f32 %v1484_v18, %v1714_v38  ;;  %v781_v23 = vadd.f32 %v1516_v19, %v1714_v38 }
 0x106   : > { %v1402_v21 = vpack.c.bf16 %v770_v17, %v770_v17  ;;  %v644_v24 = vpop.f32.mrf.mxu0  ;;  %v772_v25 = vpop.f32.mrf.mxu1 }
 0x107   : > { %1105 = vst.msk [vmem:[%s1723_s6 + $0x40] sm:$0xf] %vm1088_vm2, %v1370_v20  ;;  %v1373_v26 = vpack.c.bf16 %v653_v22, %v653_v22  ;;  %v1405_v27 = vpack.c.bf16 %v781_v23, %v781_v23  ;;  %v645_v28 = vadd.f32 %v1714_v38, %v644_v24  ;;  %v773_v29 = vadd.f32 %v1714_v38, %v772_v25 }
 0x108   : > { %1137 = vst.msk [vmem:[%s1723_s6 + $0xc0] sm:$0xf] %vm1088_vm2, %v1402_v21  ;;  %v1487_v30 = vpop.f32.mrf.mxu0  ;;  %v1519_v31 = vpop.f32.mrf.mxu1 }
 0x109   : > { %1108 = vst.msk [vmem:[%s1723_s6 + $0x4c] sm:$0xf] %vm1088_vm2, %v1373_v26  ;;  %1140 = vst.msk [vmem:[%s1723_s6 + $0xcc] sm:$0xf] %vm1088_vm2, %v1405_v27  ;;  %v1371_v32 = vpack.c.bf16 %v645_v28, %v645_v28  ;;  %v1403_v33 = vpack.c.bf16 %v773_v29, %v773_v29  ;;  %v666_v34 = vadd.f32 %v1487_v30, %v1714_v38 }
 0x10a   : > { %v794_v35 = vadd.f32 %v1519_v31, %v1714_v38  ;;  %v657_v36 = vpop.f32.mrf.mxu0  ;;  %v785_v37 = vpop.f32.mrf.mxu1 }
 0x10b   : > { %1106 = vst.msk [vmem:[%s1723_s6 + $0x44] sm:$0xf] %vm1088_vm2, %v1371_v32  ;;  %1138 = vst.msk [vmem:[%s1723_s6 + $0xc4] sm:$0xf] %vm1088_vm2, %v1403_v33  ;;  %v1376_v39 = vpack.c.bf16 %v666_v34, %v666_v34  ;;  %v658_v41 = vadd.f32 %v1714_v38, %v657_v36  ;;  %v786_v42 = vadd.f32 %v1714_v38, %v785_v37 }
 0x10c   : > { %v1408_v40 = vpack.c.bf16 %v794_v35, %v794_v35  ;;  %v1488_v43 = vpop.f32.mrf.mxu0  ;;  %v1520_v44 = vpop.f32.mrf.mxu1 }
 0x10d   : > { %1111 = vst.msk [vmem:[%s1723_s6 + $0x58] sm:$0xf] %vm1088_vm2, %v1376_v39  ;;  %v1374_v45 = vpack.c.bf16 %v658_v41, %v658_v41  ;;  %v1406_v46 = vpack.c.bf16 %v786_v42, %v786_v42  ;;  %v669_v47 = vadd.f32 %v1488_v43, %v1714_v38  ;;  %v797_v48 = vadd.f32 %v1520_v44, %v1714_v38 }
 0x10e   : > { %1143 = vst.msk [vmem:[%s1723_s6 + $0xd8] sm:$0xf] %vm1088_vm2, %v1408_v40  ;;  %v660_v49 = vpop.f32.mrf.mxu0  ;;  %v788_v50 = vpop.f32.mrf.mxu1 }
 0x10f   : > { %1109 = vst.msk [vmem:[%s1723_s6 + $0x50] sm:$0xf] %vm1088_vm2, %v1374_v45  ;;  %1141 = vst.msk [vmem:[%s1723_s6 + $0xd0] sm:$0xf] %vm1088_vm2, %v1406_v46  ;;  %v1377_v51 = vpack.c.bf16 %v669_v47, %v669_v47  ;;  %v1409_v52 = vpack.c.bf16 %v797_v48, %v797_v48  ;;  %v661_v53 = vadd.f32 %v1714_v38, %v660_v49 }
 0x110   : > { %v789_v54 = vadd.f32 %v1714_v38, %v788_v50  ;;  %v1491_v55 = vpop.f32.mrf.mxu0  ;;  %v1523_v56 = vpop.f32.mrf.mxu1 }
 0x111   : > { %1112 = vst.msk [vmem:[%s1723_s6 + $0x5c] sm:$0xf] %vm1088_vm2, %v1377_v51  ;;  %1144 = vst.msk [vmem:[%s1723_s6 + $0xdc] sm:$0xf] %vm1088_vm2, %v1409_v52  ;;  %v1375_v57 = vpack.c.bf16 %v661_v53, %v661_v53  ;;  %v682_v59 = vadd.f32 %v1491_v55, %v1714_v38  ;;  %v810_v60 = vadd.f32 %v1523_v56, %v1714_v38 }
 0x112   : > { %v1407_v58 = vpack.c.bf16 %v789_v54, %v789_v54  ;;  %v673_v61 = vpop.f32.mrf.mxu0  ;;  %v801_v62 = vpop.f32.mrf.mxu1 }
 0x113   : > { %1110 = vst.msk [vmem:[%s1723_s6 + $0x54] sm:$0xf] %vm1088_vm2, %v1375_v57  ;;  %v1380_v63 = vpack.c.bf16 %v682_v59, %v682_v59  ;;  %v1412_v0 = vpack.c.bf16 %v810_v60, %v810_v60  ;;  %v674_v1 = vadd.f32 %v1714_v38, %v673_v61  ;;  %v802_v2 = vadd.f32 %v1714_v38, %v801_v62 }
 0x114   : > { %1142 = vst.msk [vmem:[%s1723_s6 + $0xd4] sm:$0xf] %vm1088_vm2, %v1407_v58  ;;  %v1492_v3 = vpop.f32.mrf.mxu0  ;;  %v1524_v4 = vpop.f32.mrf.mxu1 }
 0x115   : > { %1115 = vst.msk [vmem:[%s1723_s6 + $0x68] sm:$0xf] %vm1088_vm2, %v1380_v63  ;;  %1147 = vst.msk [vmem:[%s1723_s6 + $0xe8] sm:$0xf] %vm1088_vm2, %v1412_v0  ;;  %v1378_v5 = vpack.c.bf16 %v674_v1, %v674_v1  ;;  %v1410_v6 = vpack.c.bf16 %v802_v2, %v802_v2  ;;  %v685_v7 = vadd.f32 %v1492_v3, %v1714_v38 }
 0x116   : > { %v813_v8 = vadd.f32 %v1524_v4, %v1714_v38  ;;  %v676_v9 = vpop.f32.mrf.mxu0  ;;  %v804_v10 = vpop.f32.mrf.mxu1 }
 0x117   : > { %1113 = vst.msk [vmem:[%s1723_s6 + $0x60] sm:$0xf] %vm1088_vm2, %v1378_v5  ;;  %1145 = vst.msk [vmem:[%s1723_s6 + $0xe0] sm:$0xf] %vm1088_vm2, %v1410_v6  ;;  %v1381_v11 = vpack.c.bf16 %v685_v7, %v685_v7  ;;  %v677_v13 = vadd.f32 %v1714_v38, %v676_v9  ;;  %v805_v14 = vadd.f32 %v1714_v38, %v804_v10 }
 0x118   : > { %v1413_v12 = vpack.c.bf16 %v813_v8, %v813_v8  ;;  %v1495_v15 = vpop.f32.mrf.mxu0  ;;  %v1527_v16 = vpop.f32.mrf.mxu1 }
 0x119   : > { %1116 = vst.msk [vmem:[%s1723_s6 + $0x6c] sm:$0xf] %vm1088_vm2, %v1381_v11  ;;  %v1379_v17 = vpack.c.bf16 %v677_v13, %v677_v13  ;;  %v1411_v18 = vpack.c.bf16 %v805_v14, %v805_v14  ;;  %v698_v19 = vadd.f32 %v1495_v15, %v1714_v38  ;;  %v826_v20 = vadd.f32 %v1527_v16, %v1714_v38 }
 0x11a   : > { %1148 = vst.msk [vmem:[%s1723_s6 + $0xec] sm:$0xf] %vm1088_vm2, %v1413_v12  ;;  %v689_v21 = vpop.f32.mrf.mxu0  ;;  %v817_v22 = vpop.f32.mrf.mxu1 }
 0x11b   : > { %1114 = vst.msk [vmem:[%s1723_s6 + $0x64] sm:$0xf] %vm1088_vm2, %v1379_v17  ;;  %1146 = vst.msk [vmem:[%s1723_s6 + $0xe4] sm:$0xf] %vm1088_vm2, %v1411_v18  ;;  %v1384_v23 = vpack.c.bf16 %v698_v19, %v698_v19  ;;  %v1416_v24 = vpack.c.bf16 %v826_v20, %v826_v20  ;;  %v690_v25 = vadd.f32 %v1714_v38, %v689_v21 }
 0x11c   : > { %v818_v26 = vadd.f32 %v1714_v38, %v817_v22  ;;  %v1496_v27 = vpop.f32.mrf.mxu0  ;;  %v1528_v28 = vpop.f32.mrf.mxu1 }
 0x11d   : > { %1119 = vst.msk [vmem:[%s1723_s6 + $0x78] sm:$0xf] %vm1088_vm2, %v1384_v23  ;;  %1151 = vst.msk [vmem:[%s1723_s6 + $0xf8] sm:$0xf] %vm1088_vm2, %v1416_v24  ;;  %v1382_v29 = vpack.c.bf16 %v690_v25, %v690_v25  ;;  %v701_v31 = vadd.f32 %v1496_v27, %v1714_v38  ;;  %v829_v32 = vadd.f32 %v1528_v28, %v1714_v38 }
 0x11e   : > { %v1414_v30 = vpack.c.bf16 %v818_v26, %v818_v26  ;;  %v692_v33 = vpop.f32.mrf.mxu0  ;;  %v820_v34 = vpop.f32.mrf.mxu1 }
 0x11f   : > { %1117 = vst.msk [vmem:[%s1723_s6 + $0x70] sm:$0xf] %vm1088_vm2, %v1382_v29  ;;  %v1385_v35 = vpack.c.bf16 %v701_v31, %v701_v31  ;;  %v1417_v36 = vpack.c.bf16 %v829_v32, %v829_v32  ;;  %v693_v37 = vadd.f32 %v1714_v38, %v692_v33  ;;  %v821_v39 = vadd.f32 %v1714_v38, %v820_v34 }
 0x120   : > { %1149 = vst.msk [vmem:[%s1723_s6 + $0xf0] sm:$0xf] %vm1088_vm2, %v1414_v30 }
 0x121   : > { %1120 = vst.msk [vmem:[%s1723_s6 + $0x7c] sm:$0xf] %vm1088_vm2, %v1385_v35  ;;  %1152 = vst.msk [vmem:[%s1723_s6 + $0xfc] sm:$0xf] %vm1088_vm2, %v1417_v36  ;;  %v1383_v40 = vpack.c.bf16 %v693_v37, %v693_v37  ;;  %v1415_v41 = vpack.c.bf16 %v821_v39, %v821_v39 }
 0x123   : > { %1118 = vst.msk [vmem:[%s1723_s6 + $0x74] sm:$0xf] %vm1088_vm2, %v1383_v40  ;;  %1150 = vst.msk [vmem:[%s1723_s6 + $0xf4] sm:$0xf] %vm1088_vm2, %v1415_v41 }
 0x124 PF: > { %s13_s12 = sadd.s32 1, %s1592_s12  }
 0x125   : > { %p10_p4 = scmp.ge.s32.totalorder %s13_s12, 6  }
 0x127   :  { %12 = sbr.rel (!%p10_p4) target bundleno = 1 (0x1), region = 62 }

// kernel: resnet_encoder_forward.13
= control target key start
LH: loop header
LB: loop body
LE: loop exit
PB: predicated region body
PF: predicated region fallthrough
CT: control target
= control target key end

     0   :  { %vm379_vm0 = vcmask 1043456   ;;  %vm282_vm1 = vcmask 588800   ;;  %vm1120_vm4 = vcmask 125952   ;;  %s2062_s1 = inlined_call_operand.vmem [shape: bf16[72,16], index: 1, kind: input, shape index: {}]   ;;  %s2063_s0 = inlined_call_operand.vmem [shape: bf16[512,72], index: 0, kind: input, shape index: {}]   ;;  %s2064_s2 = inlined_call_operand.vmem [shape: f32[1,16], index: 2, kind: input, shape index: {}]   ;;  %s2065_s3 = inlined_call_operand.vmem [shape: bf16[512,16], index: 3, kind: output, shape index: {}]  }
   0x1   :  { %v1510_v0 = vld [vmem:[%s2062_s1 + $0x20] ss:$0 sps:$4 sm:$0xff]   ;;  %v1511_v1 = vld [vmem:[%s2062_s1 + $0x18] sm:$0xff]   ;;  %v1512_v3 = vld [vmem:[%s2062_s1 + $0x10] sm:$0xff]  }
   0x2   :  { %1508 = vmatprep.subr.msk.bf16.mxu0 %vm379_vm0, %v1510_v0  ;;  %1509 = vmatprep.subr.msk.bf16.mxu1 %vm379_vm0, %v1510_v0  ;;  %v381_v2 = vsel %vm379_vm0, %v1510_v0, 0  ;;  %v1515_v4 = vld [vmem:[%s2063_s0] sm:$0xff]   ;;  %v1513_v6 = vld [vmem:[%s2062_s1 + $0x8] sm:$0xff]   ;;  %v1519_v10 = vld [vmem:[%s2063_s0 + $0x10] sm:$0xff]  }
   0x3   :  { %1425 = vmatpush3.bf16.msra.mxu0 %v381_v2  ;;  %1503 = vmatpush3.bf16.msra.mxu1 %v381_v2  ;;  %v1516_v5 = vld [vmem:[%s2063_s0 + $0x80] sm:$0xff]   ;;  %v1517_v8 = vld [vmem:[%s2063_s0 + $0x8] sm:$0xff]   ;;  %v1520_v11 = vld [vmem:[%s2063_s0 + $0x90] sm:$0xff]  }
   0x4   :  { %1426 = vmatprep.subr.bf16.mxu0 %v1511_v1  ;;  %1499 = vmatprep.subr.bf16.mxu1 %v1511_v1  ;;  %v1514_v7 = vld [vmem:[%s2062_s1] sm:$0xff]   ;;  %v1518_v9 = vld [vmem:[%s2063_s0 + $0x88] sm:$0xff]   ;;  %v1521_v12 = vld [vmem:[%s2063_s0 + $0x18] sm:$0xff]  }
   0x5   :  { %1434 = vmatprep.mubr.msk.bf16.mxu0 %vm282_vm1, %v1515_v4  ;;  %1466 = vmatprep.mubr.msk.bf16.mxu1 %vm282_vm1, %v1516_v5  ;;  %v1522_v13 = vld [vmem:[%s2063_s0 + $0x98] sm:$0xff]   ;;  %v1523_v14 = vld [vmem:[%s2063_s0 + $0x20] sm:$0xff]   ;;  %v1525_v16 = vld [vmem:[%s2063_s0 + $0x28] sm:$0xff]  }
   0x6   :  { %v1524_v15 = vld [vmem:[%s2063_s0 + $0xa0] sm:$0xff]   ;;  %v1526_v17 = vld [vmem:[%s2063_s0 + $0xa8] sm:$0xff]   ;;  %v1527_v18 = vld [vmem:[%s2063_s0 + $0x30] sm:$0xff]  }
   0x7   :  { %1427 = vmatpush3.bf16.msra.mxu0 %v1511_v1  ;;  %1504 = vmatpush3.bf16.msra.mxu1 %v1511_v1  ;;  %v1528_v19 = vld [vmem:[%s2063_s0 + $0xb0] sm:$0xff]   ;;  %v1529_v20 = vld [vmem:[%s2063_s0 + $0x38] sm:$0xff]   ;;  %v1531_v22 = vld [vmem:[%s2063_s0 + $0x40] sm:$0xff]  }
   0x8   :  { %1428 = vmatprep.subr.bf16.mxu0 %v1512_v3  ;;  %1500 = vmatprep.subr.bf16.mxu1 %v1512_v3  ;;  %v1530_v21 = vld [vmem:[%s2063_s0 + $0xb8] sm:$0xff]   ;;  %v1532_v23 = vld [vmem:[%s2063_s0 + $0xc0] sm:$0xff]   ;;  %v1533_v24 = vld [vmem:[%s2063_s0 + $0x48] sm:$0xff]  }
   0x9   :  { %v1534_v25 = vld [vmem:[%s2063_s0 + $0xc8] sm:$0xff]   ;;  %v1535_v26 = vld [vmem:[%s2063_s0 + $0x50] sm:$0xff]   ;;  %v1537_v28 = vld [vmem:[%s2063_s0 + $0x58] sm:$0xff]  }
   0xa   :  { %v1536_v27 = vld [vmem:[%s2063_s0 + $0xd0] sm:$0xff]   ;;  %v1538_v29 = vld [vmem:[%s2063_s0 + $0xd8] sm:$0xff]   ;;  %v1539_v30 = vld [vmem:[%s2063_s0 + $0x60] sm:$0xff]  }
   0xb   :  { %1429 = vmatpush3.bf16.msra.mxu0 %v1512_v3  ;;  %1505 = vmatpush3.bf16.msra.mxu1 %v1512_v3  ;;  %v1540_v31 = vld [vmem:[%s2063_s0 + $0xe0] sm:$0xff]   ;;  %v1541_v32 = vld [vmem:[%s2063_s0 + $0x68] sm:$0xff]   ;;  %v1543_v34 = vld [vmem:[%s2063_s0 + $0x70] sm:$0xff]  }
   0xc   :  { %1430 = vmatprep.subr.bf16.mxu0 %v1513_v6  ;;  %1501 = vmatprep.subr.bf16.mxu1 %v1513_v6  ;;  %v1542_v33 = vld [vmem:[%s2063_s0 + $0xe8] sm:$0xff]   ;;  %v1544_v35 = vld [vmem:[%s2063_s0 + $0xf0] sm:$0xff]   ;;  %v1545_v36 = vld [vmem:[%s2063_s0 + $0x78] sm:$0xff]  }
   0xd   :  { %v1546_v37 = vld [vmem:[%s2063_s0 + $0xf8] sm:$0xff]   ;;  %v1713_v38 = vld [vmem:[%s2064_s2] ss:$0 sm:$0xff] }
   0xf   :  { %1431 = vmatpush3.bf16.msra.mxu0 %v1513_v6  ;;  %1506 = vmatpush3.bf16.msra.mxu1 %v1513_v6 }
  0x10   :  { %1432 = vmatprep.subr.bf16.mxu0 %v1514_v7  ;;  %1502 = vmatprep.subr.bf16.mxu1 %v1514_v7 }
  0x13   :  { %1433 = vmatpush3.bf16.msra.mxu0 %v1514_v7  ;;  %1507 = vmatpush3.bf16.msra.mxu1 %v1514_v7 }
  0x16   :  { %1435 = vmatmul.mubr.msk.bf16.vlgmr.msra.gmra.mxu0 %vm282_vm1, %v1517_v8  ;;  %1467 = vmatmul.mubr.msk.bf16.vlgmr.msra.gmra.mxu1 %vm282_vm1, %v1518_v9 }
  0x17   :  { %1438 = vmatprep.mubr.msk.bf16.mxu0 %vm282_vm1, %v1519_v10  ;;  %1470 = vmatprep.mubr.msk.bf16.mxu1 %vm282_vm1, %v1520_v11 }
  0x1e   :  { %1439 = vmatmul.mubr.msk.bf16.gmra.mxu0 %vm282_vm1, %v1521_v12  ;;  %1471 = vmatmul.mubr.msk.bf16.gmra.mxu1 %vm282_vm1, %v1522_v13 }
  0x1f   :  { %1442 = vmatprep.mubr.msk.bf16.mxu0 %vm282_vm1, %v1523_v14  ;;  %1474 = vmatprep.mubr.msk.bf16.mxu1 %vm282_vm1, %v1524_v15 }
  0x26   :  { %1443 = vmatmul.mubr.msk.bf16.gmra.mxu0 %vm282_vm1, %v1525_v16  ;;  %1475 = vmatmul.mubr.msk.bf16.gmra.mxu1 %vm282_vm1, %v1526_v17 }
  0x27   :  { %1446 = vmatprep.mubr.msk.bf16.mxu0 %vm282_vm1, %v1527_v18  ;;  %1478 = vmatprep.mubr.msk.bf16.mxu1 %vm282_vm1, %v1528_v19 }
  0x2e   :  { %1447 = vmatmul.mubr.msk.bf16.gmra.mxu0 %vm282_vm1, %v1529_v20  ;;  %1479 = vmatmul.mubr.msk.bf16.gmra.mxu1 %vm282_vm1, %v1530_v21 }
  0x2f   :  { %1450 = vmatprep.mubr.msk.bf16.mxu0 %vm282_vm1, %v1531_v22  ;;  %1482 = vmatprep.mubr.msk.bf16.mxu1 %vm282_vm1, %v1532_v23 }
  0x36   :  { %1451 = vmatmul.mubr.msk.bf16.gmra.mxu0 %vm282_vm1, %v1533_v24  ;;  %1483 = vmatmul.mubr.msk.bf16.gmra.mxu1 %vm282_vm1, %v1534_v25 }
  0x37   :  { %1454 = vmatprep.mubr.msk.bf16.mxu0 %vm282_vm1, %v1535_v26  ;;  %1486 = vmatprep.mubr.msk.bf16.mxu1 %vm282_vm1, %v1536_v27 }
  0x3e   :  { %1455 = vmatmul.mubr.msk.bf16.gmra.mxu0 %vm282_vm1, %v1537_v28  ;;  %1487 = vmatmul.mubr.msk.bf16.gmra.mxu1 %vm282_vm1, %v1538_v29 }
  0x3f   :  { %1458 = vmatprep.mubr.msk.bf16.mxu0 %vm282_vm1, %v1539_v30  ;;  %1490 = vmatprep.mubr.msk.bf16.mxu1 %vm282_vm1, %v1540_v31 }
  0x46   :  { %1459 = vmatmul.mubr.msk.bf16.gmra.mxu0 %vm282_vm1, %v1541_v32  ;;  %1491 = vmatmul.mubr.msk.bf16.gmra.mxu1 %vm282_vm1, %v1542_v33 }
  0x47   :  { %1462 = vmatprep.mubr.msk.bf16.mxu0 %vm282_vm1, %v1543_v34  ;;  %1494 = vmatprep.mubr.msk.bf16.mxu1 %vm282_vm1, %v1544_v35 }
  0x4e   :  { %1463 = vmatmul.mubr.msk.bf16.gmra.mxu0 %vm282_vm1, %v1545_v36  ;;  %1495 = vmatmul.mubr.msk.bf16.gmra.mxu1 %vm282_vm1, %v1546_v37 }
  0xd6   :  { %v1436_v39 = vpop.f32.mrf.mxu0  ;;  %v1468_v40 = vpop.f32.mrf.mxu1 }
  0xd7   :  { %v426_v41 = vadd.f32 %v1436_v39, %v1713_v38  ;;  %v554_v42 = vadd.f32 %v1468_v40, %v1713_v38 }
  0xd8   :  { %v417_v43 = vpop.f32.mrf.mxu0  ;;  %v545_v44 = vpop.f32.mrf.mxu1 }
  0xd9   :  { %vm674_vm2 = vcmp.ge.f32.partialorder %v426_v41, 0.0  ;;  %v738_v45 = vmul.f32 0.01, %v426_v41  ;;  %vm706_vm3 = vcmp.ge.f32.partialorder %v554_v42, 0.0  ;;  %v770_v46 = vmul.f32 0.01, %v554_v42 }
  0xda   :  { %v418_v47 = vadd.f32 %v1713_v38, %v417_v43  ;;  %v546_v48 = vadd.f32 %v1713_v38, %v545_v44  ;;  %v1437_v49 = vpop.f32.mrf.mxu0  ;;  %v1469_v50 = vpop.f32.mrf.mxu1 }
  0xdb   :  { %v802_v51 = vsel %vm674_vm2, %v426_v41, %v738_v45  ;;  %v834_v52 = vsel %vm706_vm3, %v554_v42, %v770_v46  ;;  %v429_v53 = vadd.f32 %v1437_v49, %v1713_v38  ;;  %v557_v54 = vadd.f32 %v1469_v50, %v1713_v38 }
  0xdc   :  { %v1325_v55 = vpack.c.bf16 %v802_v51, %v802_v51  ;;  %v1357_v56 = vpack.c.bf16 %v834_v52, %v834_v52  ;;  %vm672_vm5 = vcmp.ge.f32.partialorder %v418_v47, 0.0  ;;  %v736_v57 = vmul.f32 0.01, %v418_v47  ;;  %v420_v58 = vpop.f32.mrf.mxu0  ;;  %v548_v59 = vpop.f32.mrf.mxu1 }
  0xdd   :  { %vm704_vm6 = vcmp.ge.f32.partialorder %v546_v48, 0.0  ;;  %v768_v60 = vmul.f32 0.01, %v546_v48  ;;  %vm675_vm7 = vcmp.ge.f32.partialorder %v429_v53, 0.0  ;;  %v739_v61 = vmul.f32 0.01, %v429_v53 }
  0xde   :  { %1123 = vst.msk [vmem:[%s2065_s3 + $0x8] sm:$0xf] %vm1120_vm4, %v1325_v55  ;;  %1155 = vst.msk [vmem:[%s2065_s3 + $0x88] sm:$0xf] %vm1120_vm4, %v1357_v56  ;;  %v800_v62 = vsel %vm672_vm5, %v418_v47, %v736_v57  ;;  %vm707_vm8 = vcmp.ge.f32.partialorder %v557_v54, 0.0  ;;  %v421_v0 = vadd.f32 %v1713_v38, %v420_v58  ;;  %v1440_v1 = vpop.f32.mrf.mxu0  ;;  %v1472_v2 = vpop.f32.mrf.mxu1  ;;  %v549_v6 = vadd.f32 %v1713_v38, %v548_v59 }
  0xdf   :  { %v771_v63 = vmul.f32 0.01, %v557_v54  ;;  %v1323_v3 = vpack.c.bf16 %v800_v62, %v800_v62  ;;  %v832_v4 = vsel %vm704_vm6, %v546_v48, %v768_v60  ;;  %v803_v5 = vsel %vm675_vm7, %v429_v53, %v739_v61 }
  0xe0   :  { %v1355_v7 = vpack.c.bf16 %v832_v4, %v832_v4  ;;  %v1326_v8 = vpack.c.bf16 %v803_v5, %v803_v5  ;;  %vm673_vm9 = vcmp.ge.f32.partialorder %v421_v0, 0.0  ;;  %v433_v10 = vpop.f32.mrf.mxu0  ;;  %v561_v11 = vpop.f32.mrf.mxu1  ;;  %v737_v13 = vmul.f32 0.01, %v421_v0 }
  0xe1   :  { %v835_v9 = vsel %vm707_vm8, %v557_v54, %v771_v63  ;;  %1121 = vst.msk [vmem:[%s2065_s3] sm:$0xf] %vm1120_vm4, %v1323_v3  ;;  %vm705_vm10 = vcmp.ge.f32.partialorder %v549_v6, 0.0  ;;  %v769_v14 = vmul.f32 0.01, %v549_v6  ;;  %v442_v15 = vadd.f32 %v1440_v1, %v1713_v38 }
  0xe2   :  { %v1358_v12 = vpack.c.bf16 %v835_v9, %v835_v9  ;;  %1153 = vst.msk [vmem:[%s2065_s3 + $0x80] sm:$0xf] %vm1120_vm4, %v1355_v7  ;;  %1124 = vst.msk [vmem:[%s2065_s3 + $0xc] sm:$0xf] %vm1120_vm4, %v1326_v8  ;;  %v570_v16 = vadd.f32 %v1472_v2, %v1713_v38  ;;  %v434_v17 = vadd.f32 %v1713_v38, %v433_v10  ;;  %v1441_v19 = vpop.f32.mrf.mxu0  ;;  %v1473_v20 = vpop.f32.mrf.mxu1 }
  0xe3   :  { %v562_v18 = vadd.f32 %v1713_v38, %v561_v11  ;;  %v801_v21 = vsel %vm673_vm9, %v421_v0, %v737_v13  ;;  %v833_v22 = vsel %vm705_vm10, %v549_v6, %v769_v14  ;;  %v445_v23 = vadd.f32 %v1441_v19, %v1713_v38 }
  0xe4   :  { %1156 = vst.msk [vmem:[%s2065_s3 + $0x8c] sm:$0xf] %vm1120_vm4, %v1358_v12  ;;  %v573_v24 = vadd.f32 %v1473_v20, %v1713_v38  ;;  %v1324_v25 = vpack.c.bf16 %v801_v21, %v801_v21  ;;  %v1356_v26 = vpack.c.bf16 %v833_v22, %v833_v22  ;;  %vm678_vm11 = vcmp.ge.f32.partialorder %v442_v15, 0.0  ;;  %v436_v28 = vpop.f32.mrf.mxu0  ;;  %v564_v29 = vpop.f32.mrf.mxu1 }
  0xe5   :  { %v742_v27 = vmul.f32 0.01, %v442_v15  ;;  %vm710_vm12 = vcmp.ge.f32.partialorder %v570_v16, 0.0  ;;  %v774_v30 = vmul.f32 0.01, %v570_v16  ;;  %vm676_vm13 = vcmp.ge.f32.partialorder %v434_v17, 0.0 }
  0xe6   :  { %v740_v31 = vmul.f32 0.01, %v434_v17  ;;  %1122 = vst.msk [vmem:[%s2065_s3 + $0x4] sm:$0xf] %vm1120_vm4, %v1324_v25  ;;  %1154 = vst.msk [vmem:[%s2065_s3 + $0x84] sm:$0xf] %vm1120_vm4, %v1356_v26  ;;  %v1444_v34 = vpop.f32.mrf.mxu0  ;;  %v1476_v35 = vpop.f32.mrf.mxu1  ;;  %v437_v49 = vadd.f32 %v1713_v38, %v436_v28  ;;  %v565_v51 = vadd.f32 %v1713_v38, %v564_v29 }
  0xe7   :  { %v806_v32 = vsel %vm678_vm11, %v442_v15, %v742_v27  ;;  %vm708_vm14 = vcmp.ge.f32.partialorder %v562_v18, 0.0  ;;  %v772_v33 = vmul.f32 0.01, %v562_v18  ;;  %vm679_vm15 = vcmp.ge.f32.partialorder %v445_v23, 0.0 }
  0xe8   :  { %v1329_v36 = vpack.c.bf16 %v806_v32, %v806_v32  ;;  %v838_v37 = vsel %vm710_vm12, %v570_v16, %v774_v30  ;;  %v804_v39 = vsel %vm676_vm13, %v434_v17, %v740_v31  ;;  %v743_v40 = vmul.f32 0.01, %v445_v23  ;;  %v449_v44 = vpop.f32.mrf.mxu0  ;;  %v577_v45 = vpop.f32.mrf.mxu1 }
  0xe9   :  { %v1361_v41 = vpack.c.bf16 %v838_v37, %v838_v37  ;;  %v1327_v42 = vpack.c.bf16 %v804_v39, %v804_v39  ;;  %v836_v43 = vsel %vm708_vm14, %v562_v18, %v772_v33  ;;  %vm711_vm0 = vcmp.ge.f32.partialorder %v573_v24, 0.0 }
  0xea   :  { %1127 = vst.msk [vmem:[%s2065_s3 + $0x18] sm:$0xf] %vm1120_vm4, %v1329_v36  ;;  %v1359_v46 = vpack.c.bf16 %v836_v43, %v836_v43  ;;  %v807_v47 = vsel %vm679_vm15, %v445_v23, %v743_v40  ;;  %v775_v48 = vmul.f32 0.01, %v573_v24  ;;  %v458_v52 = vadd.f32 %v1444_v34, %v1713_v38  ;;  %v1445_v54 = vpop.f32.mrf.mxu0  ;;  %v1477_v55 = vpop.f32.mrf.mxu1 }
  0xeb   :  { %1159 = vst.msk [vmem:[%s2065_s3 + $0x98] sm:$0xf] %vm1120_vm4, %v1361_v41  ;;  %1125 = vst.msk [vmem:[%s2065_s3 + $0x10] sm:$0xf] %vm1120_vm4, %v1327_v42  ;;  %v1330_v50 = vpack.c.bf16 %v807_v47, %v807_v47  ;;  %v586_v53 = vadd.f32 %v1476_v35, %v1713_v38  ;;  %vm677_vm1 = vcmp.ge.f32.partialorder %v437_v49, 0.0  ;;  %v450_v58 = vadd.f32 %v1713_v38, %v449_v44 }
  0xec   :  { %1157 = vst.msk [vmem:[%s2065_s3 + $0x90] sm:$0xf] %vm1120_vm4, %v1359_v46  ;;  %v839_v56 = vsel %vm711_vm0, %v573_v24, %v775_v48  ;;  %v741_v57 = vmul.f32 0.01, %v437_v49  ;;  %vm709_vm2 = vcmp.ge.f32.partialorder %v565_v51, 0.0  ;;  %vm682_vm3 = vcmp.ge.f32.partialorder %v458_v52, 0.0  ;;  %v452_v61 = vpop.f32.mrf.mxu0  ;;  %v580_v62 = vpop.f32.mrf.mxu1 }
  0xed   :  { %1128 = vst.msk [vmem:[%s2065_s3 + $0x1c] sm:$0xf] %vm1120_vm4, %v1330_v50  ;;  %v1362_v59 = vpack.c.bf16 %v839_v56, %v839_v56  ;;  %v773_v60 = vmul.f32 0.01, %v565_v51  ;;  %v746_v0 = vmul.f32 0.01, %v458_v52  ;;  %v578_v10 = vadd.f32 %v1713_v38, %v577_v45 }
  0xee   :  { %v805_v63 = vsel %vm677_vm1, %v437_v49, %v741_v57  ;;  %vm714_vm5 = vcmp.ge.f32.partialorder %v586_v53, 0.0  ;;  %v778_v1 = vmul.f32 0.01, %v586_v53  ;;  %vm680_vm6 = vcmp.ge.f32.partialorder %v450_v58, 0.0  ;;  %v1448_v5 = vpop.f32.mrf.mxu0  ;;  %v1480_v6 = vpop.f32.mrf.mxu1 }
  0xef   :  { %1160 = vst.msk [vmem:[%s2065_s3 + $0x9c] sm:$0xf] %vm1120_vm4, %v1362_v59  ;;  %v1328_v2 = vpack.c.bf16 %v805_v63, %v805_v63  ;;  %v837_v3 = vsel %vm709_vm2, %v565_v51, %v773_v60  ;;  %v744_v4 = vmul.f32 0.01, %v450_v58  ;;  %v810_v8 = vsel %vm682_vm3, %v458_v52, %v746_v0 }
  0xf0   :  { %v1360_v7 = vpack.c.bf16 %v837_v3, %v837_v3  ;;  %v842_v9 = vsel %vm714_vm5, %v586_v53, %v778_v1  ;;  %v1333_v11 = vpack.c.bf16 %v810_v8, %v810_v8  ;;  %v461_v14 = vadd.f32 %v1445_v54, %v1713_v38  ;;  %v465_v15 = vpop.f32.mrf.mxu0  ;;  %v593_v16 = vpop.f32.mrf.mxu1 }
  0xf1   :  { %1126 = vst.msk [vmem:[%s2065_s3 + $0x14] sm:$0xf] %vm1120_vm4, %v1328_v2  ;;  %v1365_v12 = vpack.c.bf16 %v842_v9, %v842_v9  ;;  %v808_v13 = vsel %vm680_vm6, %v450_v58, %v744_v4  ;;  %vm712_vm7 = vcmp.ge.f32.partialorder %v578_v10, 0.0  ;;  %v776_v18 = vmul.f32 0.01, %v578_v10 }
  0xf2   :  { %1158 = vst.msk [vmem:[%s2065_s3 + $0x94] sm:$0xf] %vm1120_vm4, %v1360_v7  ;;  %v1331_v17 = vpack.c.bf16 %v808_v13, %v808_v13  ;;  %v589_v19 = vadd.f32 %v1477_v55, %v1713_v38  ;;  %1131 = vst.msk [vmem:[%s2065_s3 + $0x28] sm:$0xf] %vm1120_vm4, %v1333_v11  ;;  %vm683_vm8 = vcmp.ge.f32.partialorder %v461_v14, 0.0  ;;  %v453_v21 = vadd.f32 %v1713_v38, %v452_v61  ;;  %v1449_v23 = vpop.f32.mrf.mxu0  ;;  %v1481_v24 = vpop.f32.mrf.mxu1 }
  0xf3   :  { %1163 = vst.msk [vmem:[%s2065_s3 + $0xa8] sm:$0xf] %vm1120_vm4, %v1365_v12  ;;  %v747_v20 = vmul.f32 0.01, %v461_v14  ;;  %v581_v22 = vadd.f32 %v1713_v38, %v580_v62  ;;  %v840_v25 = vsel %vm712_vm7, %v578_v10, %v776_v18  ;;  %v474_v27 = vadd.f32 %v1448_v5, %v1713_v38 }
  0xf4   :  { %1129 = vst.msk [vmem:[%s2065_s3 + $0x20] sm:$0xf] %vm1120_vm4, %v1331_v17  ;;  %vm715_vm9 = vcmp.ge.f32.partialorder %v589_v19, 0.0  ;;  %v779_v26 = vmul.f32 0.01, %v589_v19  ;;  %v1363_v28 = vpack.c.bf16 %v840_v25, %v840_v25  ;;  %vm681_vm10 = vcmp.ge.f32.partialorder %v453_v21, 0.0  ;;  %v468_v31 = vpop.f32.mrf.mxu0  ;;  %v596_v32 = vpop.f32.mrf.mxu1 }
  0xf5   :  { %v811_v29 = vsel %vm683_vm8, %v461_v14, %v747_v20  ;;  %v745_v30 = vmul.f32 0.01, %v453_v21  ;;  %vm713_vm11 = vcmp.ge.f32.partialorder %v581_v22, 0.0  ;;  %v777_v35 = vmul.f32 0.01, %v581_v22 }
  0xf6   :  { %v1334_v33 = vpack.c.bf16 %v811_v29, %v811_v29  ;;  %v843_v34 = vsel %vm715_vm9, %v589_v19, %v779_v26  ;;  %1161 = vst.msk [vmem:[%s2065_s3 + $0xa0] sm:$0xf] %vm1120_vm4, %v1363_v28  ;;  %vm686_vm12 = vcmp.ge.f32.partialorder %v474_v27, 0.0  ;;  %v750_v39 = vmul.f32 0.01, %v474_v27  ;;  %v1452_v40 = vpop.f32.mrf.mxu0  ;;  %v1484_v41 = vpop.f32.mrf.mxu1 }
  0xf7   :  { %v1366_v36 = vpack.c.bf16 %v843_v34, %v843_v34  ;;  %v809_v37 = vsel %vm681_vm10, %v453_v21, %v745_v30  ;;  %v841_v43 = vsel %vm713_vm11, %v581_v22, %v777_v35  ;;  %v602_v44 = vadd.f32 %v1480_v6, %v1713_v38 }
  0xf8   :  { %1132 = vst.msk [vmem:[%s2065_s3 + $0x2c] sm:$0xf] %vm1120_vm4, %v1334_v33  ;;  %v1332_v42 = vpack.c.bf16 %v809_v37, %v809_v37  ;;  %v466_v45 = vadd.f32 %v1713_v38, %v465_v15  ;;  %v1364_v46 = vpack.c.bf16 %v841_v43, %v841_v43  ;;  %v814_v47 = vsel %vm686_vm12, %v474_v27, %v750_v39  ;;  %v481_v50 = vpop.f32.mrf.mxu0  ;;  %v609_v51 = vpop.f32.mrf.mxu1 }
  0xf9   :  { %1164 = vst.msk [vmem:[%s2065_s3 + $0xac] sm:$0xf] %vm1120_vm4, %v1366_v36  ;;  %v594_v48 = vadd.f32 %v1713_v38, %v593_v16  ;;  %v477_v49 = vadd.f32 %v1449_v23, %v1713_v38  ;;  %v1337_v52 = vpack.c.bf16 %v814_v47, %v814_v47  ;;  %vm718_vm13 = vcmp.ge.f32.partialorder %v602_v44, 0.0 }
  0xfa   :  { %1130 = vst.msk [vmem:[%s2065_s3 + $0x24] sm:$0xf] %vm1120_vm4, %v1332_v42  ;;  %v782_v53 = vmul.f32 0.01, %v602_v44  ;;  %vm684_vm14 = vcmp.ge.f32.partialorder %v466_v45, 0.0  ;;  %v1453_v56 = vpop.f32.mrf.mxu0  ;;  %v1485_v57 = vpop.f32.mrf.mxu1  ;;  %v605_v60 = vadd.f32 %v1481_v24, %v1713_v38  ;;  %v469_v61 = vadd.f32 %v1713_v38, %v468_v31 }
  0xfb   :  { %1162 = vst.msk [vmem:[%s2065_s3 + $0xa4] sm:$0xf] %vm1120_vm4, %v1364_v46  ;;  %v748_v54 = vmul.f32 0.01, %v466_v45  ;;  %vm716_vm15 = vcmp.ge.f32.partialorder %v594_v48, 0.0  ;;  %vm687_vm0 = vcmp.ge.f32.partialorder %v477_v49, 0.0  ;;  %v597_v1 = vadd.f32 %v1713_v38, %v596_v32 }
  0xfc   :  { %v780_v55 = vmul.f32 0.01, %v594_v48  ;;  %1135 = vst.msk [vmem:[%s2065_s3 + $0x38] sm:$0xf] %vm1120_vm4, %v1337_v52  ;;  %v846_v58 = vsel %vm718_vm13, %v602_v44, %v782_v53  ;;  %v751_v59 = vmul.f32 0.01, %v477_v49  ;;  %v1849_v2 = vpop.f32.mrf.mxu0  ;;  %v1851_v3 = vpop.f32.mrf.mxu1  ;;  %v490_v13 = vadd.f32 %v1452_v40, %v1713_v38 }
  0xfd   :  { %v1369_v62 = vpack.c.bf16 %v846_v58, %v846_v58  ;;  %v812_v63 = vsel %vm684_vm14, %v466_v45, %v748_v54  ;;  %vm719_vm1 = vcmp.ge.f32.partialorder %v605_v60, 0.0  ;;  %v783_v8 = vmul.f32 0.01, %v605_v60 }
  0xfe   :  { %v844_v0 = vsel %vm716_vm15, %v594_v48, %v780_v55  ;;  %v1335_v4 = vpack.c.bf16 %v812_v63, %v812_v63  ;;  %v815_v6 = vsel %vm687_vm0, %v477_v49, %v751_v59  ;;  %vm685_vm2 = vcmp.ge.f32.partialorder %v469_v61, 0.0  ;;  %v1456_v10 = vpop.f32.mrf.mxu0  ;;  %v1488_v11 = vpop.f32.mrf.mxu1 }
  0xff   :  { %v1367_v5 = vpack.c.bf16 %v844_v0, %v844_v0  ;;  %1167 = vst.msk [vmem:[%s2065_s3 + $0xb8] sm:$0xf] %vm1120_vm4, %v1369_v62  ;;  %v1338_v7 = vpack.c.bf16 %v815_v6, %v815_v6  ;;  %v749_v9 = vmul.f32 0.01, %v469_v61  ;;  %vm717_vm3 = vcmp.ge.f32.partialorder %v597_v1, 0.0 }
 0x100   :  { %1133 = vst.msk [vmem:[%s2065_s3 + $0x30] sm:$0xf] %vm1120_vm4, %v1335_v4  ;;  %v781_v12 = vmul.f32 0.01, %v597_v1  ;;  %v618_v14 = vadd.f32 %v1484_v41, %v1713_v38  ;;  %v847_v15 = vsel %vm719_vm1, %v605_v60, %v783_v8  ;;  %v482_v17 = vadd.f32 %v1713_v38, %v481_v50  ;;  %v497_v19 = vpop.f32.mrf.mxu0  ;;  %v1874_v20 = vpop.f32.mrf.mxu1 }
 0x101   :  { %1165 = vst.msk [vmem:[%s2065_s3 + $0xb0] sm:$0xf] %vm1120_vm4, %v1367_v5  ;;  %1136 = vst.msk [vmem:[%s2065_s3 + $0x3c] sm:$0xf] %vm1120_vm4, %v1338_v7  ;;  %v813_v16 = vsel %vm685_vm2, %v469_v61, %v749_v9  ;;  %v610_v18 = vadd.f32 %v1713_v38, %v609_v51  ;;  %v1370_v21 = vpack.c.bf16 %v847_v15, %v847_v15  ;;  %vm690_vm5 = vcmp.ge.f32.partialorder %v490_v13, 0.0 }
 0x102   :  { %v1336_v22 = vpack.c.bf16 %v813_v16, %v813_v16  ;;  %v845_v23 = vsel %vm717_vm3, %v597_v1, %v781_v12  ;;  %v754_v25 = vmul.f32 0.01, %v490_v13  ;;  %vm722_vm6 = vcmp.ge.f32.partialorder %v618_v14, 0.0  ;;  %v1876_v27 = vpop.f32.mrf.mxu0  ;;  %v1878_v28 = vpop.f32.mrf.mxu1 }
 0x103   :  { %v1368_v24 = vpack.c.bf16 %v845_v23, %v845_v23  ;;  %v786_v26 = vmul.f32 0.01, %v618_v14  ;;  %1168 = vst.msk [vmem:[%s2065_s3 + $0xbc] sm:$0xf] %vm1120_vm4, %v1370_v21  ;;  %vm688_vm7 = vcmp.ge.f32.partialorder %v482_v17, 0.0  ;;  %vm720_vm8 = vcmp.ge.f32.partialorder %v610_v18, 0.0 }
 0x104   :  { %1134 = vst.msk [vmem:[%s2065_s3 + $0x34] sm:$0xf] %vm1120_vm4, %v1336_v22  ;;  %v752_v29 = vmul.f32 0.01, %v482_v17  ;;  %v784_v30 = vmul.f32 0.01, %v610_v18  ;;  %v818_v31 = vsel %vm690_vm5, %v490_v13, %v754_v25  ;;  %v493_v33 = vadd.f32 %v1453_v56, %v1713_v38  ;;  %v1894_v35 = vpop.f32.mrf.mxu0  ;;  %v1896_v36 = vpop.f32.mrf.mxu1 }
 0x105   :  { %1166 = vst.msk [vmem:[%s2065_s3 + $0xb4] sm:$0xf] %vm1120_vm4, %v1368_v24  ;;  %v850_v32 = vsel %vm722_vm6, %v618_v14, %v786_v26  ;;  %v621_v34 = vadd.f32 %v1485_v57, %v1713_v38  ;;  %v1341_v37 = vpack.c.bf16 %v818_v31, %v818_v31  ;;  %v485_v48 = vadd.f32 %v1713_v38, %v1849_v2 }
 0x106   :  { %v1373_v39 = vpack.c.bf16 %v850_v32, %v850_v32  ;;  %v816_v40 = vsel %vm688_vm7, %v482_v17, %v752_v29  ;;  %v848_v41 = vsel %vm720_vm8, %v610_v18, %v784_v30  ;;  %vm691_vm9 = vcmp.ge.f32.partialorder %v493_v33, 0.0  ;;  %v1460_v45 = vpop.f32.mrf.mxu0  ;;  %v1898_v46 = vpop.f32.mrf.mxu1 }
 0x107   :  { %v1339_v42 = vpack.c.bf16 %v816_v40, %v816_v40  ;;  %v1371_v43 = vpack.c.bf16 %v848_v41, %v848_v41  ;;  %v755_v44 = vmul.f32 0.01, %v493_v33  ;;  %1139 = vst.msk [vmem:[%s2065_s3 + $0x48] sm:$0xf] %vm1120_vm4, %v1341_v37  ;;  %vm723_vm10 = vcmp.ge.f32.partialorder %v621_v34, 0.0 }
 0x108   :  { %1171 = vst.msk [vmem:[%s2065_s3 + $0xc8] sm:$0xf] %vm1120_vm4, %v1373_v39  ;;  %v787_v47 = vmul.f32 0.01, %v621_v34  ;;  %v613_v49 = vadd.f32 %v1713_v38, %v1851_v3  ;;  %v506_v51 = vadd.f32 %v1456_v10, %v1713_v38  ;;  %v634_v52 = vadd.f32 %v1488_v11, %v1713_v38  ;;  %v513_v59 = vpop.f32.mrf.mxu0  ;;  %v641_v60 = vpop.f32.mrf.mxu1 }
 0x109   :  { %1137 = vst.msk [vmem:[%s2065_s3 + $0x40] sm:$0xf] %vm1120_vm4, %v1339_v42  ;;  %1169 = vst.msk [vmem:[%s2065_s3 + $0xc0] sm:$0xf] %vm1120_vm4, %v1371_v43  ;;  %v819_v50 = vsel %vm691_vm9, %v493_v33, %v755_v44  ;;  %v498_v53 = vadd.f32 %v1713_v38, %v497_v19  ;;  %vm689_vm11 = vcmp.ge.f32.partialorder %v485_v48, 0.0  ;;  %v626_v6 = vadd.f32 %v1713_v38, %v1874_v20 }
 0x10a   :  { %v1342_v54 = vpack.c.bf16 %v819_v50, %v819_v50  ;;  %v851_v55 = vsel %vm723_vm10, %v621_v34, %v787_v47  ;;  %v753_v56 = vmul.f32 0.01, %v485_v48  ;;  %vm721_vm12 = vcmp.ge.f32.partialorder %v613_v49, 0.0  ;;  %v1461_v11 = vpop.f32.mrf.mxu0  ;;  %v1493_v12 = vpop.f32.mrf.mxu1 }
 0x10b   :  { %v1374_v57 = vpack.c.bf16 %v851_v55, %v851_v55  ;;  %v785_v58 = vmul.f32 0.01, %v613_v49  ;;  %vm694_vm13 = vcmp.ge.f32.partialorder %v506_v51, 0.0  ;;  %v758_v62 = vmul.f32 0.01, %v506_v51 }
 0x10c   :  { %1140 = vst.msk [vmem:[%s2065_s3 + $0x4c] sm:$0xf] %vm1120_vm4, %v1342_v54  ;;  %v817_v61 = vsel %vm689_vm11, %v485_v48, %v753_v56  ;;  %vm726_vm14 = vcmp.ge.f32.partialorder %v634_v52, 0.0  ;;  %v790_v63 = vmul.f32 0.01, %v634_v52  ;;  %vm692_vm15 = vcmp.ge.f32.partialorder %v498_v53, 0.0  ;;  %v516_v25 = vpop.f32.mrf.mxu0  ;;  %v644_v26 = vpop.f32.mrf.mxu1 }
 0x10d   :  { %1172 = vst.msk [vmem:[%s2065_s3 + $0xcc] sm:$0xf] %vm1120_vm4, %v1374_v57  ;;  %v1340_v0 = vpack.c.bf16 %v817_v61, %v817_v61  ;;  %v849_v1 = vsel %vm721_vm12, %v613_v49, %v785_v58  ;;  %v756_v2 = vmul.f32 0.01, %v498_v53  ;;  %v822_v4 = vsel %vm694_vm13, %v506_v51, %v758_v62 }
 0x10e   :  { %v1372_v3 = vpack.c.bf16 %v849_v1, %v849_v1  ;;  %v854_v5 = vsel %vm726_vm14, %v634_v52, %v790_v63  ;;  %v1345_v7 = vpack.c.bf16 %v822_v4, %v822_v4  ;;  %v509_v10 = vadd.f32 %v1876_v27, %v1713_v38  ;;  %v1464_v42 = vpop.f32.mrf.mxu0  ;;  %v1496_v43 = vpop.f32.mrf.mxu1 }
 0x10f   :  { %1138 = vst.msk [vmem:[%s2065_s3 + $0x44] sm:$0xf] %vm1120_vm4, %v1340_v0  ;;  %v1377_v8 = vpack.c.bf16 %v854_v5, %v854_v5  ;;  %v820_v9 = vsel %vm692_vm15, %v498_v53, %v756_v2  ;;  %vm724_vm0 = vcmp.ge.f32.partialorder %v626_v6, 0.0  ;;  %v788_v14 = vmul.f32 0.01, %v626_v6 }
 0x110   :  { %1170 = vst.msk [vmem:[%s2065_s3 + $0xc4] sm:$0xf] %vm1120_vm4, %v1372_v3  ;;  %v1343_v13 = vpack.c.bf16 %v820_v9, %v820_v9  ;;  %v637_v15 = vadd.f32 %v1878_v28, %v1713_v38  ;;  %1143 = vst.msk [vmem:[%s2065_s3 + $0x58] sm:$0xf] %vm1120_vm4, %v1345_v7  ;;  %vm695_vm1 = vcmp.ge.f32.partialorder %v509_v10, 0.0  ;;  %v501_v17 = vadd.f32 %v1713_v38, %v1894_v35  ;;  %v529_v56 = vpop.f32.mrf.mxu0  ;;  %v657_v57 = vpop.f32.mrf.mxu1 }
 0x111   :  { %1175 = vst.msk [vmem:[%s2065_s3 + $0xd8] sm:$0xf] %vm1120_vm4, %v1377_v8  ;;  %v759_v16 = vmul.f32 0.01, %v509_v10  ;;  %v629_v18 = vadd.f32 %v1713_v38, %v1896_v36  ;;  %v852_v19 = vsel %vm724_vm0, %v626_v6, %v788_v14  ;;  %v522_v21 = vadd.f32 %v1460_v45, %v1713_v38 }
 0x112   :  { %1141 = vst.msk [vmem:[%s2065_s3 + $0x50] sm:$0xf] %vm1120_vm4, %v1343_v13  ;;  %vm727_vm2 = vcmp.ge.f32.partialorder %v637_v15, 0.0  ;;  %v791_v20 = vmul.f32 0.01, %v637_v15  ;;  %v1375_v22 = vpack.c.bf16 %v852_v19, %v852_v19  ;;  %vm693_vm3 = vcmp.ge.f32.partialorder %v501_v17, 0.0  ;;  %v1465_v7 = vpop.f32.mrf.mxu0  ;;  %v1497_v8 = vpop.f32.mrf.mxu1 }
 0x113   :  { %v823_v23 = vsel %vm695_vm1, %v509_v10, %v759_v16  ;;  %v757_v24 = vmul.f32 0.01, %v501_v17  ;;  %vm725_vm5 = vcmp.ge.f32.partialorder %v629_v18, 0.0  ;;  %v789_v29 = vmul.f32 0.01, %v629_v18 }
 0x114   :  { %v1346_v27 = vpack.c.bf16 %v823_v23, %v823_v23  ;;  %v855_v28 = vsel %vm727_vm2, %v637_v15, %v791_v20  ;;  %1173 = vst.msk [vmem:[%s2065_s3 + $0xd0] sm:$0xf] %vm1120_vm4, %v1375_v22  ;;  %vm698_vm6 = vcmp.ge.f32.partialorder %v522_v21, 0.0  ;;  %v762_v32 = vmul.f32 0.01, %v522_v21  ;;  %v660_v22 = vpop.f32.mrf.mxu1 }
 0x115   :  { %v1378_v30 = vpack.c.bf16 %v855_v28, %v855_v28  ;;  %v821_v31 = vsel %vm693_vm3, %v501_v17, %v757_v24  ;;  %v853_v34 = vsel %vm725_vm5, %v629_v18, %v789_v29  ;;  %v650_v35 = vadd.f32 %v1898_v46, %v1713_v38 }
 0x116   :  { %1144 = vst.msk [vmem:[%s2065_s3 + $0x5c] sm:$0xf] %vm1120_vm4, %v1346_v27  ;;  %v1344_v33 = vpack.c.bf16 %v821_v31, %v821_v31  ;;  %v514_v36 = vadd.f32 %v1713_v38, %v513_v59  ;;  %v1376_v37 = vpack.c.bf16 %v853_v34, %v853_v34  ;;  %v826_v39 = vsel %vm698_vm6, %v522_v21, %v762_v32  ;;  %v532_v21 = vpop.f32.mrf.mxu0 }
 0x117   :  { %1176 = vst.msk [vmem:[%s2065_s3 + $0xdc] sm:$0xf] %vm1120_vm4, %v1378_v30  ;;  %v642_v40 = vadd.f32 %v1713_v38, %v641_v60  ;;  %v525_v41 = vadd.f32 %v1461_v11, %v1713_v38  ;;  %v1349_v44 = vpack.c.bf16 %v826_v39, %v826_v39  ;;  %vm730_vm7 = vcmp.ge.f32.partialorder %v650_v35, 0.0 }
 0x118   :  { %1142 = vst.msk [vmem:[%s2065_s3 + $0x54] sm:$0xf] %vm1120_vm4, %v1344_v33  ;;  %v794_v45 = vmul.f32 0.01, %v650_v35  ;;  %vm696_vm8 = vcmp.ge.f32.partialorder %v514_v36, 0.0  ;;  %v653_v50 = vadd.f32 %v1493_v12, %v1713_v38  ;;  %v517_v51 = vadd.f32 %v1713_v38, %v516_v25 }
 0x119   :  { %1174 = vst.msk [vmem:[%s2065_s3 + $0xd4] sm:$0xf] %vm1120_vm4, %v1376_v37  ;;  %v760_v46 = vmul.f32 0.01, %v514_v36  ;;  %vm728_vm9 = vcmp.ge.f32.partialorder %v642_v40, 0.0  ;;  %vm699_vm10 = vcmp.ge.f32.partialorder %v525_v41, 0.0  ;;  %v645_v55 = vadd.f32 %v1713_v38, %v644_v26 }
 0x11a   :  { %v792_v47 = vmul.f32 0.01, %v642_v40  ;;  %1147 = vst.msk [vmem:[%s2065_s3 + $0x68] sm:$0xf] %vm1120_vm4, %v1349_v44  ;;  %v858_v48 = vsel %vm730_vm7, %v650_v35, %v794_v45  ;;  %v763_v49 = vmul.f32 0.01, %v525_v41  ;;  %v538_v1 = vadd.f32 %v1464_v42, %v1713_v38 }
 0x11b   :  { %v1381_v52 = vpack.c.bf16 %v858_v48, %v858_v48  ;;  %v824_v53 = vsel %vm696_vm8, %v514_v36, %v760_v46  ;;  %vm731_vm11 = vcmp.ge.f32.partialorder %v653_v50, 0.0  ;;  %v795_v62 = vmul.f32 0.01, %v653_v50 }
 0x11c   :  { %v856_v54 = vsel %vm728_vm9, %v642_v40, %v792_v47  ;;  %v1347_v58 = vpack.c.bf16 %v824_v53, %v824_v53  ;;  %v827_v60 = vsel %vm699_vm10, %v525_v41, %v763_v49  ;;  %vm697_vm12 = vcmp.ge.f32.partialorder %v517_v51, 0.0 }
 0x11d   :  { %v1379_v59 = vpack.c.bf16 %v856_v54, %v856_v54  ;;  %1179 = vst.msk [vmem:[%s2065_s3 + $0xe8] sm:$0xf] %vm1120_vm4, %v1381_v52  ;;  %v1350_v61 = vpack.c.bf16 %v827_v60, %v827_v60  ;;  %v761_v63 = vmul.f32 0.01, %v517_v51  ;;  %vm729_vm13 = vcmp.ge.f32.partialorder %v645_v55, 0.0 }
 0x11e   :  { %1145 = vst.msk [vmem:[%s2065_s3 + $0x60] sm:$0xf] %vm1120_vm4, %v1347_v58  ;;  %v793_v0 = vmul.f32 0.01, %v645_v55  ;;  %v666_v2 = vadd.f32 %v1496_v43, %v1713_v38  ;;  %v859_v3 = vsel %vm731_vm11, %v653_v50, %v795_v62  ;;  %v530_v5 = vadd.f32 %v1713_v38, %v529_v56 }
 0x11f   :  { %1177 = vst.msk [vmem:[%s2065_s3 + $0xe0] sm:$0xf] %vm1120_vm4, %v1379_v59  ;;  %1148 = vst.msk [vmem:[%s2065_s3 + $0x6c] sm:$0xf] %vm1120_vm4, %v1350_v61  ;;  %v825_v4 = vsel %vm697_vm12, %v517_v51, %v761_v63  ;;  %v658_v6 = vadd.f32 %v1713_v38, %v657_v57  ;;  %v1382_v9 = vpack.c.bf16 %v859_v3, %v859_v3  ;;  %vm702_vm14 = vcmp.ge.f32.partialorder %v538_v1, 0.0 }
 0x120   :  { %v1348_v10 = vpack.c.bf16 %v825_v4, %v825_v4  ;;  %v857_v11 = vsel %vm729_vm13, %v645_v55, %v793_v0  ;;  %v766_v13 = vmul.f32 0.01, %v538_v1  ;;  %vm734_vm15 = vcmp.ge.f32.partialorder %v666_v2, 0.0 }
 0x121   :  { %v1380_v12 = vpack.c.bf16 %v857_v11, %v857_v11  ;;  %v798_v14 = vmul.f32 0.01, %v666_v2  ;;  %1180 = vst.msk [vmem:[%s2065_s3 + $0xec] sm:$0xf] %vm1120_vm4, %v1382_v9  ;;  %vm700_vm0 = vcmp.ge.f32.partialorder %v530_v5, 0.0  ;;  %vm732_vm1 = vcmp.ge.f32.partialorder %v658_v6, 0.0 }
 0x122   :  { %1146 = vst.msk [vmem:[%s2065_s3 + $0x64] sm:$0xf] %vm1120_vm4, %v1348_v10  ;;  %v764_v15 = vmul.f32 0.01, %v530_v5  ;;  %v796_v16 = vmul.f32 0.01, %v658_v6  ;;  %v830_v17 = vsel %vm702_vm14, %v538_v1, %v766_v13  ;;  %v541_v19 = vadd.f32 %v1465_v7, %v1713_v38 }
 0x123   :  { %1178 = vst.msk [vmem:[%s2065_s3 + $0xe4] sm:$0xf] %vm1120_vm4, %v1380_v12  ;;  %v862_v18 = vsel %vm734_vm15, %v666_v2, %v798_v14  ;;  %v669_v20 = vadd.f32 %v1497_v8, %v1713_v38  ;;  %v1353_v23 = vpack.c.bf16 %v830_v17, %v830_v17  ;;  %v533_v31 = vadd.f32 %v1713_v38, %v532_v21 }
 0x124   :  { %v1385_v24 = vpack.c.bf16 %v862_v18, %v862_v18  ;;  %v828_v25 = vsel %vm700_vm0, %v530_v5, %v764_v15  ;;  %v860_v26 = vsel %vm732_vm1, %v658_v6, %v796_v16  ;;  %vm703_vm2 = vcmp.ge.f32.partialorder %v541_v19, 0.0 }
 0x125   :  { %v1351_v27 = vpack.c.bf16 %v828_v25, %v828_v25  ;;  %v1383_v28 = vpack.c.bf16 %v860_v26, %v860_v26  ;;  %v767_v29 = vmul.f32 0.01, %v541_v19  ;;  %1151 = vst.msk [vmem:[%s2065_s3 + $0x78] sm:$0xf] %vm1120_vm4, %v1353_v23  ;;  %vm735_vm3 = vcmp.ge.f32.partialorder %v669_v20, 0.0 }
 0x126   :  { %1183 = vst.msk [vmem:[%s2065_s3 + $0xf8] sm:$0xf] %vm1120_vm4, %v1385_v24  ;;  %v799_v30 = vmul.f32 0.01, %v669_v20  ;;  %v661_v32 = vadd.f32 %v1713_v38, %v660_v22  ;;  %vm701_vm5 = vcmp.ge.f32.partialorder %v533_v31, 0.0 }
 0x127   :  { %1149 = vst.msk [vmem:[%s2065_s3 + $0x70] sm:$0xf] %vm1120_vm4, %v1351_v27  ;;  %1181 = vst.msk [vmem:[%s2065_s3 + $0xf0] sm:$0xf] %vm1120_vm4, %v1383_v28  ;;  %v831_v33 = vsel %vm703_vm2, %v541_v19, %v767_v29  ;;  %v765_v36 = vmul.f32 0.01, %v533_v31 }
 0x128   :  { %v1354_v34 = vpack.c.bf16 %v831_v33, %v831_v33  ;;  %v863_v35 = vsel %vm735_vm3, %v669_v20, %v799_v30  ;;  %vm733_vm6 = vcmp.ge.f32.partialorder %v661_v32, 0.0  ;;  %v797_v39 = vmul.f32 0.01, %v661_v32 }
 0x129   :  { %v1386_v37 = vpack.c.bf16 %v863_v35, %v863_v35  ;;  %v829_v38 = vsel %vm701_vm5, %v533_v31, %v765_v36 }
 0x12a   :  { %1152 = vst.msk [vmem:[%s2065_s3 + $0x7c] sm:$0xf] %vm1120_vm4, %v1354_v34  ;;  %v1352_v40 = vpack.c.bf16 %v829_v38, %v829_v38  ;;  %v861_v41 = vsel %vm733_vm6, %v661_v32, %v797_v39 }
 0x12b   :  { %1184 = vst.msk [vmem:[%s2065_s3 + $0xfc] sm:$0xf] %vm1120_vm4, %v1386_v37  ;;  %v1384_v42 = vpack.c.bf16 %v861_v41, %v861_v41 }
 0x12c   :  { %1150 = vst.msk [vmem:[%s2065_s3 + $0x74] sm:$0xf] %vm1120_vm4, %v1352_v40 }
 0x12d   :  { %1182 = vst.msk [vmem:[%s2065_s3 + $0xf4] sm:$0xf] %vm1120_vm4, %v1384_v42 }

// kernel: resnet_encoder_forward.14
= control target key start
LH: loop header
LB: loop body
LE: loop exit
PB: predicated region body
PF: predicated region fallthrough
CT: control target
= control target key end

     0   :  { %v555_v0 = vmov 0   ;;  %vm182_vm0 = vcmask 130048   ;;  %vm416_vm3 = vcmask 125952   ;;  %s744_s1 = inlined_call_operand.vmem [shape: bf16[144,16], index: 1, kind: input, shape index: {}]   ;;  %s745_s0 = inlined_call_operand.vmem [shape: bf16[128,144], index: 0, kind: input, shape index: {}]   ;;  %s746_s2 = inlined_call_operand.vmem [shape: f32[1,16], index: 2, kind: input, shape index: {}]   ;;  %s747_s3 = inlined_call_operand.vmem [shape: bf16[128,16], index: 3, kind: output, shape index: {}]  }
   0x1   :  { %207 = vmatprep.subr.bf16.mxu0 %v555_v0  ;;  %503 = vmatprep.subr.bf16.mxu1 %v555_v0  ;;  %v522_v1 = vld [vmem:[%s744_s1 + $0x38] sm:$0xff]   ;;  %v523_v2 = vld [vmem:[%s744_s1 + $0x30] sm:$0xff]   ;;  %v524_v3 = vld [vmem:[%s744_s1 + $0x28] sm:$0xff]  }
   0x2   :  { %208 = vmatpush1.bf16.msra.mxu0 %v522_v1  ;;  %512 = vmatpush1.bf16.msra.mxu1 %v522_v1  ;;  %v525_v4 = vld [vmem:[%s744_s1 + $0x20] sm:$0xff]   ;;  %v526_v7 = vld [vmem:[%s744_s1 + $0x18] sm:$0xff]   ;;  %v527_v8 = vld [vmem:[%s744_s1 + $0x10] sm:$0xff]  }
   0x3   :  { %209 = vmatprep.subr.bf16.mxu0 %v555_v0  ;;  %504 = vmatprep.subr.bf16.mxu1 %v555_v0  ;;  %v533_v5 = vld [vmem:[%s745_s0 + $0x4] ss:$8 sps:$4 sm:$0xff]   ;;  %v531_v12 = vld [vmem:[%s745_s0] ss:$8 sps:$4 sm:$0xff]   ;;  %v537_v14 = vld [vmem:[%s745_s0 + $0x14] ss:$8 sps:$4 sm:$0xff]  }
   0x4   :  { %v536_v6 = vld [vmem:[%s745_s0 + $0x44] ss:$8 sps:$4 sm:$0xff]   ;;  %463 = vmatprep.mubr.msk.bf16.mxu0 %vm182_vm0, %v533_v5  ;;  %v534_v13 = vld [vmem:[%s745_s0 + $0x40] ss:$8 sps:$4 sm:$0xff]   ;;  %v539_v15 = vld [vmem:[%s745_s0 + $0x54] ss:$8 sps:$4 sm:$0xff]  }
   0x5   :  { %467 = vmatprep.mubr.msk.bf16.mxu1 %vm182_vm0, %v536_v6  ;;  %v528_v9 = vld [vmem:[%s744_s1 + $0x8] sm:$0xff]   ;;  %v529_v10 = vld [vmem:[%s744_s1] sm:$0xff]   ;;  %v541_v16 = vld [vmem:[%s745_s0 + $0x10] ss:$8 sps:$4 sm:$0xff]  }
   0x6   :  { %210 = vmatpush1.bf16.msra.mxu0 %v523_v2  ;;  %513 = vmatpush1.bf16.msra.mxu1 %v523_v2  ;;  %v530_v11 = vld [vmem:[%s744_s1 + $0x40] sm:$0xff]   ;;  %v542_v17 = vld [vmem:[%s745_s0 + $0x50] ss:$8 sps:$4 sm:$0xff]   ;;  %v549_v22 = vld [vmem:[%s745_s0 + $0x34] ss:$8 sps:$4 sm:$0xff]  }
   0x7   :  { %211 = vmatprep.subr.bf16.mxu0 %v555_v0  ;;  %505 = vmatprep.subr.bf16.mxu1 %v555_v0  ;;  %v543_v18 = vld [vmem:[%s745_s0 + $0x24] ss:$8 sps:$4 sm:$0xff]   ;;  %v547_v20 = vld [vmem:[%s745_s0 + $0x20] ss:$8 sps:$4 sm:$0xff]   ;;  %v551_v23 = vld [vmem:[%s745_s0 + $0x74] ss:$8 sps:$4 sm:$0xff]  }
   0x8   :  { %v545_v19 = vld [vmem:[%s745_s0 + $0x64] ss:$8 sps:$4 sm:$0xff]   ;;  %v548_v21 = vld [vmem:[%s745_s0 + $0x60] ss:$8 sps:$4 sm:$0xff]   ;;  %v553_v24 = vld [vmem:[%s745_s0 + $0x30] ss:$8 sps:$4 sm:$0xff]  }
   0x9   :  { %v554_v25 = vld [vmem:[%s745_s0 + $0x70] ss:$8 sps:$4 sm:$0xff]   ;;  %v662_v26 = vld [vmem:[%s746_s2] ss:$0 sm:$0xff] }
   0xa   :  { %212 = vmatpush1.bf16.msra.mxu0 %v524_v3  ;;  %514 = vmatpush1.bf16.msra.mxu1 %v524_v3 }
   0xb   :  { %213 = vmatprep.subr.bf16.mxu0 %v555_v0  ;;  %506 = vmatprep.subr.bf16.mxu1 %v555_v0 }
   0xe   :  { %214 = vmatpush1.bf16.msra.mxu0 %v525_v4  ;;  %515 = vmatpush1.bf16.msra.mxu1 %v525_v4 }
   0xf   :  { %215 = vmatprep.subr.bf16.mxu0 %v555_v0  ;;  %507 = vmatprep.subr.bf16.mxu1 %v555_v0 }
  0x12   :  { %216 = vmatpush1.bf16.msra.mxu0 %v526_v7  ;;  %516 = vmatpush1.bf16.msra.mxu1 %v526_v7 }
  0x13   :  { %217 = vmatprep.subr.bf16.mxu0 %v555_v0  ;;  %508 = vmatprep.subr.bf16.mxu1 %v555_v0 }
  0x16   :  { %218 = vmatpush1.bf16.msra.mxu0 %v527_v8  ;;  %517 = vmatpush1.bf16.msra.mxu1 %v527_v8 }
  0x17   :  { %219 = vmatprep.subr.bf16.mxu0 %v555_v0  ;;  %509 = vmatprep.subr.bf16.mxu1 %v555_v0 }
  0x1a   :  { %220 = vmatpush1.bf16.msra.mxu0 %v528_v9  ;;  %518 = vmatpush1.bf16.msra.mxu1 %v528_v9 }
  0x1b   :  { %221 = vmatprep.subr.bf16.mxu0 %v555_v0  ;;  %510 = vmatprep.subr.bf16.mxu1 %v555_v0 }
  0x1e   :  { %222 = vmatpush1.bf16.msra.mxu0 %v529_v10  ;;  %519 = vmatpush1.bf16.msra.mxu1 %v529_v10 }
  0x1f   :  { %237 = vmatprep.subr.bf16.mxu0 %v555_v0  ;;  %511 = vmatprep.subr.bf16.mxu1 %v555_v0 }
  0x22   :  { %238 = vmatpush2.bf16.msra.mxu0 %v530_v11  ;;  %520 = vmatpush2.bf16.msra.mxu1 %v530_v11 }
  0x25   :  { %240 = vmatmul.mubr.bf16.vlgmr.msra.gmra.mxu0 %v531_v12  ;;  %272 = vmatmul.mubr.bf16.vlgmr.msra.gmra.mxu1 %v534_v13 }
  0x26   :  { %464 = vmatprep.mubr.msk.bf16.mxu0 %vm182_vm0, %v537_v14  ;;  %468 = vmatprep.mubr.msk.bf16.mxu1 %vm182_vm0, %v539_v15 }
  0x2d   :  { %248 = vmatmul.mubr.bf16.gmra.mxu0 %v541_v16  ;;  %280 = vmatmul.mubr.bf16.gmra.mxu1 %v542_v17 }
  0x2e   :  { %465 = vmatprep.mubr.msk.bf16.mxu0 %vm182_vm0, %v543_v18  ;;  %469 = vmatprep.mubr.msk.bf16.mxu1 %vm182_vm0, %v545_v19 }
  0x35   :  { %256 = vmatmul.mubr.bf16.gmra.mxu0 %v547_v20  ;;  %288 = vmatmul.mubr.bf16.gmra.mxu1 %v548_v21 }
  0x36   :  { %466 = vmatprep.mubr.msk.bf16.mxu0 %vm182_vm0, %v549_v22  ;;  %470 = vmatprep.mubr.msk.bf16.mxu1 %vm182_vm0, %v551_v23 }
  0x3d   :  { %264 = vmatmul.mubr.bf16.gmra.mxu0 %v553_v24  ;;  %296 = vmatmul.mubr.bf16.gmra.mxu1 %v554_v25 }
  0xe5   :  { %v241_v27 = vpop.f32.mrf.mxu0  ;;  %v273_v28 = vpop.f32.mrf.mxu1 }
  0xe6   :  { %v242_v29 = vadd.f32 %v662_v26, %v241_v27  ;;  %v274_v30 = vadd.f32 %v662_v26, %v273_v28 }
  0xe7   :  { %v243_v31 = vpop.f32.mrf.mxu0  ;;  %v275_v32 = vpop.f32.mrf.mxu1 }
  0xe8   :  { %vm304_vm1 = vcmp.ge.f32.partialorder %v242_v29, 0.0  ;;  %v320_v33 = vmul.f32 0.01, %v242_v29  ;;  %vm312_vm2 = vcmp.ge.f32.partialorder %v274_v30, 0.0  ;;  %v328_v34 = vmul.f32 0.01, %v274_v30 }
  0xe9   :  { %v244_v35 = vpop.f32.mrf.mxu0  ;;  %v276_v36 = vpop.f32.mrf.mxu1 }
  0xea   :  { %v336_v37 = vsel %vm304_vm1, %v242_v29, %v320_v33  ;;  %v344_v38 = vsel %vm312_vm2, %v274_v30, %v328_v34  ;;  %v245_v39 = vadd.f32 %v662_v26, %v244_v35  ;;  %v277_v40 = vadd.f32 %v662_v26, %v276_v36 }
  0xeb   :  { %v487_v41 = vpack.c.bf16 %v336_v37, %v336_v37  ;;  %v495_v42 = vpack.c.bf16 %v344_v38, %v344_v38  ;;  %v246_v43 = vpop.f32.mrf.mxu0  ;;  %v278_v44 = vpop.f32.mrf.mxu1 }
  0xec   :  { %vm305_vm4 = vcmp.ge.f32.partialorder %v245_v39, 0.0  ;;  %v321_v45 = vmul.f32 0.01, %v245_v39  ;;  %vm313_vm5 = vcmp.ge.f32.partialorder %v277_v40, 0.0  ;;  %v329_v46 = vmul.f32 0.01, %v277_v40 }
  0xed   :  { %417 = vst.msk [vmem:[%s747_s3] sm:$0xf] %vm416_vm3, %v487_v41  ;;  %425 = vst.msk [vmem:[%s747_s3 + $0x20] sm:$0xf] %vm416_vm3, %v495_v42  ;;  %v249_v47 = vpop.f32.mrf.mxu0  ;;  %v281_v48 = vpop.f32.mrf.mxu1 }
  0xee   :  { %v337_v49 = vsel %vm305_vm4, %v245_v39, %v321_v45  ;;  %v345_v50 = vsel %vm313_vm5, %v277_v40, %v329_v46  ;;  %v250_v51 = vadd.f32 %v662_v26, %v249_v47  ;;  %v282_v52 = vadd.f32 %v662_v26, %v281_v48 }
  0xef   :  { %v488_v53 = vpack.c.bf16 %v337_v49, %v337_v49  ;;  %v496_v54 = vpack.c.bf16 %v345_v50, %v345_v50  ;;  %v251_v55 = vpop.f32.mrf.mxu0  ;;  %v283_v56 = vpop.f32.mrf.mxu1 }
  0xf0   :  { %vm306_vm6 = vcmp.ge.f32.partialorder %v250_v51, 0.0  ;;  %v322_v57 = vmul.f32 0.01, %v250_v51  ;;  %vm314_vm7 = vcmp.ge.f32.partialorder %v282_v52, 0.0  ;;  %v330_v58 = vmul.f32 0.01, %v282_v52 }
  0xf1   :  { %418 = vst.msk [vmem:[%s747_s3 + $0x4] sm:$0xf] %vm416_vm3, %v488_v53  ;;  %426 = vst.msk [vmem:[%s747_s3 + $0x24] sm:$0xf] %vm416_vm3, %v496_v54  ;;  %v252_v59 = vpop.f32.mrf.mxu0  ;;  %v284_v60 = vpop.f32.mrf.mxu1 }
  0xf2   :  { %v338_v61 = vsel %vm306_vm6, %v250_v51, %v322_v57  ;;  %v346_v62 = vsel %vm314_vm7, %v282_v52, %v330_v58  ;;  %v253_v63 = vadd.f32 %v662_v26, %v252_v59  ;;  %v285_v0 = vadd.f32 %v662_v26, %v284_v60 }
  0xf3   :  { %v489_v1 = vpack.c.bf16 %v338_v61, %v338_v61  ;;  %v497_v2 = vpack.c.bf16 %v346_v62, %v346_v62  ;;  %v254_v3 = vpop.f32.mrf.mxu0  ;;  %v286_v4 = vpop.f32.mrf.mxu1 }
  0xf4   :  { %vm307_vm8 = vcmp.ge.f32.partialorder %v253_v63, 0.0  ;;  %v323_v5 = vmul.f32 0.01, %v253_v63  ;;  %vm315_vm9 = vcmp.ge.f32.partialorder %v285_v0, 0.0  ;;  %v331_v6 = vmul.f32 0.01, %v285_v0 }
  0xf5   :  { %419 = vst.msk [vmem:[%s747_s3 + $0x8] sm:$0xf] %vm416_vm3, %v489_v1  ;;  %427 = vst.msk [vmem:[%s747_s3 + $0x28] sm:$0xf] %vm416_vm3, %v497_v2  ;;  %v257_v7 = vpop.f32.mrf.mxu0  ;;  %v289_v8 = vpop.f32.mrf.mxu1 }
  0xf6   :  { %v339_v9 = vsel %vm307_vm8, %v253_v63, %v323_v5  ;;  %v347_v10 = vsel %vm315_vm9, %v285_v0, %v331_v6  ;;  %v258_v11 = vadd.f32 %v662_v26, %v257_v7  ;;  %v290_v12 = vadd.f32 %v662_v26, %v289_v8 }
  0xf7   :  { %v490_v13 = vpack.c.bf16 %v339_v9, %v339_v9  ;;  %v498_v14 = vpack.c.bf16 %v347_v10, %v347_v10  ;;  %v259_v15 = vpop.f32.mrf.mxu0  ;;  %v291_v16 = vpop.f32.mrf.mxu1 }
  0xf8   :  { %vm308_vm10 = vcmp.ge.f32.partialorder %v258_v11, 0.0  ;;  %v324_v17 = vmul.f32 0.01, %v258_v11  ;;  %vm316_vm11 = vcmp.ge.f32.partialorder %v290_v12, 0.0  ;;  %v332_v18 = vmul.f32 0.01, %v290_v12 }
  0xf9   :  { %420 = vst.msk [vmem:[%s747_s3 + $0xc] sm:$0xf] %vm416_vm3, %v490_v13  ;;  %428 = vst.msk [vmem:[%s747_s3 + $0x2c] sm:$0xf] %vm416_vm3, %v498_v14  ;;  %v260_v19 = vpop.f32.mrf.mxu0  ;;  %v292_v20 = vpop.f32.mrf.mxu1 }
  0xfa   :  { %v340_v21 = vsel %vm308_vm10, %v258_v11, %v324_v17  ;;  %v348_v22 = vsel %vm316_vm11, %v290_v12, %v332_v18  ;;  %v261_v23 = vadd.f32 %v662_v26, %v260_v19  ;;  %v293_v24 = vadd.f32 %v662_v26, %v292_v20 }
  0xfb   :  { %v491_v25 = vpack.c.bf16 %v340_v21, %v340_v21  ;;  %v499_v27 = vpack.c.bf16 %v348_v22, %v348_v22  ;;  %v262_v28 = vpop.f32.mrf.mxu0  ;;  %v294_v29 = vpop.f32.mrf.mxu1 }
  0xfc   :  { %vm309_vm12 = vcmp.ge.f32.partialorder %v261_v23, 0.0  ;;  %v325_v30 = vmul.f32 0.01, %v261_v23  ;;  %vm317_vm13 = vcmp.ge.f32.partialorder %v293_v24, 0.0  ;;  %v333_v31 = vmul.f32 0.01, %v293_v24 }
  0xfd   :  { %421 = vst.msk [vmem:[%s747_s3 + $0x10] sm:$0xf] %vm416_vm3, %v491_v25  ;;  %429 = vst.msk [vmem:[%s747_s3 + $0x30] sm:$0xf] %vm416_vm3, %v499_v27  ;;  %v265_v32 = vpop.f32.mrf.mxu0  ;;  %v297_v33 = vpop.f32.mrf.mxu1 }
  0xfe   :  { %v341_v34 = vsel %vm309_vm12, %v261_v23, %v325_v30  ;;  %v349_v35 = vsel %vm317_vm13, %v293_v24, %v333_v31  ;;  %v266_v36 = vadd.f32 %v662_v26, %v265_v32  ;;  %v298_v37 = vadd.f32 %v662_v26, %v297_v33 }
  0xff   :  { %v492_v38 = vpack.c.bf16 %v341_v34, %v341_v34  ;;  %v500_v39 = vpack.c.bf16 %v349_v35, %v349_v35  ;;  %v267_v40 = vpop.f32.mrf.mxu0  ;;  %v299_v41 = vpop.f32.mrf.mxu1 }
 0x100   :  { %vm310_vm14 = vcmp.ge.f32.partialorder %v266_v36, 0.0  ;;  %v326_v42 = vmul.f32 0.01, %v266_v36  ;;  %vm318_vm15 = vcmp.ge.f32.partialorder %v298_v37, 0.0  ;;  %v334_v43 = vmul.f32 0.01, %v298_v37 }
 0x101   :  { %422 = vst.msk [vmem:[%s747_s3 + $0x14] sm:$0xf] %vm416_vm3, %v492_v38  ;;  %430 = vst.msk [vmem:[%s747_s3 + $0x34] sm:$0xf] %vm416_vm3, %v500_v39  ;;  %v268_v44 = vpop.f32.mrf.mxu0  ;;  %v300_v45 = vpop.f32.mrf.mxu1 }
 0x102   :  { %v342_v46 = vsel %vm310_vm14, %v266_v36, %v326_v42  ;;  %v350_v47 = vsel %vm318_vm15, %v298_v37, %v334_v43  ;;  %v269_v48 = vadd.f32 %v662_v26, %v268_v44  ;;  %v301_v49 = vadd.f32 %v662_v26, %v300_v45 }
 0x103   :  { %v493_v50 = vpack.c.bf16 %v342_v46, %v342_v46  ;;  %v501_v51 = vpack.c.bf16 %v350_v47, %v350_v47  ;;  %v270_v52 = vpop.f32.mrf.mxu0  ;;  %v302_v53 = vpop.f32.mrf.mxu1 }
 0x104   :  { %vm311_vm0 = vcmp.ge.f32.partialorder %v269_v48, 0.0  ;;  %v327_v54 = vmul.f32 0.01, %v269_v48  ;;  %vm319_vm1 = vcmp.ge.f32.partialorder %v301_v49, 0.0  ;;  %v335_v55 = vmul.f32 0.01, %v301_v49 }
 0x105   :  { %423 = vst.msk [vmem:[%s747_s3 + $0x18] sm:$0xf] %vm416_vm3, %v493_v50  ;;  %431 = vst.msk [vmem:[%s747_s3 + $0x38] sm:$0xf] %vm416_vm3, %v501_v51 }
 0x106   :  { %v343_v56 = vsel %vm311_vm0, %v269_v48, %v327_v54  ;;  %v351_v26 = vsel %vm319_vm1, %v301_v49, %v335_v55 }
 0x107   :  { %v494_v57 = vpack.c.bf16 %v343_v56, %v343_v56  ;;  %v502_v58 = vpack.c.bf16 %v351_v26, %v351_v26 }
 0x109   :  { %424 = vst.msk [vmem:[%s747_s3 + $0x1c] sm:$0xf] %vm416_vm3, %v494_v57  ;;  %432 = vst.msk [vmem:[%s747_s3 + $0x3c] sm:$0xf] %vm416_vm3, %v502_v58 }

// kernel: resnet_encoder_forward.15
= control target key start
LH: loop header
LB: loop body
LE: loop exit
PB: predicated region body
PF: predicated region fallthrough
CT: control target
= control target key end

     0   :  { %v507_v0 = vmov 0   ;;  %vm182_vm0 = vcmask 130048   ;;  %vm368_vm1 = vcmask 125952   ;;  %s696_s1 = inlined_call_operand.vmem [shape: bf16[144,16], index: 1, kind: input, shape index: {}]   ;;  %s697_s0 = inlined_call_operand.vmem [shape: bf16[128,144], index: 0, kind: input, shape index: {}]   ;;  %s698_s2 = inlined_call_operand.vmem [shape: f32[1,16], index: 2, kind: input, shape index: {}]   ;;  %s699_s3 = inlined_call_operand.vmem [shape: bf16[128,16], index: 3, kind: output, shape index: {}]  }
   0x1   :  { %207 = vmatprep.subr.bf16.mxu0 %v507_v0  ;;  %455 = vmatprep.subr.bf16.mxu1 %v507_v0  ;;  %v474_v1 = vld [vmem:[%s696_s1 + $0x38] sm:$0xff]   ;;  %v475_v2 = vld [vmem:[%s696_s1 + $0x30] sm:$0xff]   ;;  %v476_v3 = vld [vmem:[%s696_s1 + $0x28] sm:$0xff]  }
   0x2   :  { %208 = vmatpush1.bf16.msra.mxu0 %v474_v1  ;;  %464 = vmatpush1.bf16.msra.mxu1 %v474_v1  ;;  %v477_v4 = vld [vmem:[%s696_s1 + $0x20] sm:$0xff]   ;;  %v478_v7 = vld [vmem:[%s696_s1 + $0x18] sm:$0xff]   ;;  %v479_v8 = vld [vmem:[%s696_s1 + $0x10] sm:$0xff]  }
   0x3   :  { %209 = vmatprep.subr.bf16.mxu0 %v507_v0  ;;  %456 = vmatprep.subr.bf16.mxu1 %v507_v0  ;;  %v485_v5 = vld [vmem:[%s697_s0 + $0x4] ss:$8 sps:$4 sm:$0xff]   ;;  %v483_v12 = vld [vmem:[%s697_s0] ss:$8 sps:$4 sm:$0xff]   ;;  %v489_v14 = vld [vmem:[%s697_s0 + $0x14] ss:$8 sps:$4 sm:$0xff]  }
   0x4   :  { %v488_v6 = vld [vmem:[%s697_s0 + $0x44] ss:$8 sps:$4 sm:$0xff]   ;;  %415 = vmatprep.mubr.msk.bf16.mxu0 %vm182_vm0, %v485_v5  ;;  %v486_v13 = vld [vmem:[%s697_s0 + $0x40] ss:$8 sps:$4 sm:$0xff]   ;;  %v491_v15 = vld [vmem:[%s697_s0 + $0x54] ss:$8 sps:$4 sm:$0xff]  }
   0x5   :  { %419 = vmatprep.mubr.msk.bf16.mxu1 %vm182_vm0, %v488_v6  ;;  %v480_v9 = vld [vmem:[%s696_s1 + $0x8] sm:$0xff]   ;;  %v481_v10 = vld [vmem:[%s696_s1] sm:$0xff]   ;;  %v493_v16 = vld [vmem:[%s697_s0 + $0x10] ss:$8 sps:$4 sm:$0xff]  }
   0x6   :  { %210 = vmatpush1.bf16.msra.mxu0 %v475_v2  ;;  %465 = vmatpush1.bf16.msra.mxu1 %v475_v2  ;;  %v482_v11 = vld [vmem:[%s696_s1 + $0x40] sm:$0xff]   ;;  %v494_v17 = vld [vmem:[%s697_s0 + $0x50] ss:$8 sps:$4 sm:$0xff]   ;;  %v501_v22 = vld [vmem:[%s697_s0 + $0x34] ss:$8 sps:$4 sm:$0xff]  }
   0x7   :  { %211 = vmatprep.subr.bf16.mxu0 %v507_v0  ;;  %457 = vmatprep.subr.bf16.mxu1 %v507_v0  ;;  %v495_v18 = vld [vmem:[%s697_s0 + $0x24] ss:$8 sps:$4 sm:$0xff]   ;;  %v499_v20 = vld [vmem:[%s697_s0 + $0x20] ss:$8 sps:$4 sm:$0xff]   ;;  %v503_v23 = vld [vmem:[%s697_s0 + $0x74] ss:$8 sps:$4 sm:$0xff]  }
   0x8   :  { %v497_v19 = vld [vmem:[%s697_s0 + $0x64] ss:$8 sps:$4 sm:$0xff]   ;;  %v500_v21 = vld [vmem:[%s697_s0 + $0x60] ss:$8 sps:$4 sm:$0xff]   ;;  %v505_v24 = vld [vmem:[%s697_s0 + $0x30] ss:$8 sps:$4 sm:$0xff]  }
   0x9   :  { %v506_v25 = vld [vmem:[%s697_s0 + $0x70] ss:$8 sps:$4 sm:$0xff]   ;;  %v614_v26 = vld [vmem:[%s698_s2] ss:$0 sm:$0xff] }
   0xa   :  { %212 = vmatpush1.bf16.msra.mxu0 %v476_v3  ;;  %466 = vmatpush1.bf16.msra.mxu1 %v476_v3 }
   0xb   :  { %213 = vmatprep.subr.bf16.mxu0 %v507_v0  ;;  %458 = vmatprep.subr.bf16.mxu1 %v507_v0 }
   0xe   :  { %214 = vmatpush1.bf16.msra.mxu0 %v477_v4  ;;  %467 = vmatpush1.bf16.msra.mxu1 %v477_v4 }
   0xf   :  { %215 = vmatprep.subr.bf16.mxu0 %v507_v0  ;;  %459 = vmatprep.subr.bf16.mxu1 %v507_v0 }
  0x12   :  { %216 = vmatpush1.bf16.msra.mxu0 %v478_v7  ;;  %468 = vmatpush1.bf16.msra.mxu1 %v478_v7 }
  0x13   :  { %217 = vmatprep.subr.bf16.mxu0 %v507_v0  ;;  %460 = vmatprep.subr.bf16.mxu1 %v507_v0 }
  0x16   :  { %218 = vmatpush1.bf16.msra.mxu0 %v479_v8  ;;  %469 = vmatpush1.bf16.msra.mxu1 %v479_v8 }
  0x17   :  { %219 = vmatprep.subr.bf16.mxu0 %v507_v0  ;;  %461 = vmatprep.subr.bf16.mxu1 %v507_v0 }
  0x1a   :  { %220 = vmatpush1.bf16.msra.mxu0 %v480_v9  ;;  %470 = vmatpush1.bf16.msra.mxu1 %v480_v9 }
  0x1b   :  { %221 = vmatprep.subr.bf16.mxu0 %v507_v0  ;;  %462 = vmatprep.subr.bf16.mxu1 %v507_v0 }
  0x1e   :  { %222 = vmatpush1.bf16.msra.mxu0 %v481_v10  ;;  %471 = vmatpush1.bf16.msra.mxu1 %v481_v10 }
  0x1f   :  { %237 = vmatprep.subr.bf16.mxu0 %v507_v0  ;;  %463 = vmatprep.subr.bf16.mxu1 %v507_v0 }
  0x22   :  { %238 = vmatpush2.bf16.msra.mxu0 %v482_v11  ;;  %472 = vmatpush2.bf16.msra.mxu1 %v482_v11 }
  0x25   :  { %240 = vmatmul.mubr.bf16.vlgmr.msra.gmra.mxu0 %v483_v12  ;;  %272 = vmatmul.mubr.bf16.vlgmr.msra.gmra.mxu1 %v486_v13 }
  0x26   :  { %416 = vmatprep.mubr.msk.bf16.mxu0 %vm182_vm0, %v489_v14  ;;  %420 = vmatprep.mubr.msk.bf16.mxu1 %vm182_vm0, %v491_v15 }
  0x2d   :  { %248 = vmatmul.mubr.bf16.gmra.mxu0 %v493_v16  ;;  %280 = vmatmul.mubr.bf16.gmra.mxu1 %v494_v17 }
  0x2e   :  { %417 = vmatprep.mubr.msk.bf16.mxu0 %vm182_vm0, %v495_v18  ;;  %421 = vmatprep.mubr.msk.bf16.mxu1 %vm182_vm0, %v497_v19 }
  0x35   :  { %256 = vmatmul.mubr.bf16.gmra.mxu0 %v499_v20  ;;  %288 = vmatmul.mubr.bf16.gmra.mxu1 %v500_v21 }
  0x36   :  { %418 = vmatprep.mubr.msk.bf16.mxu0 %vm182_vm0, %v501_v22  ;;  %422 = vmatprep.mubr.msk.bf16.mxu1 %vm182_vm0, %v503_v23 }
  0x3d   :  { %264 = vmatmul.mubr.bf16.gmra.mxu0 %v505_v24  ;;  %296 = vmatmul.mubr.bf16.gmra.mxu1 %v506_v25 }
  0xe5   :  { %v241_v27 = vpop.f32.mrf.mxu0  ;;  %v273_v28 = vpop.f32.mrf.mxu1 }
  0xe6   :  { %v242_v29 = vadd.f32 %v614_v26, %v241_v27  ;;  %v274_v30 = vadd.f32 %v614_v26, %v273_v28 }
  0xe7   :  { %v243_v31 = vpop.f32.mrf.mxu0  ;;  %v275_v32 = vpop.f32.mrf.mxu1 }
  0xe8   :  { %v439_v33 = vpack.c.bf16 %v242_v29, %v242_v29  ;;  %v447_v34 = vpack.c.bf16 %v274_v30, %v274_v30 }
  0xe9   :  { %v244_v35 = vpop.f32.mrf.mxu0  ;;  %v276_v36 = vpop.f32.mrf.mxu1 }
  0xea   :  { %369 = vst.msk [vmem:[%s699_s3] sm:$0xf] %vm368_vm1, %v439_v33  ;;  %377 = vst.msk [vmem:[%s699_s3 + $0x20] sm:$0xf] %vm368_vm1, %v447_v34  ;;  %v245_v37 = vadd.f32 %v614_v26, %v244_v35  ;;  %v277_v38 = vadd.f32 %v614_v26, %v276_v36 }
  0xeb   :  { %v246_v39 = vpop.f32.mrf.mxu0  ;;  %v278_v40 = vpop.f32.mrf.mxu1 }
  0xec   :  { %v440_v41 = vpack.c.bf16 %v245_v37, %v245_v37  ;;  %v448_v42 = vpack.c.bf16 %v277_v38, %v277_v38 }
  0xed   :  { %v249_v43 = vpop.f32.mrf.mxu0  ;;  %v281_v44 = vpop.f32.mrf.mxu1 }
  0xee   :  { %370 = vst.msk [vmem:[%s699_s3 + $0x4] sm:$0xf] %vm368_vm1, %v440_v41  ;;  %378 = vst.msk [vmem:[%s699_s3 + $0x24] sm:$0xf] %vm368_vm1, %v448_v42  ;;  %v250_v45 = vadd.f32 %v614_v26, %v249_v43  ;;  %v282_v46 = vadd.f32 %v614_v26, %v281_v44 }
  0xef   :  { %v251_v47 = vpop.f32.mrf.mxu0  ;;  %v283_v48 = vpop.f32.mrf.mxu1 }
  0xf0   :  { %v441_v49 = vpack.c.bf16 %v250_v45, %v250_v45  ;;  %v449_v50 = vpack.c.bf16 %v282_v46, %v282_v46 }
  0xf1   :  { %v252_v51 = vpop.f32.mrf.mxu0  ;;  %v284_v52 = vpop.f32.mrf.mxu1 }
  0xf2   :  { %371 = vst.msk [vmem:[%s699_s3 + $0x8] sm:$0xf] %vm368_vm1, %v441_v49  ;;  %379 = vst.msk [vmem:[%s699_s3 + $0x28] sm:$0xf] %vm368_vm1, %v449_v50  ;;  %v253_v53 = vadd.f32 %v614_v26, %v252_v51  ;;  %v285_v54 = vadd.f32 %v614_v26, %v284_v52 }
  0xf3   :  { %v254_v55 = vpop.f32.mrf.mxu0  ;;  %v286_v56 = vpop.f32.mrf.mxu1 }
  0xf4   :  { %v442_v57 = vpack.c.bf16 %v253_v53, %v253_v53  ;;  %v450_v58 = vpack.c.bf16 %v285_v54, %v285_v54 }
  0xf5   :  { %v257_v59 = vpop.f32.mrf.mxu0  ;;  %v289_v60 = vpop.f32.mrf.mxu1 }
  0xf6   :  { %372 = vst.msk [vmem:[%s699_s3 + $0xc] sm:$0xf] %vm368_vm1, %v442_v57  ;;  %380 = vst.msk [vmem:[%s699_s3 + $0x2c] sm:$0xf] %vm368_vm1, %v450_v58  ;;  %v258_v61 = vadd.f32 %v614_v26, %v257_v59  ;;  %v290_v62 = vadd.f32 %v614_v26, %v289_v60 }
  0xf7   :  { %v259_v63 = vpop.f32.mrf.mxu0  ;;  %v291_v0 = vpop.f32.mrf.mxu1 }
  0xf8   :  { %v443_v1 = vpack.c.bf16 %v258_v61, %v258_v61  ;;  %v451_v2 = vpack.c.bf16 %v290_v62, %v290_v62 }
  0xf9   :  { %v260_v3 = vpop.f32.mrf.mxu0  ;;  %v292_v4 = vpop.f32.mrf.mxu1 }
  0xfa   :  { %373 = vst.msk [vmem:[%s699_s3 + $0x10] sm:$0xf] %vm368_vm1, %v443_v1  ;;  %381 = vst.msk [vmem:[%s699_s3 + $0x30] sm:$0xf] %vm368_vm1, %v451_v2  ;;  %v261_v5 = vadd.f32 %v614_v26, %v260_v3  ;;  %v293_v6 = vadd.f32 %v614_v26, %v292_v4 }
  0xfb   :  { %v262_v7 = vpop.f32.mrf.mxu0  ;;  %v294_v8 = vpop.f32.mrf.mxu1 }
  0xfc   :  { %v444_v9 = vpack.c.bf16 %v261_v5, %v261_v5  ;;  %v452_v10 = vpack.c.bf16 %v293_v6, %v293_v6 }
  0xfd   :  { %v265_v11 = vpop.f32.mrf.mxu0  ;;  %v297_v12 = vpop.f32.mrf.mxu1 }
  0xfe   :  { %374 = vst.msk [vmem:[%s699_s3 + $0x14] sm:$0xf] %vm368_vm1, %v444_v9  ;;  %382 = vst.msk [vmem:[%s699_s3 + $0x34] sm:$0xf] %vm368_vm1, %v452_v10  ;;  %v266_v13 = vadd.f32 %v614_v26, %v265_v11  ;;  %v298_v14 = vadd.f32 %v614_v26, %v297_v12 }
  0xff   :  { %v267_v15 = vpop.f32.mrf.mxu0  ;;  %v299_v16 = vpop.f32.mrf.mxu1 }
 0x100   :  { %v445_v17 = vpack.c.bf16 %v266_v13, %v266_v13  ;;  %v453_v18 = vpack.c.bf16 %v298_v14, %v298_v14 }
 0x101   :  { %v268_v19 = vpop.f32.mrf.mxu0  ;;  %v300_v20 = vpop.f32.mrf.mxu1 }
 0x102   :  { %375 = vst.msk [vmem:[%s699_s3 + $0x18] sm:$0xf] %vm368_vm1, %v445_v17  ;;  %383 = vst.msk [vmem:[%s699_s3 + $0x38] sm:$0xf] %vm368_vm1, %v453_v18  ;;  %v269_v21 = vadd.f32 %v614_v26, %v268_v19  ;;  %v301_v22 = vadd.f32 %v614_v26, %v300_v20 }
 0x103   :  { %v270_v23 = vpop.f32.mrf.mxu0  ;;  %v302_v24 = vpop.f32.mrf.mxu1 }
 0x104   :  { %v446_v25 = vpack.c.bf16 %v269_v21, %v269_v21  ;;  %v454_v27 = vpack.c.bf16 %v301_v22, %v301_v22 }
 0x106   :  { %376 = vst.msk [vmem:[%s699_s3 + $0x1c] sm:$0xf] %vm368_vm1, %v446_v25  ;;  %384 = vst.msk [vmem:[%s699_s3 + $0x3c] sm:$0xf] %vm368_vm1, %v454_v27 }

// kernel: resnet_encoder_forward.16
= control target key start
LH: loop header
LB: loop body
LE: loop exit
PB: predicated region body
PF: predicated region fallthrough
CT: control target
= control target key end

     0   :  { %v267_v0 = vmov 0   ;;  %vm116_vm0 = vcmask 130048   ;;  %vm200_vm3 = vcmask 257024   ;;  %s346_s1 = inlined_call_operand.vmem [shape: bf16[144,32], index: 1, kind: input, shape index: {}]   ;;  %s347_s0 = inlined_call_operand.vmem [shape: bf16[32,144], index: 0, kind: input, shape index: {}]   ;;  %s348_s2 = inlined_call_operand.vmem [shape: f32[1,32], index: 2, kind: input, shape index: {}]   ;;  %s349_s3 = inlined_call_operand.vmem [shape: bf16[32,32], index: 3, kind: output, shape index: {}]  }
   0x1   :  { %123 = vmatprep.subr.bf16.mxu0 %v267_v0  ;;  %233 = vmatprep.subr.bf16.mxu1 %v267_v0  ;;  %v252_v1 = vld [vmem:[%s346_s1 + $0x38] sm:$0xff]   ;;  %v253_v2 = vld [vmem:[%s346_s1 + $0x30] sm:$0xff]   ;;  %v254_v3 = vld [vmem:[%s346_s1 + $0x28] sm:$0xff]  }
   0x2   :  { %124 = vmatpush1.bf16.msra.mxu0 %v252_v1  ;;  %242 = vmatpush1.bf16.msra.mxu1 %v252_v1  ;;  %v255_v4 = vld [vmem:[%s346_s1 + $0x20] sm:$0xff]   ;;  %v266_v6 = vld [vmem:[%s347_s0 + $0x14] ss:$8 sps:$4 sm:$0xff]   ;;  %v258_v9 = vld [vmem:[%s346_s1 + $0x8] sm:$0xff]  }
   0x3   :  { %125 = vmatprep.subr.bf16.mxu0 %v267_v0  ;;  %234 = vmatprep.subr.bf16.mxu1 %v267_v0  ;;  %v263_v5 = vld [vmem:[%s347_s0 + $0x4] ss:$8 sps:$4 sm:$0xff]   ;;  %v256_v7 = vld [vmem:[%s346_s1 + $0x18] sm:$0xff]   ;;  %v257_v8 = vld [vmem:[%s346_s1 + $0x10] sm:$0xff]  }
   0x4   :  { %223 = vmatprep.mubr.msk.bf16.mxu0 %vm116_vm0, %v263_v5  ;;  %224 = vmatprep.mubr.msk.bf16.mxu1 %vm116_vm0, %v266_v6  ;;  %v259_v10 = vld [vmem:[%s346_s1] sm:$0xff]   ;;  %v264_v13 = vld [vmem:[%s347_s0 + $0x10] ss:$8 sps:$4 sm:$0xff]  }
   0x5   :  { %v260_v11 = vld [vmem:[%s346_s1 + $0x40] sm:$0xff]  }
   0x6   :  { %126 = vmatpush1.bf16.msra.mxu0 %v253_v2  ;;  %243 = vmatpush1.bf16.msra.mxu1 %v253_v2  ;;  %v261_v12 = vld [vmem:[%s347_s0] ss:$8 sps:$4 sm:$0xff]  }
   0x7   :  { %127 = vmatprep.subr.bf16.mxu0 %v267_v0  ;;  %235 = vmatprep.subr.bf16.mxu1 %v267_v0  ;;  %v209_v14 = vld [vmem:[%s348_s2] ss:$0 sm:$0xff] }
   0xa   :  { %128 = vmatpush1.bf16.msra.mxu0 %v254_v3  ;;  %244 = vmatpush1.bf16.msra.mxu1 %v254_v3 }
   0xb   :  { %129 = vmatprep.subr.bf16.mxu0 %v267_v0  ;;  %236 = vmatprep.subr.bf16.mxu1 %v267_v0 }
   0xe   :  { %130 = vmatpush1.bf16.msra.mxu0 %v255_v4  ;;  %245 = vmatpush1.bf16.msra.mxu1 %v255_v4 }
   0xf   :  { %131 = vmatprep.subr.bf16.mxu0 %v267_v0  ;;  %237 = vmatprep.subr.bf16.mxu1 %v267_v0 }
  0x12   :  { %132 = vmatpush1.bf16.msra.mxu0 %v256_v7  ;;  %246 = vmatpush1.bf16.msra.mxu1 %v256_v7 }
  0x13   :  { %133 = vmatprep.subr.bf16.mxu0 %v267_v0  ;;  %238 = vmatprep.subr.bf16.mxu1 %v267_v0 }
  0x16   :  { %134 = vmatpush1.bf16.msra.mxu0 %v257_v8  ;;  %247 = vmatpush1.bf16.msra.mxu1 %v257_v8 }
  0x17   :  { %135 = vmatprep.subr.bf16.mxu0 %v267_v0  ;;  %239 = vmatprep.subr.bf16.mxu1 %v267_v0 }
  0x1a   :  { %136 = vmatpush1.bf16.msra.mxu0 %v258_v9  ;;  %248 = vmatpush1.bf16.msra.mxu1 %v258_v9 }
  0x1b   :  { %137 = vmatprep.subr.bf16.mxu0 %v267_v0  ;;  %240 = vmatprep.subr.bf16.mxu1 %v267_v0 }
  0x1e   :  { %138 = vmatpush1.bf16.msra.mxu0 %v259_v10  ;;  %249 = vmatpush1.bf16.msra.mxu1 %v259_v10 }
  0x1f   :  { %153 = vmatprep.subr.bf16.mxu0 %v267_v0  ;;  %241 = vmatprep.subr.bf16.mxu1 %v267_v0 }
  0x22   :  { %154 = vmatpush2.bf16.msra.mxu0 %v260_v11  ;;  %250 = vmatpush2.bf16.msra.mxu1 %v260_v11 }
  0x25   :  { %156 = vmatmul.mubr.bf16.vlgmr.msra.gmra.mxu0 %v261_v12  ;;  %164 = vmatmul.mubr.bf16.vlgmr.msra.gmra.mxu1 %v264_v13 }
  0xe5   :  { %v157_v15 = vpop.f32.mrf.mxu0  ;;  %v165_v16 = vpop.f32.mrf.mxu1 }
  0xe6   :  { %v158_v17 = vadd.f32 %v209_v14, %v157_v15  ;;  %v166_v18 = vadd.f32 %v209_v14, %v165_v16 }
  0xe7   :  { %v159_v19 = vpop.f32.mrf.mxu0  ;;  %v167_v20 = vpop.f32.mrf.mxu1 }
  0xe8   :  { %vm172_vm1 = vcmp.ge.f32.partialorder %v158_v17, 0.0  ;;  %v176_v21 = vmul.f32 0.01, %v158_v17  ;;  %vm174_vm2 = vcmp.ge.f32.partialorder %v166_v18, 0.0  ;;  %v178_v22 = vmul.f32 0.01, %v166_v18 }
  0xe9   :  { %v160_v23 = vpop.f32.mrf.mxu0  ;;  %v168_v24 = vpop.f32.mrf.mxu1 }
  0xea   :  { %v180_v25 = vsel %vm172_vm1, %v158_v17, %v176_v21  ;;  %v182_v26 = vsel %vm174_vm2, %v166_v18, %v178_v22  ;;  %v161_v27 = vadd.f32 %v209_v14, %v160_v23  ;;  %v169_v28 = vadd.f32 %v209_v14, %v168_v24 }
  0xeb   :  { %v229_v29 = vpack.c.bf16 %v180_v25, %v180_v25  ;;  %v231_v30 = vpack.c.bf16 %v182_v26, %v182_v26  ;;  %v162_v31 = vpop.f32.mrf.mxu0  ;;  %v170_v32 = vpop.f32.mrf.mxu1 }
  0xec   :  { %vm173_vm4 = vcmp.ge.f32.partialorder %v161_v27, 0.0  ;;  %v177_v33 = vmul.f32 0.01, %v161_v27  ;;  %vm175_vm5 = vcmp.ge.f32.partialorder %v169_v28, 0.0  ;;  %v179_v34 = vmul.f32 0.01, %v169_v28 }
  0xed   :  { %201 = vst.msk [vmem:[%s349_s3] sm:$0xf] %vm200_vm3, %v229_v29  ;;  %203 = vst.msk [vmem:[%s349_s3 + $0x8] sm:$0xf] %vm200_vm3, %v231_v30 }
  0xee   :  { %v181_v35 = vsel %vm173_vm4, %v161_v27, %v177_v33  ;;  %v183_v36 = vsel %vm175_vm5, %v169_v28, %v179_v34 }
  0xef   :  { %v230_v37 = vpack.c.bf16 %v181_v35, %v181_v35  ;;  %v232_v38 = vpack.c.bf16 %v183_v36, %v183_v36 }
  0xf1   :  { %202 = vst.msk [vmem:[%s349_s3 + $0x4] sm:$0xf] %vm200_vm3, %v230_v37  ;;  %204 = vst.msk [vmem:[%s349_s3 + $0xc] sm:$0xf] %vm200_vm3, %v232_v38 }

// kernel: resnet_encoder_forward.17
= control target key start
LH: loop header
LB: loop body
LE: loop exit
PB: predicated region body
PF: predicated region fallthrough
CT: control target
= control target key end

     0   :  { %v100_v30 = vlaneseq  ;;  %v539_v34 = vmov 1966171168   ;;  %s666_s0 = inlined_call_operand.vmem [shape: bf16[2,512], index: 0, kind: input, shape index: {}]   ;;  %s667_s1 = inlined_call_operand.vmem [shape: bf16[512,8], index: 1, kind: input, shape index: {}]   ;;  %s668_s2 = inlined_call_operand.vmem [shape: f32[1,8], index: 2, kind: input, shape index: {}]   ;;  %s669_s3 = inlined_call_operand.hbm [shape: f32[2,8], index: 3, kind: output, shape index: {}]  }
   0x1   :  { %v485_v0 = vld [vmem:[%s667_s1 + $0x78] sm:$0xff]   ;;  %v489_v4 = vld [vmem:[%s667_s1 + $0x70] sm:$0xff]   ;;  %v493_v8 = vld [vmem:[%s667_s1 + $0x68] sm:$0xff]   ;;  %v98_v35 = vunpack.c.l.s4 %v539_v34 }
   0x2   :  { %v486_v1 = vld [vmem:[%s667_s1 + $0xf8] sm:$0xff]   ;;  %439 = vmatprep.subr.bf16.mxu0 %v485_v0  ;;  %v490_v5 = vld [vmem:[%s667_s1 + $0xf0] sm:$0xff]   ;;  %v494_v9 = vld [vmem:[%s667_s1 + $0xe8] sm:$0xff]   ;;  %v101_v36 = vshrl.u32 %v100_v30, 7 }
   0x3   :  { %v487_v2 = vld [vmem:[%s667_s1 + $0x38] sm:$0xff]   ;;  %461 = vmatprep.subr.bf16.mxu1 %v486_v1  ;;  %v491_v6 = vld [vmem:[%s667_s1 + $0x30] sm:$0xff]   ;;  %v495_v10 = vld [vmem:[%s667_s1 + $0x28] sm:$0xff]  }
   0x4   :  { %v488_v3 = vld [vmem:[%s667_s1 + $0xb8] sm:$0xff]   ;;  %440 = vmatpush3.bf16.msra.mxu0 %v487_v2  ;;  %v492_v7 = vld [vmem:[%s667_s1 + $0xb0] sm:$0xff]   ;;  %v496_v11 = vld [vmem:[%s667_s1 + $0xa8] sm:$0xff]  }
   0x5   :  { %462 = vmatpush3.bf16.msra.mxu1 %v488_v3  ;;  %441 = vmatprep.subr.bf16.mxu0 %v489_v4  ;;  %v497_v12 = vld [vmem:[%s667_s1 + $0x60] sm:$0xff]   ;;  %v501_v16 = vld [vmem:[%s667_s1 + $0x58] sm:$0xff]   ;;  %v505_v20 = vld [vmem:[%s667_s1 + $0x50] sm:$0xff]  }
   0x6   :  { %463 = vmatprep.subr.bf16.mxu1 %v490_v5  ;;  %v498_v13 = vld [vmem:[%s667_s1 + $0xe0] sm:$0xff]   ;;  %v502_v17 = vld [vmem:[%s667_s1 + $0xd8] sm:$0xff]   ;;  %v506_v21 = vld [vmem:[%s667_s1 + $0xd0] sm:$0xff]  }
   0x7   :  { %v499_v14 = vld [vmem:[%s667_s1 + $0x20] sm:$0xff]   ;;  %v503_v18 = vld [vmem:[%s667_s1 + $0x18] sm:$0xff]   ;;  %v507_v22 = vld [vmem:[%s667_s1 + $0x10] sm:$0xff]  }
   0x8   :  { %442 = vmatpush3.bf16.msra.mxu0 %v491_v6  ;;  %v500_v15 = vld [vmem:[%s667_s1 + $0xa0] sm:$0xff]   ;;  %v504_v19 = vld [vmem:[%s667_s1 + $0x98] sm:$0xff]   ;;  %v508_v23 = vld [vmem:[%s667_s1 + $0x90] sm:$0xff]  }
   0x9   :  { %464 = vmatpush3.bf16.msra.mxu1 %v492_v7  ;;  %443 = vmatprep.subr.bf16.mxu0 %v493_v8  ;;  %v509_v24 = vld [vmem:[%s667_s1 + $0x48] sm:$0xff]   ;;  %v513_v28 = vld [vmem:[%s667_s1 + $0x40] sm:$0xff]  }
   0xa   :  { %465 = vmatprep.subr.bf16.mxu1 %v494_v9  ;;  %v510_v25 = vld [vmem:[%s667_s1 + $0xc8] sm:$0xff]   ;;  %v514_v29 = vld [vmem:[%s667_s1 + $0xc0] sm:$0xff]  }
   0xb   :  { %v511_v26 = vld [vmem:[%s667_s1 + $0x8] sm:$0xff]   ;;  %v515_v31 = vld [vmem:[%s667_s1] sm:$0xff]  }
   0xc   :  { %444 = vmatpush3.bf16.msra.mxu0 %v495_v10  ;;  %v512_v27 = vld [vmem:[%s667_s1 + $0x88] sm:$0xff]   ;;  %v516_v32 = vld [vmem:[%s667_s1 + $0x80] sm:$0xff]  }
   0xd   :  { %466 = vmatpush3.bf16.msra.mxu1 %v496_v11  ;;  %445 = vmatprep.subr.bf16.mxu0 %v497_v12  ;;  %v406_v33 = vld.sshfl [vmem:[%s666_s0] sm:$0x33 pattern:$0x75316420] }
   0xe   :  { %467 = vmatprep.subr.bf16.mxu1 %v498_v13 }
  0x10   :  { %446 = vmatpush3.bf16.msra.mxu0 %v499_v14 }
  0x11   :  { %468 = vmatpush3.bf16.msra.mxu1 %v500_v15  ;;  %447 = vmatprep.subr.bf16.mxu0 %v501_v16 }
  0x12   :  { %469 = vmatprep.subr.bf16.mxu1 %v502_v17 }
  0x14   :  { %448 = vmatpush3.bf16.msra.mxu0 %v503_v18 }
  0x15   :  { %470 = vmatpush3.bf16.msra.mxu1 %v504_v19  ;;  %449 = vmatprep.subr.bf16.mxu0 %v505_v20 }
  0x16   :  { %471 = vmatprep.subr.bf16.mxu1 %v506_v21 }
  0x18   :  { %450 = vmatpush3.bf16.msra.mxu0 %v507_v22 }
  0x19   :  { %472 = vmatpush3.bf16.msra.mxu1 %v508_v23  ;;  %451 = vmatprep.subr.bf16.mxu0 %v509_v24 }
  0x1a   :  { %473 = vmatprep.subr.bf16.mxu1 %v510_v25 }
  0x1c   :  { %452 = vmatpush3.bf16.msra.mxu0 %v511_v26 }
  0x1d   :  { %474 = vmatpush3.bf16.msra.mxu1 %v512_v27  ;;  %453 = vmatprep.subr.bf16.mxu0 %v513_v28 }
  0x1e   :  { %475 = vmatprep.subr.bf16.mxu1 %v514_v29 }
  0x20   :  { %454 = vmatpush3.bf16.msra.mxu0 %v515_v31 }
  0x21   :  { %476 = vmatpush3.bf16.msra.mxu1 %v516_v32 }
  0x22   :  { %8 = vsyncpa [#allocation3], 0  ;;  %v96_v37 = vcombine.high %v406_v33, %v406_v33  ;;  %v99_v38 = vunpack.c.0.s8 %v98_v35  ;;  %v405_v46 = vld [vmem:[%s668_s2] ss:$0 sm:$0xff]  ;;  %s540_s24 = smov [#allocation2]   ;;  %vm389_vm0 = vcmask 58368  }
  0x23   :  { %s397_s25 = sshll.u32 %s540_s24, 4  ;;  %s398_s25 = int_to_ptr.vmem [resolvable:$true] %s397_s25 }
  0x24   :  { %v102_v39 = vsub.s32 %v99_v38, %v101_v36  ;;  %s517_s26 = scalar_lea.vmem %s398_s25, 32  ;;  %p522_p1 = scmp.lt.s32.totalorder %s398_s25, %s398_s25 }
  0x25   :  { %p518_p0 = scmp.ne.s32.totalorder %s398_s25, %s517_s26  ;;  %p523_p2 = scmp.lt.s32.totalorder %s517_s26, %s517_s26 }
  0x26   :  { %v110_v40 = vrot.slane %v96_v37, %v102_v39  ;;  %v103_v41 = vrot.slane %v406_v33, %v102_v39 }
  0x27   :  { %p524_p3 = por %p523_p2, %p522_p1 }
  0x28   :  { %341 = vmatprep.mubr.bf16.mxu0 %v110_v40  ;;  %v112_v42 = vcombine.high %v110_v40, %v110_v40  ;;  %v111_v43 = vcombine.high %v103_v41, %v103_v41 }
  0x29   :  { %342 = vmatmul.mubr.bf16.vlgmr.msra.gmra.mxu0 %v103_v41  ;;  %p525_p4 = pnand %p524_p3, %p518_p0 }
  0x2a   :  { %381 = vmatprep.mubr.bf16.mxu1 %v112_v42 }
  0x2b   :  { %382 = vmatmul.mubr.bf16.vlgmr.msra.gmra.mxu1 %v111_v43 }
  0xe9   :  { %v455_v44 = vpop.f32.mrf.mxu0 }
  0xeb   :  { %v477_v45 = vpop.f32.mrf.mxu1  ;;  %v456_v47 = vpop.f32.mrf.mxu0 }
  0xec   :  { %v457_v48 = vadd.f32 %v456_v47, %v455_v44 }
  0xed   :  { %v478_v49 = vpop.f32.mrf.mxu1  ;;  %v458_v50 = vpop.f32.mrf.mxu0 }
  0xee   :  { %v344_v51 = vadd.f32 %v457_v48, %v405_v46  ;;  %v479_v52 = vadd.f32 %v478_v49, %v477_v45 }
  0xef   :  { %v480_v53 = vpop.f32.mrf.mxu1  ;;  %v459_v54 = vpop.f32.mrf.mxu0 }
  0xf0   :  { %v384_v55 = vadd.f32 %v479_v52, %v344_v51 }
  0xf1   :  { %v481_v56 = vpop.f32.mrf.mxu1 }
  0xf2   :  { %390 = vst.msk [vmem:[#allocation2] sm:$0x3] %vm389_vm0, %v384_v55 }
  0xf3   :  { %528 = shalt.err (!%p525_p4)
}
  0xf4   :  { %400 = dma.vmem_to_hbm [thread:$0]  %s398_s25, 32, %s669_s3, [#allocation3]  }
  0xf5   :  { %537 = dma.done.wait [#allocation3], 32  }
  0xf6   :  { %538 = vsyncadd [#allocation3], 4294967264 }
  0xf7   :  { %404 = vsyncpa [#allocation3], 1 }

</bundles_post_ra>
